<compile_context>
chip_gen: v7x
topology: tpu7x:2x2x1
jax: 0.10.0
libtpu: 0.0.40
codegen_flags: <defaults>
</compile_context>

<pallas_src>
import jax
import jax.numpy as jnp
from jax.experimental import pallas as pl
from jax.experimental.pallas import tpu as pltpu

N, CIN, H, W = 2, 3, 16, 16
COUT = 32
EPS = 1e-5


# ---------------------------------------------------------------------------
# Fused kernel: conv3x3 (one K=32 matmul) -> bilinear x2 -> BatchNorm (batch
# stats, one-pass) -> relu / concat / sigmoid, all in VMEM.
# Output: (2, N, H, W, 4*COUT); leading axis = upsampled-row parity,
# lanes = [relu_even(32) | raw_even(32) | relu_odd(32) | raw_odd(32)].
# ---------------------------------------------------------------------------
def fused_kernel(x_ref, w_ref, g_ref, b_ref, o_ref):
    _, n, h, wdim, c4 = o_ref.shape            # (2, N, H, W, 4*COUT)
    cnt = float(n * (2 * h) * (2 * wdim))      # N * 2H * 2W

    # ---------------- conv 3x3 (pad=1, no bias): single MXU matmul -----------
    # x_ref: (N*H*W, 32) im2col (taps ordered (kh, kw, cin), zero-padded 27->32)
    # w_ref: (32, 4*COUT) with out channels tiled x4.
    y = jnp.dot(x_ref[...], w_ref[...], preferred_element_type=jnp.float32)
    y = y.reshape(n, h, wdim, c4)              # free split of the leading dim

    # ---------------- bilinear x2 upsample, align_corners=False --------------
    # rows: edge-clamped neighbours via slab-granular concats (no masks)
    y_hm = jnp.concatenate([y[:, :1], y[:, :-1]], axis=1)     # y[h-1] (clamped)
    y_hp = jnp.concatenate([y[:, 1:], y[:, -1:]], axis=1)     # y[h+1] (clamped)
    r_e = 0.25 * y_hm + 0.75 * y                               # output rows 2i
    r_o = 0.75 * y + 0.25 * y_hp                               # output rows 2i+1

    # single tiny lane-index vreg reused for both lane masks
    lane = jax.lax.broadcasted_iota(jnp.int32, (1, 1, 1, c4), 3)
    odd_col = lane >= (c4 // 2)                    # lane blocks 2,3 = odd output cols
    half = jnp.where((lane % (c4 // 2)) < (c4 // 4), 0.5, 0.0)  # 0.5 on relu lanes

    def col_upsample(r):
        # columns: edge-clamped neighbours; even-col lanes take w-1, odd-col w+1
        r_wm = jnp.concatenate([r[:, :, :1], r[:, :, :-1]], axis=2)
        r_wp = jnp.concatenate([r[:, :, 1:], r[:, :, -1:]], axis=2)
        return 0.75 * r + 0.25 * jnp.where(odd_col, r_wp, r_wm)

    u_e = col_upsample(r_e)                        # even upsampled rows
    u_o = col_upsample(r_o)                        # odd upsampled rows

    # ---------------- BatchNorm2d, training-mode batch stats (one pass) ------
    s = (jnp.sum(u_e, axis=(0, 1, 2), keepdims=True)
         + jnp.sum(u_o, axis=(0, 1, 2), keepdims=True))
    ss = (jnp.sum(u_e * u_e, axis=(0, 1, 2), keepdims=True)
          + jnp.sum(u_o * u_o, axis=(0, 1, 2), keepdims=True))
    # combine even-col / odd-col lane blocks (64 lanes apart)
    mean = (s + pltpu.roll(s, c4 // 2, axis=3)) * (1.0 / cnt)
    ex2 = (ss + pltpu.roll(ss, c4 // 2, axis=3)) * (1.0 / cnt)
    var = ex2 - mean * mean
    scale = g_ref[...] * jax.lax.rsqrt(var + EPS)
    shift = b_ref[...] - mean * scale

    def finish(u):
        sg = jax.nn.sigmoid(u * scale + shift)
        # sigmoid(relu(x)) == max(sigmoid(x), 0.5); raw lanes: max(sg, 0) == sg
        return jnp.maximum(sg, half)

    o_ref[0] = finish(u_e)
    o_ref[1] = finish(u_o)


# ---------------------------------------------------------------------------
# Wrapper: im2col + weight K-packing in XLA, one pallas_call, one final
# (fused) XLA permutation copy to NCHW.
# ---------------------------------------------------------------------------
@jax.jit
def forward(x_nchw, w_oihw, gamma, beta):
    n, cin, h, w = x_nchw.shape
    cout = w_oihw.shape[0]
    c4 = 4 * cout
    kdim = 32                                   # 3*3*cin = 27 taps, padded to 32

    # ---- im2col in the wrapper: (N*H*W, 32), taps ordered (kh, kw, cin) -----
    x_nhwc = jnp.transpose(x_nchw, (0, 2, 3, 1)).astype(jnp.float32)
    xpad = jnp.pad(x_nhwc, ((0, 0), (1, 1), (1, 1), (0, 0)))
    patches = jnp.concatenate(
        [xpad[:, kh:kh + h, kw:kw + w, :] for kh in range(3) for kw in range(3)],
        axis=-1)                                               # (N, H, W, 27)
    patches = jnp.pad(patches, ((0, 0), (0, 0), (0, 0), (0, kdim - 9 * cin)))
    x2d = patches.reshape(n * h * w, kdim)

    # ---- weights: (kh, kw, cin, cout) -> (32, 4*COUT), out channels tiled x4
    wk = jnp.transpose(w_oihw, (2, 3, 1, 0)).astype(jnp.float32)   # (3,3,CIN,COUT)
    wk = jnp.tile(wk, (1, 1, 1, 4)).reshape(9 * cin, c4)
    wk = jnp.pad(wk, ((0, kdim - 9 * cin), (0, 0)))                # (32, 4*COUT)

    g4 = jnp.tile(gamma.astype(jnp.float32).reshape(1, 1, 1, cout), (1, 1, 1, 4))
    b4 = jnp.tile(beta.astype(jnp.float32).reshape(1, 1, 1, cout), (1, 1, 1, 4))

    out = pl.pallas_call(
        fused_kernel,
        out_shape=jax.ShapeDtypeStruct((2, n, h, w, c4), jnp.float32),
        grid=(1,),
        in_specs=[
            pl.BlockSpec((n * h * w, kdim), lambda i: (0, 0)),
            pl.BlockSpec((kdim, c4), lambda i: (0, 0)),
            pl.BlockSpec((1, 1, 1, c4), lambda i: (0, 0, 0, 0)),
            pl.BlockSpec((1, 1, 1, c4), lambda i: (0, 0, 0, 0)),
        ],
        out_specs=pl.BlockSpec((2, n, h, w, c4), lambda i: (0, 0, 0, 0, 0)),
        # NOTE(v7x): grid=(1,) uses one TensorCore; fine at this size, split the
        # grid (stats-then-normalize) only if N/H/W grow.
        compiler_params=pltpu.CompilerParams(
            dimension_semantics=("arbitrary",)),
    )(x2d, wk, g4, b4)

    # (rp, n, h, w, cp, ch) -> (n, ch, 2h+rp, 2w+cp): free reshapes + ONE fused
    # XLA permutation copy (see TODO at top about leaving this in the wrapper).
    t = out.reshape(2, n, h, w, 2, 2 * cout)
    nchw = jnp.transpose(t, (1, 5, 2, 0, 3, 4)).reshape(n, 2 * cout, 2 * h, 2 * w)
    return nchw


# ---------------------------------------------------------------------------
# Pure-JAX reference for validation
# ---------------------------------------------------------------------------
def ref_forward(x_nchw, w_oihw, gamma, beta):
    y = jax.lax.conv_general_dilated(
        x_nchw.astype(jnp.float32), w_oihw.astype(jnp.float32),
        window_strides=(1, 1), padding='SAME',
        dimension_numbers=('NCHW', 'OIHW', 'NCHW'))
    n, c, h, w = y.shape
    up = jax.image.resize(y, (n, c, 2 * h, 2 * w), method='bilinear')
    mean = jnp.mean(up, axis=(0, 2, 3), keepdims=True)
    var = jnp.mean((up - mean) ** 2, axis=(0, 2, 3), keepdims=True)
    bn = ((up - mean) * jax.lax.rsqrt(var + EPS)
          * gamma.reshape(1, -1, 1, 1) + beta.reshape(1, -1, 1, 1))
    cat = jnp.concatenate([jnp.maximum(bn, 0.0), bn], axis=1)
    return jax.nn.sigmoid(cat)


if __name__ == "__main__":
    key = jax.random.PRNGKey(0)
    k1, k2, k3, k4 = jax.random.split(key, 4)
    # deterministic synthetic parameters (shapes from the module's __init__)
    x = jax.random.normal(k1, (N, CIN, H, W), jnp.float32)                 # NCHW like PyTorch
    conv_w = 0.1 * jax.random.normal(k2, (COUT, CIN, 3, 3), jnp.float32)   # OIHW
    gamma = 1.0 + 0.1 * jax.random.normal(k3, (COUT,), jnp.float32)
    beta = 0.1 * jax.random.normal(k4, (COUT,), jnp.float32)
    # TODO(synk): BatchNorm running-stat updates (a training-mode side effect)
    # are not reproduced; they do not affect the forward output.

    out = jax.block_until_ready(forward(x, conv_w, gamma, beta))
    ref = jax.block_until_ready(ref_forward(x, conv_w, gamma, beta))

    assert out.shape == (N, 2 * COUT, 2 * H, 2 * W), out.shape
    assert out.dtype == jnp.float32
    max_err = float(jnp.max(jnp.abs(out - ref)))
    assert max_err < 1e-3, f"max abs error vs reference: {max_err}"
    print("KERNEL_OK")
</pallas_src>

<mosaic_0001>
module attributes {stable_mosaic.version = 11 : i64} {
  func.func @fused_kernel(%arg0: i32, %arg1: memref<512x32xf32, #tpu.memory_space<vmem>>, %arg2: memref<32x128xf32, #tpu.memory_space<vmem>>, %arg3: memref<1x1x1x128xf32, #tpu.memory_space<vmem>>, %arg4: memref<1x1x1x128xf32, #tpu.memory_space<vmem>>, %arg5: memref<2x2x16x16x128xf32, #tpu.memory_space<vmem>>) attributes {dimension_semantics = [#tpu.dimension_semantics<arbitrary>], iteration_bounds = array<i64: 1>, scalar_prefetch = 0 : i64, scratch_operands = 0 : i64, tpu.core_type = #tpu.core_type<tc>, window_params = [{pipeline_mode = #tpu.pipeline_mode<synchronous>, transform_indices = @transform_0, window_bounds = array<i64: 512, 32>}, {pipeline_mode = #tpu.pipeline_mode<synchronous>, transform_indices = @transform_1, window_bounds = array<i64: 32, 128>}, {pipeline_mode = #tpu.pipeline_mode<synchronous>, transform_indices = @transform_2, window_bounds = array<i64: 1, 1, 1, 128>}, {pipeline_mode = #tpu.pipeline_mode<synchronous>, transform_indices = @transform_3, window_bounds = array<i64: 1, 1, 1, 128>}, {pipeline_mode = #tpu.pipeline_mode<synchronous>, transform_indices = @transform_4, window_bounds = array<i64: 2, 2, 16, 16, 128>}]} {
    %c0 = arith.constant 0 : index
    %c0_0 = arith.constant 0 : index
    %0 = vector.load %arg1[%c0, %c0_0] : memref<512x32xf32, #tpu.memory_space<vmem>>, vector<512x32xf32>
    %c0_1 = arith.constant 0 : index
    %c0_2 = arith.constant 0 : index
    %1 = vector.load %arg2[%c0_1, %c0_2] : memref<32x128xf32, #tpu.memory_space<vmem>>, vector<32x128xf32>
    %cst = arith.constant dense<0.000000e+00> : vector<512x128xf32>
    %2 = tpu.matmul %0, %1, %cst {dimension_numbers = #tpu.dot_dimension_numbers<[1], [0], [0], [1], [0, 0, 1, 1], [], []>} : vector<512x32xf32>, vector<32x128xf32>, vector<512x128xf32> -> vector<512x128xf32>
    %3 = vector.shape_cast %2 : vector<512x128xf32> to vector<2x16x16x128xf32>
    %4 = vector.extract_strided_slice %3 {offsets = [0, 0, 0, 0], sizes = [2, 1, 16, 128], strides = [1, 1, 1, 1]} : vector<2x16x16x128xf32> to vector<2x1x16x128xf32>
    %5 = vector.extract_strided_slice %3 {offsets = [0, 0, 0, 0], sizes = [2, 15, 16, 128], strides = [1, 1, 1, 1]} : vector<2x16x16x128xf32> to vector<2x15x16x128xf32>
    %6 = tpu.concatenate %4, %5 in 1 : vector<2x1x16x128xf32>, vector<2x15x16x128xf32> -> vector<2x16x16x128xf32>
    %7 = vector.extract_strided_slice %3 {offsets = [0, 1, 0, 0], sizes = [2, 15, 16, 128], strides = [1, 1, 1, 1]} : vector<2x16x16x128xf32> to vector<2x15x16x128xf32>
    %8 = vector.extract_strided_slice %3 {offsets = [0, 15, 0, 0], sizes = [2, 1, 16, 128], strides = [1, 1, 1, 1]} : vector<2x16x16x128xf32> to vector<2x1x16x128xf32>
    %9 = tpu.concatenate %7, %8 in 1 : vector<2x15x16x128xf32>, vector<2x1x16x128xf32> -> vector<2x16x16x128xf32>
    %cst_3 = arith.constant 2.500000e-01 : f32
    %10 = vector.broadcast %cst_3 : f32 to vector<2x16x16x128xf32>
    %11 = arith.mulf %10, %6 : vector<2x16x16x128xf32>
    %cst_4 = arith.constant 7.500000e-01 : f32
    %12 = vector.broadcast %cst_4 : f32 to vector<2x16x16x128xf32>
    %13 = arith.mulf %12, %3 : vector<2x16x16x128xf32>
    %14 = arith.addf %11, %13 : vector<2x16x16x128xf32>
    %cst_5 = arith.constant 7.500000e-01 : f32
    %15 = vector.broadcast %cst_5 : f32 to vector<2x16x16x128xf32>
    %16 = arith.mulf %15, %3 : vector<2x16x16x128xf32>
    %cst_6 = arith.constant 2.500000e-01 : f32
    %17 = vector.broadcast %cst_6 : f32 to vector<2x16x16x128xf32>
    %18 = arith.mulf %17, %9 : vector<2x16x16x128xf32>
    %19 = arith.addf %16, %18 : vector<2x16x16x128xf32>
    %20 = tpu.iota {dimensions = array<i32: 3>} : vector<1x1x1x128xi32>
    %c64_i32 = arith.constant 64 : i32
    %21 = vector.broadcast %c64_i32 : i32 to vector<1x1x1x128xi32>
    %22 = arith.cmpi sge, %20, %21 : vector<1x1x1x128xi32>
    %c64_i32_7 = arith.constant 64 : i32
    %c0_i32 = arith.constant 0 : i32
    %23 = arith.cmpi eq, %c64_i32_7, %c0_i32 : i32
    %c1_i32 = arith.constant 1 : i32
    %24 = arith.select %23, %c1_i32, %c64_i32_7 : i32
    %25 = vector.broadcast %24 : i32 to vector<1x1x1x128xi32>
    %26 = arith.remsi %20, %25 : vector<1x1x1x128xi32>
    %c0_i32_8 = arith.constant 0 : i32
    %27 = vector.broadcast %c0_i32_8 : i32 to vector<1x1x1x128xi32>
    %28 = arith.cmpi ne, %26, %27 : vector<1x1x1x128xi32>
    %c0_i32_9 = arith.constant 0 : i32
    %29 = vector.broadcast %c0_i32_9 : i32 to vector<1x1x1x128xi32>
    %30 = arith.cmpi slt, %26, %29 : vector<1x1x1x128xi32>
    %c0_i32_10 = arith.constant 0 : i32
    %31 = arith.cmpi slt, %24, %c0_i32_10 : i32
    %32 = vector.broadcast %31 : i1 to vector<1x1x1x128xi1>
    %33 = vector.broadcast %32 : vector<1x1x1x128xi1> to vector<1x1x1x128xi1>
    %34 = arith.xori %30, %33 : vector<1x1x1x128xi1>
    %35 = arith.andi %34, %28 : vector<1x1x1x128xi1>
    %36 = vector.broadcast %24 : i32 to vector<1x1x1x128xi32>
    %37 = arith.addi %26, %36 : vector<1x1x1x128xi32>
    %38 = arith.select %35, %37, %26 : vector<1x1x1x128xi1>, vector<1x1x1x128xi32>
    %c32_i32 = arith.constant 32 : i32
    %39 = vector.broadcast %c32_i32 : i32 to vector<1x1x1x128xi32>
    %40 = arith.cmpi slt, %38, %39 : vector<1x1x1x128xi32>
    %cst_11 = arith.constant 5.000000e-01 : f32
    %cst_12 = arith.constant 0.000000e+00 : f32
    %41 = vector.broadcast %cst_11 : f32 to vector<1x1x1x128xf32>
    %42 = vector.broadcast %cst_12 : f32 to vector<1x1x1x128xf32>
    %43 = arith.select %40, %41, %42 : vector<1x1x1x128xi1>, vector<1x1x1x128xf32>
    %44 = vector.extract_strided_slice %14 {offsets = [0, 0, 0, 0], sizes = [2, 16, 1, 128], strides = [1, 1, 1, 1]} : vector<2x16x16x128xf32> to vector<2x16x1x128xf32>
    %45 = vector.extract_strided_slice %14 {offsets = [0, 0, 0, 0], sizes = [2, 16, 15, 128], strides = [1, 1, 1, 1]} : vector<2x16x16x128xf32> to vector<2x16x15x128xf32>
    %46 = tpu.concatenate %44, %45 in 2 : vector<2x16x1x128xf32>, vector<2x16x15x128xf32> -> vector<2x16x16x128xf32>
    %47 = vector.extract_strided_slice %14 {offsets = [0, 0, 1, 0], sizes = [2, 16, 15, 128], strides = [1, 1, 1, 1]} : vector<2x16x16x128xf32> to vector<2x16x15x128xf32>
    %48 = vector.extract_strided_slice %14 {offsets = [0, 0, 15, 0], sizes = [2, 16, 1, 128], strides = [1, 1, 1, 1]} : vector<2x16x16x128xf32> to vector<2x16x1x128xf32>
    %49 = tpu.concatenate %47, %48 in 2 : vector<2x16x15x128xf32>, vector<2x16x1x128xf32> -> vector<2x16x16x128xf32>
    %cst_13 = arith.constant 7.500000e-01 : f32
    %50 = vector.broadcast %cst_13 : f32 to vector<2x16x16x128xf32>
    %51 = arith.mulf %50, %14 : vector<2x16x16x128xf32>
    %52 = vector.shape_cast %22 : vector<1x1x1x128xi1> to vector<1x1x1x128xi1>
    %53 = vector.broadcast %52 : vector<1x1x1x128xi1> to vector<2x16x16x128xi1>
    %54 = arith.select %53, %49, %46 : vector<2x16x16x128xi1>, vector<2x16x16x128xf32>
    %cst_14 = arith.constant 2.500000e-01 : f32
    %55 = vector.broadcast %cst_14 : f32 to vector<2x16x16x128xf32>
    %56 = arith.mulf %55, %54 : vector<2x16x16x128xf32>
    %57 = arith.addf %51, %56 : vector<2x16x16x128xf32>
    %58 = vector.extract_strided_slice %19 {offsets = [0, 0, 0, 0], sizes = [2, 16, 1, 128], strides = [1, 1, 1, 1]} : vector<2x16x16x128xf32> to vector<2x16x1x128xf32>
    %59 = vector.extract_strided_slice %19 {offsets = [0, 0, 0, 0], sizes = [2, 16, 15, 128], strides = [1, 1, 1, 1]} : vector<2x16x16x128xf32> to vector<2x16x15x128xf32>
    %60 = tpu.concatenate %58, %59 in 2 : vector<2x16x1x128xf32>, vector<2x16x15x128xf32> -> vector<2x16x16x128xf32>
    %61 = vector.extract_strided_slice %19 {offsets = [0, 0, 1, 0], sizes = [2, 16, 15, 128], strides = [1, 1, 1, 1]} : vector<2x16x16x128xf32> to vector<2x16x15x128xf32>
    %62 = vector.extract_strided_slice %19 {offsets = [0, 0, 15, 0], sizes = [2, 16, 1, 128], strides = [1, 1, 1, 1]} : vector<2x16x16x128xf32> to vector<2x16x1x128xf32>
    %63 = tpu.concatenate %61, %62 in 2 : vector<2x16x15x128xf32>, vector<2x16x1x128xf32> -> vector<2x16x16x128xf32>
    %cst_15 = arith.constant 7.500000e-01 : f32
    %64 = vector.broadcast %cst_15 : f32 to vector<2x16x16x128xf32>
    %65 = arith.mulf %64, %19 : vector<2x16x16x128xf32>
    %66 = vector.shape_cast %22 : vector<1x1x1x128xi1> to vector<1x1x1x128xi1>
    %67 = vector.broadcast %66 : vector<1x1x1x128xi1> to vector<2x16x16x128xi1>
    %68 = arith.select %67, %63, %60 : vector<2x16x16x128xi1>, vector<2x16x16x128xf32>
    %cst_16 = arith.constant 2.500000e-01 : f32
    %69 = vector.broadcast %cst_16 : f32 to vector<2x16x16x128xf32>
    %70 = arith.mulf %69, %68 : vector<2x16x16x128xf32>
    %71 = arith.addf %65, %70 : vector<2x16x16x128xf32>
    %cst_17 = arith.constant dense<0.000000e+00> : vector<128xf32>
    %72 = vector.multi_reduction <add>, %57, %cst_17 [0, 1, 2] : vector<2x16x16x128xf32> to vector<128xf32>
    %73 = vector.shape_cast %72 : vector<128xf32> to vector<1x1x1x128xf32>
    %cst_18 = arith.constant dense<0.000000e+00> : vector<128xf32>
    %74 = vector.multi_reduction <add>, %71, %cst_18 [0, 1, 2] : vector<2x16x16x128xf32> to vector<128xf32>
    %75 = vector.shape_cast %74 : vector<128xf32> to vector<1x1x1x128xf32>
    %76 = arith.addf %73, %75 : vector<1x1x1x128xf32>
    %77 = arith.mulf %57, %57 : vector<2x16x16x128xf32>
    %cst_19 = arith.constant dense<0.000000e+00> : vector<128xf32>
    %78 = vector.multi_reduction <add>, %77, %cst_19 [0, 1, 2] : vector<2x16x16x128xf32> to vector<128xf32>
    %79 = vector.shape_cast %78 : vector<128xf32> to vector<1x1x1x128xf32>
    %80 = arith.mulf %71, %71 : vector<2x16x16x128xf32>
    %cst_20 = arith.constant dense<0.000000e+00> : vector<128xf32>
    %81 = vector.multi_reduction <add>, %80, %cst_20 [0, 1, 2] : vector<2x16x16x128xf32> to vector<128xf32>
    %82 = vector.shape_cast %81 : vector<128xf32> to vector<1x1x1x128xf32>
    %83 = arith.addf %79, %82 : vector<1x1x1x128xf32>
    %c64_i32_21 = arith.constant 64 : i32
    %84 = tpu.dynamic_rotate %76 by %c64_i32_21 dim 3 : vector<1x1x1x128xf32>, i32 -> vector<1x1x1x128xf32>
    %85 = arith.addf %76, %84 : vector<1x1x1x128xf32>
    %cst_22 = arith.constant 4.8828125E-4 : f32
    %86 = vector.broadcast %cst_22 : f32 to vector<1x1x1x128xf32>
    %87 = arith.mulf %85, %86 : vector<1x1x1x128xf32>
    %c64_i32_23 = arith.constant 64 : i32
    %88 = tpu.dynamic_rotate %83 by %c64_i32_23 dim 3 : vector<1x1x1x128xf32>, i32 -> vector<1x1x1x128xf32>
    %89 = arith.addf %83, %88 : vector<1x1x1x128xf32>
    %cst_24 = arith.constant 4.8828125E-4 : f32
    %90 = vector.broadcast %cst_24 : f32 to vector<1x1x1x128xf32>
    %91 = arith.mulf %89, %90 : vector<1x1x1x128xf32>
    %92 = arith.mulf %87, %87 : vector<1x1x1x128xf32>
    %93 = arith.subf %91, %92 : vector<1x1x1x128xf32>
    %c0_25 = arith.constant 0 : index
    %c0_26 = arith.constant 0 : index
    %c0_27 = arith.constant 0 : index
    %c0_28 = arith.constant 0 : index
    %94 = vector.load %arg3[%c0_25, %c0_26, %c0_27, %c0_28] : memref<1x1x1x128xf32, #tpu.memory_space<vmem>>, vector<1x1x1x128xf32>
    %cst_29 = arith.constant 9.99999974E-6 : f32
    %95 = vector.broadcast %cst_29 : f32 to vector<1x1x1x128xf32>
    %96 = arith.addf %93, %95 : vector<1x1x1x128xf32>
    %97 = math.rsqrt %96 : vector<1x1x1x128xf32>
    %98 = arith.mulf %94, %97 : vector<1x1x1x128xf32>
    %c0_30 = arith.constant 0 : index
    %c0_31 = arith.constant 0 : index
    %c0_32 = arith.constant 0 : index
    %c0_33 = arith.constant 0 : index
    %99 = vector.load %arg4[%c0_30, %c0_31, %c0_32, %c0_33] : memref<1x1x1x128xf32, #tpu.memory_space<vmem>>, vector<1x1x1x128xf32>
    %100 = arith.mulf %87, %98 : vector<1x1x1x128xf32>
    %101 = arith.subf %99, %100 : vector<1x1x1x128xf32>
    %102 = vector.broadcast %98 : vector<1x1x1x128xf32> to vector<2x16x16x128xf32>
    %103 = arith.mulf %57, %102 : vector<2x16x16x128xf32>
    %104 = vector.broadcast %101 : vector<1x1x1x128xf32> to vector<2x16x16x128xf32>
    %105 = arith.addf %103, %104 : vector<2x16x16x128xf32>
    %106 = arith.negf %105 : vector<2x16x16x128xf32>
    %107 = math.exp %106 : vector<2x16x16x128xf32>
    %cst_34 = arith.constant 1.000000e+00 : f32
    %108 = vector.broadcast %cst_34 : f32 to vector<2x16x16x128xf32>
    %109 = arith.addf %108, %107 : vector<2x16x16x128xf32>
    %110 = arith.divf %108, %109 : vector<2x16x16x128xf32>
    %111 = vector.broadcast %43 : vector<1x1x1x128xf32> to vector<2x16x16x128xf32>
    %112 = arith.maximumf %110, %111 : vector<2x16x16x128xf32>
    %c0_35 = arith.constant 0 : index
    %c0_36 = arith.constant 0 : index
    %c0_37 = arith.constant 0 : index
    %c0_38 = arith.constant 0 : index
    %c0_39 = arith.constant 0 : index
    %113 = vector.load %arg5[%c0_35, %c0_36, %c0_37, %c0_38, %c0_39] : memref<2x2x16x16x128xf32, #tpu.memory_space<vmem>>, vector<1x2x16x16x128xf32>
    %114 = vector.shape_cast %113 : vector<1x2x16x16x128xf32> to vector<2x16x16x128xf32>
    %115 = vector.shape_cast %112 : vector<2x16x16x128xf32> to vector<1x2x16x16x128xf32>
    tpu.vector_store %arg5[%c0_35, %c0_36, %c0_37, %c0_38, %c0_39], %115 {strides = array<i32>} : memref<2x2x16x16x128xf32, #tpu.memory_space<vmem>>, vector<1x2x16x16x128xf32>,
    %116 = vector.broadcast %98 : vector<1x1x1x128xf32> to vector<2x16x16x128xf32>
    %117 = arith.mulf %71, %116 : vector<2x16x16x128xf32>
    %118 = vector.broadcast %101 : vector<1x1x1x128xf32> to vector<2x16x16x128xf32>
    %119 = arith.addf %117, %118 : vector<2x16x16x128xf32>
    %120 = arith.negf %119 : vector<2x16x16x128xf32>
    %121 = math.exp %120 : vector<2x16x16x128xf32>
    %cst_40 = arith.constant 1.000000e+00 : f32
    %122 = vector.broadcast %cst_40 : f32 to vector<2x16x16x128xf32>
    %123 = arith.addf %122, %121 : vector<2x16x16x128xf32>
    %124 = arith.divf %122, %123 : vector<2x16x16x128xf32>
    %125 = vector.broadcast %43 : vector<1x1x1x128xf32> to vector<2x16x16x128xf32>
    %126 = arith.maximumf %124, %125 : vector<2x16x16x128xf32>
    %c1 = arith.constant 1 : index
    %c0_41 = arith.constant 0 : index
    %c0_42 = arith.constant 0 : index
    %c0_43 = arith.constant 0 : index
    %c0_44 = arith.constant 0 : index
    %127 = vector.load %arg5[%c1, %c0_41, %c0_42, %c0_43, %c0_44] : memref<2x2x16x16x128xf32, #tpu.memory_space<vmem>>, vector<1x2x16x16x128xf32>
    %128 = vector.shape_cast %127 : vector<1x2x16x16x128xf32> to vector<2x16x16x128xf32>
    %129 = vector.shape_cast %126 : vector<2x16x16x128xf32> to vector<1x2x16x16x128xf32>
    tpu.vector_store %arg5[%c1, %c0_41, %c0_42, %c0_43, %c0_44], %129 {strides = array<i32>} : memref<2x2x16x16x128xf32, #tpu.memory_space<vmem>>, vector<1x2x16x16x128xf32>,
    return
  }
  func.func @transform_0(%arg0: i32) -> (i32, i32) {
    %c0_i32 = arith.constant 0 : i32
    %c0_i32_0 = arith.constant 0 : i32
    %c0_i32_1 = arith.constant 0 : i32
    return %c0_i32, %c0_i32_0 : i32, i32
  }
  func.func @transform_1(%arg0: i32) -> (i32, i32) {
    %c0_i32 = arith.constant 0 : i32
    %c0_i32_0 = arith.constant 0 : i32
    %c0_i32_1 = arith.constant 0 : i32
    return %c0_i32, %c0_i32_0 : i32, i32
  }
  func.func @transform_2(%arg0: i32) -> (i32, i32, i32, i32) {
    %c0_i32 = arith.constant 0 : i32
    %c0_i32_0 = arith.constant 0 : i32
    %c0_i32_1 = arith.constant 0 : i32
    %c0_i32_2 = arith.constant 0 : i32
    %c0_i32_3 = arith.constant 0 : i32
    return %c0_i32, %c0_i32_0, %c0_i32_1, %c0_i32_2 : i32, i32, i32, i32
  }
  func.func @transform_3(%arg0: i32) -> (i32, i32, i32, i32) {
    %c0_i32 = arith.constant 0 : i32
    %c0_i32_0 = arith.constant 0 : i32
    %c0_i32_1 = arith.constant 0 : i32
    %c0_i32_2 = arith.constant 0 : i32
    %c0_i32_3 = arith.constant 0 : i32
    return %c0_i32, %c0_i32_0, %c0_i32_1, %c0_i32_2 : i32, i32, i32, i32
  }
  func.func @transform_4(%arg0: i32) -> (i32, i32, i32, i32, i32) {
    %c0_i32 = arith.constant 0 : i32
    %c0_i32_0 = arith.constant 0 : i32
    %c0_i32_1 = arith.constant 0 : i32
    %c0_i32_2 = arith.constant 0 : i32
    %c0_i32_3 = arith.constant 0 : i32
    %c0_i32_4 = arith.constant 0 : i32
    return %c0_i32, %c0_i32_0, %c0_i32_1, %c0_i32_2, %c0_i32_3 : i32, i32, i32, i32, i32
  }
}

</mosaic_0001>

<bundles_post_ra>
// kernel: tile.17
= control target key start
LH: loop header
LB: loop body
LE: loop exit
PB: predicated region body
PF: predicated region fallthrough
CT: control target
= control target key end

     0   :  { %vm137_vm0 = vcmask 1047556   ;;  %vm139_vm1 = vcmask 261120   ;;  %s348_s2 = smov 64   ;;  %s349_s11 = smov 32   ;;  %vm172_vm2 = vcmask 1048320   ;;  %vm211_vm3 = vcmask 785920   ;;  %s505_s0 = inlined_call_operand.vmem [shape: f32[3,1,3,1,3,4,32], index: 0, kind: input, shape index: {}]   ;;  %s506_s1 = inlined_call_operand.vmem [shape: f32[27,128], index: 1, kind: output, shape index: {}]  }
   0x1   :  { %v325_v0 = vld [vmem:[%s505_s0 + $0x1c] sm:$0xf]  ;;  %v326_v1 = vld [vmem:[%s505_s0 + $0x18] sm:$0xf]  ;;  %v327_v2 = vld [vmem:[%s505_s0 + $0x14] sm:$0xf] }
   0x2   :  { %103 = vst [vmem:[#allocation0 + $0x38] sm:$0xf] %v325_v0  ;;  %108 = vst [vmem:[#allocation0 + $0x30] sm:$0xf] %v326_v1  ;;  %v328_v3 = vld [vmem:[%s505_s0 + $0x10] sm:$0xf] }
   0x3   :  { %113 = vst [vmem:[#allocation0 + $0x28] sm:$0xf] %v327_v2  ;;  %v329_v4 = vld [vmem:[%s505_s0 + $0xc] sm:$0xf]  ;;  %v330_v5 = vld [vmem:[%s505_s0 + $0x8] sm:$0xf] }
   0x4   :  { %118 = vst [vmem:[#allocation0 + $0x20] sm:$0xf] %v328_v3  ;;  %123 = vst [vmem:[#allocation0 + $0x18] sm:$0xf] %v329_v4  ;;  %v331_v6 = vld [vmem:[%s505_s0 + $0x4] sm:$0xf] }
   0x5   :  { %128 = vst [vmem:[#allocation0 + $0x10] sm:$0xf] %v330_v5  ;;  %v133_v7 = vld [vmem:[%s505_s0] sm:$0xf]  ;;  %132 = vst [vmem:[#allocation0 + $0x8] sm:$0xf] %v331_v6 }
   0x6   :  { %134 = vst [vmem:[#allocation0] sm:$0xf] %v133_v7  ;;  %v306_v8 = vld [vmem:[%s505_s0 + $0x68] sm:$0xf]  ;;  %v307_v9 = vld [vmem:[%s505_s0 + $0x64] sm:$0xf] }
   0x7   :  { %v308_v10 = vld [vmem:[%s505_s0 + $0x60] sm:$0xf]  ;;  %8 = vst [vmem:[#allocation0 + $0xd0] sm:$0xf] %v306_v8  ;;  %13 = vst [vmem:[#allocation0 + $0xc8] sm:$0xf] %v307_v9 }
   0x8   :  { %18 = vst [vmem:[#allocation0 + $0xc0] sm:$0xf] %v308_v10  ;;  %v317_v11 = vld [vmem:[%s505_s0 + $0x3c] sm:$0xf]  ;;  %v318_v12 = vld [vmem:[%s505_s0 + $0x38] sm:$0xf] }
   0x9   :  { %v319_v13 = vld [vmem:[%s505_s0 + $0x34] sm:$0xf]  ;;  %63 = vst [vmem:[#allocation0 + $0x78] sm:$0xf] %v317_v11  ;;  %68 = vst [vmem:[#allocation0 + $0x70] sm:$0xf] %v318_v12 }
   0xa   :  { %73 = vst [vmem:[#allocation0 + $0x68] sm:$0xf] %v319_v13  ;;  %v320_v14 = vld [vmem:[%s505_s0 + $0x30] sm:$0xf]  ;;  %v321_v15 = vld [vmem:[%s505_s0 + $0x2c] sm:$0xf] }
   0xb   :  { %v322_v16 = vld [vmem:[%s505_s0 + $0x28] sm:$0xf]  ;;  %78 = vst [vmem:[#allocation0 + $0x60] sm:$0xf] %v320_v14  ;;  %83 = vst [vmem:[#allocation0 + $0x58] sm:$0xf] %v321_v15 }
   0xc   :  { %88 = vst [vmem:[#allocation0 + $0x50] sm:$0xf] %v322_v16  ;;  %v323_v17 = vld [vmem:[%s505_s0 + $0x24] sm:$0xf]  ;;  %v324_v18 = vld [vmem:[%s505_s0 + $0x20] sm:$0xf] }
   0xd   :  { %v309_v19 = vld [vmem:[%s505_s0 + $0x5c] sm:$0xf]  ;;  %93 = vst [vmem:[#allocation0 + $0x48] sm:$0xf] %v323_v17  ;;  %98 = vst [vmem:[#allocation0 + $0x40] sm:$0xf] %v324_v18 }
   0xe   :  { %23 = vst [vmem:[#allocation0 + $0xb8] sm:$0xf] %v309_v19  ;;  %v310_v20 = vld [vmem:[%s505_s0 + $0x58] sm:$0xf]  ;;  %v311_v21 = vld [vmem:[%s505_s0 + $0x54] sm:$0xf] }
   0xf   :  { %v312_v22 = vld [vmem:[%s505_s0 + $0x50] sm:$0xf]  ;;  %28 = vst [vmem:[#allocation0 + $0xb0] sm:$0xf] %v310_v20  ;;  %33 = vst [vmem:[#allocation0 + $0xa8] sm:$0xf] %v311_v21 }
  0x10   :  { %38 = vst [vmem:[#allocation0 + $0xa0] sm:$0xf] %v312_v22  ;;  %v313_v23 = vld [vmem:[%s505_s0 + $0x4c] sm:$0xf]  ;;  %v314_v24 = vld [vmem:[%s505_s0 + $0x48] sm:$0xf] }
  0x11   :  { %v315_v25 = vld [vmem:[%s505_s0 + $0x44] sm:$0xf]  ;;  %v167_v26 = vld [vmem:[#allocation0 + $0x3] ss:$8 sm:$0xf0]   ;;  %vm250_vm4 = vcmask 523520  }
  0x12   :  { %43 = vst [vmem:[#allocation0 + $0x98] sm:$0xf] %v313_v23  ;;  %48 = vst [vmem:[#allocation0 + $0x90] sm:$0xf] %v314_v24  ;;  %v316_v27 = vld [vmem:[%s505_s0 + $0x40] sm:$0xf] }
  0x13   :  { %53 = vst [vmem:[#allocation0 + $0x88] sm:$0xf] %v315_v25  ;;  %v165_v28 = vld [vmem:[#allocation0 + $0x3] ss:$8 sm:$0xf]   ;;  %s347_s0 = smov 96  }
  0x14   :  { %58 = vst [vmem:[#allocation0 + $0x80] sm:$0xf] %v316_v27  ;;  %v169_v29 = vsel %vm137_vm0, %v167_v26, %v165_v28  ;;  %v197_v30 = vld [vmem:[#allocation0 + $0xc3] ss:$8 sm:$0x7]  }
  0x15   :  { %170 = vrot.lane.b32.xlu0 %v169_v29, %s347_s0  ;;  %198 = vrot.lane.b32.xlu1 %v197_v30, %s347_s0  ;;  %v177_v31 = vld [vmem:[#allocation0 + $0x43] ss:$8 sm:$0xf0]   ;;  %v204_v32 = vld [vmem:[#allocation0 + $0x2] ss:$8 sm:$0xf]  }
  0x16   :  { %v175_v33 = vld [vmem:[#allocation0 + $0x43] ss:$8 sm:$0xf]   ;;  %v206_v34 = vld [vmem:[#allocation0 + $0x2] ss:$8 sm:$0xf0]  }
  0x17   :  { %v179_v35 = vsel %vm137_vm0, %v177_v31, %v175_v33  ;;  %v188_v36 = vld [vmem:[#allocation0 + $0x83] ss:$8 sm:$0xf0]   ;;  %v216_v37 = vld [vmem:[#allocation0 + $0x42] ss:$8 sm:$0xf0]   ;;  %v208_v39 = vsel %vm137_vm0, %v206_v34, %v204_v32 }
  0x18   :  { %v214_v40 = vld [vmem:[#allocation0 + $0x42] ss:$8 sm:$0xf]   ;;  %v243_v45 = vld [vmem:[#allocation0 + $0x1] ss:$8 sm:$0xf]  }
  0x19   :  { %180 = vrot.lane.b32.xlu0 %v179_v35, %s347_s0  ;;  %v227_v43 = vld [vmem:[#allocation0 + $0x82] ss:$8 sm:$0xf0]   ;;  %v218_v44 = vsel %vm137_vm0, %v216_v37, %v214_v40  ;;  %v245_v46 = vld [vmem:[#allocation0 + $0x1] ss:$8 sm:$0xf0]  }
  0x1a   :  { %v135_v47 = vld [vmem:[#allocation0] ss:$8 sm:$0xf]   ;;  %v236_v57 = vld [vmem:[#allocation0 + $0xc2] ss:$8 sm:$0x7]   ;;  %v247_v59 = vsel %vm137_vm0, %v245_v46, %v243_v45 }
  0x1b   :  { %v186_v38 = vld [vmem:[#allocation0 + $0x83] ss:$8 sm:$0xf]   ;;  %v225_v42 = vld [vmem:[#allocation0 + $0x82] ss:$8 sm:$0xf]  }
  0x1c   :  { %v190_v41 = vsel %vm137_vm0, %v188_v36, %v186_v38  ;;  %v229_v48 = vsel %vm137_vm0, %v227_v43, %v225_v42  ;;  %v136_v49 = vld [vmem:[#allocation0] ss:$8 sm:$0xf0]   ;;  %v253_v60 = vld [vmem:[#allocation0 + $0x41] ss:$8 sm:$0xf]  }
  0x1d   :  { %191 = vrot.lane.b32.xlu1 %v190_v41, %s347_s0  ;;  %209 = vrot.lane.b32.xlu0 %v208_v39, %s348_s2  ;;  %v160_v50 = vld [vmem:[#allocation0 + $0xc0] ss:$8 sm:$0x7]   ;;  %v138_v51 = vsel %vm137_vm0, %v136_v49, %v135_v47  ;;  %v255_v61 = vld [vmem:[#allocation0 + $0x41] ss:$8 sm:$0xf0]  }
  0x1e   :  { %334 = vst.msk [vmem:[%s506_s1 + $0x18] sm:$0x7] %vm139_vm1, %v160_v50   ;;  %v142_v52 = vld [vmem:[#allocation0 + $0x40] ss:$8 sm:$0xf]   ;;  %140 = vst.msk [vmem:[%s506_s1] sm:$0xff] %vm139_vm1, %v138_v51   ;;  %v257_v0 = vsel %vm137_vm0, %v255_v61, %v253_v60 }
  0x1f   :  { %v144_v53 = vld [vmem:[#allocation0 + $0x40] ss:$8 sm:$0xf0]   ;;  %v264_v62 = vld [vmem:[#allocation0 + $0x81] ss:$8 sm:$0xf]  }
  0x20   :  { %v146_v54 = vsel %vm137_vm0, %v144_v53, %v142_v52  ;;  %v151_v55 = vld [vmem:[#allocation0 + $0x80] ss:$8 sm:$0xf]   ;;  %v266_v63 = vld [vmem:[#allocation0 + $0x81] ss:$8 sm:$0xf0]  }
  0x21   :  { %219 = vrot.lane.b32.xlu1 %v218_v44, %s348_s2  ;;  %v153_v56 = vld [vmem:[#allocation0 + $0x80] ss:$8 sm:$0xf0]   ;;  %230 = vrot.lane.b32.xlu0 %v229_v48, %s348_s2  ;;  %332 = vst.msk [vmem:[%s506_s1 + $0x8] sm:$0xff] %vm139_vm1, %v146_v54   ;;  %v268_v1 = vsel %vm137_vm0, %v266_v63, %v264_v62 }
  0x22   :  { %v155_v58 = vsel %vm137_vm0, %v153_v56, %v151_v55  ;;  %v275_v2 = vld [vmem:[#allocation0 + $0xc1] ss:$8 sm:$0x7]  }
  0x23   :  { %333 = vst.msk [vmem:[%s506_s1 + $0x10] sm:$0xff] %vm139_vm1, %v155_v58  }
  0x25   :  { %237 = vrot.lane.b32.xlu1 %v236_v57, %s348_s2  ;;  %248 = vrot.lane.b32.xlu0 %v247_v59, %s349_s11 }
  0x29   :  { %258 = vrot.lane.b32.xlu1 %v257_v0, %s349_s11  ;;  %269 = vrot.lane.b32.xlu0 %v268_v1, %s349_s11 }
  0x2d   :  { %276 = vrot.lane.b32.xlu1 %v275_v2, %s349_s11 }
  0x87   :  { %v171_v3 = vpop.permute.xlu0 %170   ;;  %v199_v4 = vpop.permute.xlu1 %198  }
  0x88   :  { %173 = vst.msk [vmem:[%s506_s1] sm:$0xff] %vm172_vm2, %v171_v3   ;;  %337 = vst.msk [vmem:[%s506_s1 + $0x18] sm:$0x7] %vm172_vm2, %v199_v4  }
  0x8b   :  { %v181_v5 = vpop.permute.xlu0 %180  }
  0x8c   :  { %335 = vst.msk [vmem:[%s506_s1 + $0x8] sm:$0xff] %vm172_vm2, %v181_v5  }
  0x8f   :  { %v192_v6 = vpop.permute.xlu1 %191   ;;  %v210_v7 = vpop.permute.xlu0 %209  }
  0x90   :  { %336 = vst.msk [vmem:[%s506_s1 + $0x10] sm:$0xff] %vm172_vm2, %v192_v6  }
  0x91   :  { %212 = vst.msk [vmem:[%s506_s1] sm:$0xff] %vm211_vm3, %v210_v7  }
  0x93   :  { %v220_v8 = vpop.permute.xlu1 %219   ;;  %v231_v9 = vpop.permute.xlu0 %230  }
  0x94   :  { %338 = vst.msk [vmem:[%s506_s1 + $0x8] sm:$0xff] %vm211_vm3, %v220_v8   ;;  %339 = vst.msk [vmem:[%s506_s1 + $0x10] sm:$0xff] %vm211_vm3, %v231_v9  }
  0x97   :  { %v238_v10 = vpop.permute.xlu1 %237   ;;  %v249_v11 = vpop.permute.xlu0 %248  }
  0x98   :  { %340 = vst.msk [vmem:[%s506_s1 + $0x18] sm:$0x7] %vm211_vm3, %v238_v10  }
  0x99   :  { %251 = vst.msk [vmem:[%s506_s1] sm:$0xff] %vm250_vm4, %v249_v11  }
  0x9b   :  { %v259_v12 = vpop.permute.xlu1 %258   ;;  %v270_v13 = vpop.permute.xlu0 %269  }
  0x9c   :  { %341 = vst.msk [vmem:[%s506_s1 + $0x8] sm:$0xff] %vm250_vm4, %v259_v12   ;;  %342 = vst.msk [vmem:[%s506_s1 + $0x10] sm:$0xff] %vm250_vm4, %v270_v13  }
  0x9f   :  { %v277_v14 = vpop.permute.xlu1 %276  }
  0xa0   :  { %343 = vst.msk [vmem:[%s506_s1 + $0x18] sm:$0x7] %vm250_vm4, %v277_v14  }

// kernel: forward.1
= control target key start
LH: loop header
LB: loop body
LE: loop exit
PB: predicated region body
PF: predicated region fallthrough
CT: control target
= control target key end

     0   :  { %vm85_vm0 = vcmask 261120   ;;  %vm1193_vm1 = vcmask 1046528   ;;  %vm1000_vm3 = vcmask 1040384   ;;  %s8337_s1 = inlined_call_operand.vmem [shape: f32[32,128], index: 1, kind: input, shape index: {}]   ;;  %s8338_s0 = inlined_call_operand.vmem [shape: f32[512,32], index: 0, kind: input, shape index: {}]   ;;  %s8339_s2 = inlined_call_operand.vmem [shape: f32[1,1,1,128], index: 2, kind: input, shape index: {}]   ;;  %s8340_s3 = inlined_call_operand.vmem [shape: f32[1,1,1,128], index: 3, kind: input, shape index: {}]   ;;  %s8341_s4 = inlined_call_operand.vmem [shape: f32[2,2,16,16,128], index: 4, kind: output, shape index: {}]  }
   0x1   :  { %v81_v0 = vld [vmem:[%s8337_s1] sm:$0xff]  ;;  %v82_v1 = vld [vmem:[%s8337_s1 + $0x8] sm:$0xff]  ;;  %v83_v2 = vld [vmem:[%s8337_s1 + $0x10] sm:$0xff] }
   0x2   :  { %v4496_v3 = vpack.c.bf16 %v82_v1, %v81_v0  ;;  %v84_v4 = vld [vmem:[%s8337_s1 + $0x18] sm:$0xff]  ;;  %v17_v5 = vld [vmem:[%s8338_s0] sm:$0xff]  ;;  %v18_v7 = vld [vmem:[%s8338_s0 + $0x8] sm:$0xff] }
   0x3   :  { %v4500_v6 = vpack.c.bf16 %v84_v4, %v83_v2  ;;  %4400 = vmatprep.mubr.msk.f32.mxu0 %vm85_vm0, %v17_v5  ;;  %v19_v8 = vld [vmem:[%s8338_s0 + $0x10] sm:$0xff]  ;;  %v49_v9 = vld [vmem:[%s8338_s0 + $0x100] sm:$0xff]  ;;  %v50_v10 = vld [vmem:[%s8338_s0 + $0x108] sm:$0xff] }
   0x4   :  { %4497 = vmatprep.subr.bf16.mxu0 %v4496_v3  ;;  %4504 = vmatprep.subr.bf16.mxu1 %v4496_v3  ;;  %v20_v11 = vld [vmem:[%s8338_s0 + $0x18] sm:$0xff]  ;;  %v51_v12 = vld [vmem:[%s8338_s0 + $0x110] sm:$0xff]  ;;  %v21_v13 = vld [vmem:[%s8338_s0 + $0x20] sm:$0xff] }
   0x5   :  { %4499 = vmatpush3.bf16.msra.mxu0 %v4496_v3  ;;  %4506 = vmatpush3.bf16.msra.mxu1 %v4496_v3  ;;  %v52_v14 = vld [vmem:[%s8338_s0 + $0x118] sm:$0xff]  ;;  %v53_v15 = vld [vmem:[%s8338_s0 + $0x120] sm:$0xff]  ;;  %v22_v16 = vld [vmem:[%s8338_s0 + $0x28] sm:$0xff] }
   0x6   :  { %4501 = vmatprep.subr.bf16.mxu0 %v4500_v6  ;;  %4505 = vmatprep.subr.bf16.mxu1 %v4500_v6  ;;  %v23_v17 = vld [vmem:[%s8338_s0 + $0x30] sm:$0xff]  ;;  %v54_v18 = vld [vmem:[%s8338_s0 + $0x128] sm:$0xff]  ;;  %v24_v20 = vld [vmem:[%s8338_s0 + $0x38] sm:$0xff] }
   0x7   :  { %4448 = vmatprep.mubr.msk.f32.mxu1 %vm85_vm0, %v49_v9  ;;  %v55_v19 = vld [vmem:[%s8338_s0 + $0x130] sm:$0xff]  ;;  %v25_v21 = vld [vmem:[%s8338_s0 + $0x40] sm:$0xff]  ;;  %v56_v22 = vld [vmem:[%s8338_s0 + $0x138] sm:$0xff] }
   0x8   :  { %v57_v23 = vld [vmem:[%s8338_s0 + $0x140] sm:$0xff]  ;;  %v26_v24 = vld [vmem:[%s8338_s0 + $0x48] sm:$0xff]  ;;  %v27_v25 = vld [vmem:[%s8338_s0 + $0x50] sm:$0xff] }
   0x9   :  { %4503 = vmatpush3.bf16.msra.mxu0 %v4500_v6  ;;  %4507 = vmatpush3.bf16.msra.mxu1 %v4500_v6  ;;  %v58_v26 = vld [vmem:[%s8338_s0 + $0x148] sm:$0xff]  ;;  %v59_v27 = vld [vmem:[%s8338_s0 + $0x150] sm:$0xff]  ;;  %v28_v28 = vld [vmem:[%s8338_s0 + $0x58] sm:$0xff]  ;;  %v8342_v6 = vlaneseq }
   0xa   :  { %v29_v29 = vld [vmem:[%s8338_s0 + $0x60] sm:$0xff]  ;;  %v60_v30 = vld [vmem:[%s8338_s0 + $0x158] sm:$0xff]  ;;  %v30_v32 = vld [vmem:[%s8338_s0 + $0x68] sm:$0xff] }
   0xb   :  { %v61_v31 = vld [vmem:[%s8338_s0 + $0x160] sm:$0xff]  ;;  %v31_v33 = vld [vmem:[%s8338_s0 + $0x70] sm:$0xff]  ;;  %v62_v34 = vld [vmem:[%s8338_s0 + $0x168] sm:$0xff] }
   0xc   :  { %4401 = vmatmul.mubr.msk.f32.vlgmr.msra.gmra.mrb[0].mxu0 %vm85_vm0, %v18_v7  ;;  %4449 = vmatmul.mubr.msk.f32.vlgmr.msra.gmra.mrb[0].mxu1 %vm85_vm0, %v50_v10  ;;  %v63_v35 = vld [vmem:[%s8338_s0 + $0x170] sm:$0xff]  ;;  %v32_v36 = vld [vmem:[%s8338_s0 + $0x78] sm:$0xff]  ;;  %v33_v37 = vld [vmem:[%s8338_s0 + $0x80] sm:$0xff] }
   0xd   :  { %4403 = vmatprep.mubr.msk.f32.mxu0 %vm85_vm0, %v19_v8  ;;  %4451 = vmatprep.mubr.msk.f32.mxu1 %vm85_vm0, %v51_v12  ;;  %v64_v38 = vld [vmem:[%s8338_s0 + $0x178] sm:$0xff]  ;;  %v65_v39 = vld [vmem:[%s8338_s0 + $0x180] sm:$0xff]  ;;  %v34_v40 = vld [vmem:[%s8338_s0 + $0x88] sm:$0xff]  ;;  %v5320_v8 = vand.u32 127, %v8342_v6 }
   0xe   :  { %v35_v41 = vld [vmem:[%s8338_s0 + $0x90] sm:$0xff]  ;;  %v66_v42 = vld [vmem:[%s8338_s0 + $0x188] sm:$0xff]  ;;  %v36_v44 = vld [vmem:[%s8338_s0 + $0x98] sm:$0xff] }
   0xf   :  { %v67_v43 = vld [vmem:[%s8338_s0 + $0x190] sm:$0xff]  ;;  %v37_v45 = vld [vmem:[%s8338_s0 + $0xa0] sm:$0xff]  ;;  %v68_v46 = vld [vmem:[%s8338_s0 + $0x198] sm:$0xff]  ;;  %vm921_vm2 = vcmp.ge.s32.totalorder %v5320_v8, 64 }
  0x10   :  { %4404 = vmatmul.mubr.msk.f32.gmra.mrb[2].mxu0 %vm85_vm0, %v20_v11  ;;  %4452 = vmatmul.mubr.msk.f32.gmra.mrb[2].mxu1 %vm85_vm0, %v52_v14  ;;  %v69_v47 = vld [vmem:[%s8338_s0 + $0x1a0] sm:$0xff]  ;;  %v38_v48 = vld [vmem:[%s8338_s0 + $0xa8] sm:$0xff]  ;;  %v39_v49 = vld [vmem:[%s8338_s0 + $0xb0] sm:$0xff] }
  0x11   :  { %4406 = vmatprep.mubr.msk.f32.mxu0 %vm85_vm0, %v21_v13  ;;  %4454 = vmatprep.mubr.msk.f32.mxu1 %vm85_vm0, %v53_v15  ;;  %v70_v50 = vld [vmem:[%s8338_s0 + $0x1a8] sm:$0xff]  ;;  %v71_v51 = vld [vmem:[%s8338_s0 + $0x1b0] sm:$0xff]  ;;  %v40_v52 = vld [vmem:[%s8338_s0 + $0xb8] sm:$0xff] }
  0x12   :  { %v41_v53 = vld [vmem:[%s8338_s0 + $0xc0] sm:$0xff]  ;;  %v72_v54 = vld [vmem:[%s8338_s0 + $0x1b8] sm:$0xff]  ;;  %v42_v56 = vld [vmem:[%s8338_s0 + $0xc8] sm:$0xff] }
  0x13   :  { %v73_v55 = vld [vmem:[%s8338_s0 + $0x1c0] sm:$0xff]  ;;  %v43_v57 = vld [vmem:[%s8338_s0 + $0xd0] sm:$0xff]  ;;  %v74_v58 = vld [vmem:[%s8338_s0 + $0x1c8] sm:$0xff] }
  0x14   :  { %4407 = vmatmul.mubr.msk.f32.gmra.mrb[4].mxu0 %vm85_vm0, %v22_v16  ;;  %4455 = vmatmul.mubr.msk.f32.gmra.mrb[4].mxu1 %vm85_vm0, %v54_v18  ;;  %v75_v59 = vld [vmem:[%s8338_s0 + $0x1d0] sm:$0xff]  ;;  %v44_v60 = vld [vmem:[%s8338_s0 + $0xd8] sm:$0xff]  ;;  %v45_v61 = vld [vmem:[%s8338_s0 + $0xe0] sm:$0xff] }
  0x15   :  { %4409 = vmatprep.mubr.msk.f32.mxu0 %vm85_vm0, %v23_v17  ;;  %4457 = vmatprep.mubr.msk.f32.mxu1 %vm85_vm0, %v55_v19  ;;  %v76_v62 = vld [vmem:[%s8338_s0 + $0x1d8] sm:$0xff]  ;;  %v77_v63 = vld [vmem:[%s8338_s0 + $0x1e0] sm:$0xff]  ;;  %v46_v0 = vld [vmem:[%s8338_s0 + $0xe8] sm:$0xff] }
  0x16   :  { %v47_v1 = vld [vmem:[%s8338_s0 + $0xf0] sm:$0xff]  ;;  %v78_v2 = vld [vmem:[%s8338_s0 + $0x1e8] sm:$0xff]  ;;  %v48_v4 = vld [vmem:[%s8338_s0 + $0xf8] sm:$0xff] }
  0x17   :  { %v79_v3 = vld [vmem:[%s8338_s0 + $0x1f0] sm:$0xff]  ;;  %v80_v5 = vld [vmem:[%s8338_s0 + $0x1f8] sm:$0xff]  ;;  %s5024_s0 = smov 64  }
  0x18   :  { %4410 = vmatmul.mubr.msk.f32.gmra.mrb[6].mxu0 %vm85_vm0, %v24_v20  ;;  %4458 = vmatmul.mubr.msk.f32.gmra.mrb[6].mxu1 %vm85_vm0, %v56_v22 }
  0x19   :  { %4412 = vmatprep.mubr.msk.f32.mxu0 %vm85_vm0, %v25_v21  ;;  %4460 = vmatprep.mubr.msk.f32.mxu1 %vm85_vm0, %v57_v23 }
  0x1c   :  { %4413 = vmatmul.mubr.msk.f32.gmra.mrb[8].mxu0 %vm85_vm0, %v26_v24  ;;  %4461 = vmatmul.mubr.msk.f32.gmra.mrb[8].mxu1 %vm85_vm0, %v58_v26 }
  0x1d   :  { %4415 = vmatprep.mubr.msk.f32.mxu0 %vm85_vm0, %v27_v25  ;;  %4463 = vmatprep.mubr.msk.f32.mxu1 %vm85_vm0, %v59_v27 }
  0x20   :  { %4416 = vmatmul.mubr.msk.f32.gmra.mrb[10].mxu0 %vm85_vm0, %v28_v28  ;;  %4464 = vmatmul.mubr.msk.f32.gmra.mrb[10].mxu1 %vm85_vm0, %v60_v30 }
  0x21   :  { %4418 = vmatprep.mubr.msk.f32.mxu0 %vm85_vm0, %v29_v29  ;;  %4466 = vmatprep.mubr.msk.f32.mxu1 %vm85_vm0, %v61_v31 }
  0x24   :  { %4419 = vmatmul.mubr.msk.f32.gmra.mrb[12].mxu0 %vm85_vm0, %v30_v32  ;;  %4467 = vmatmul.mubr.msk.f32.gmra.mrb[12].mxu1 %vm85_vm0, %v62_v34 }
  0x25   :  { %4421 = vmatprep.mubr.msk.f32.mxu0 %vm85_vm0, %v31_v33  ;;  %4469 = vmatprep.mubr.msk.f32.mxu1 %vm85_vm0, %v63_v35 }
  0x28   :  { %4422 = vmatmul.mubr.msk.f32.gmra.mrb[14].mxu0 %vm85_vm0, %v32_v36  ;;  %4470 = vmatmul.mubr.msk.f32.gmra.mrb[14].mxu1 %vm85_vm0, %v64_v38 }
  0x29   :  { %4424 = vmatprep.mubr.msk.f32.mxu0 %vm85_vm0, %v33_v37  ;;  %4472 = vmatprep.mubr.msk.f32.mxu1 %vm85_vm0, %v65_v39 }
  0x2c   :  { %4425 = vmatmul.mubr.msk.f32.gmra.mrb[16].mxu0 %vm85_vm0, %v34_v40  ;;  %4473 = vmatmul.mubr.msk.f32.gmra.mrb[16].mxu1 %vm85_vm0, %v66_v42 }
  0x2d   :  { %4427 = vmatprep.mubr.msk.f32.mxu0 %vm85_vm0, %v35_v41  ;;  %4475 = vmatprep.mubr.msk.f32.mxu1 %vm85_vm0, %v67_v43 }
  0x30   :  { %4428 = vmatmul.mubr.msk.f32.gmra.mrb[18].mxu0 %vm85_vm0, %v36_v44  ;;  %4476 = vmatmul.mubr.msk.f32.gmra.mrb[18].mxu1 %vm85_vm0, %v68_v46 }
  0x31   :  { %4430 = vmatprep.mubr.msk.f32.mxu0 %vm85_vm0, %v37_v45  ;;  %4478 = vmatprep.mubr.msk.f32.mxu1 %vm85_vm0, %v69_v47 }
  0x34   :  { %4431 = vmatmul.mubr.msk.f32.gmra.mrb[20].mxu0 %vm85_vm0, %v38_v48  ;;  %4479 = vmatmul.mubr.msk.f32.gmra.mrb[20].mxu1 %vm85_vm0, %v70_v50 }
  0x35   :  { %4433 = vmatprep.mubr.msk.f32.mxu0 %vm85_vm0, %v39_v49  ;;  %4481 = vmatprep.mubr.msk.f32.mxu1 %vm85_vm0, %v71_v51 }
  0x38   :  { %4434 = vmatmul.mubr.msk.f32.gmra.mrb[22].mxu0 %vm85_vm0, %v40_v52  ;;  %4482 = vmatmul.mubr.msk.f32.gmra.mrb[22].mxu1 %vm85_vm0, %v72_v54 }
  0x39   :  { %4436 = vmatprep.mubr.msk.f32.mxu0 %vm85_vm0, %v41_v53  ;;  %4484 = vmatprep.mubr.msk.f32.mxu1 %vm85_vm0, %v73_v55 }
  0x3c   :  { %4437 = vmatmul.mubr.msk.f32.gmra.mrb[24].mxu0 %vm85_vm0, %v42_v56  ;;  %4485 = vmatmul.mubr.msk.f32.gmra.mrb[24].mxu1 %vm85_vm0, %v74_v58 }
  0x3d   :  { %4439 = vmatprep.mubr.msk.f32.mxu0 %vm85_vm0, %v43_v57  ;;  %4487 = vmatprep.mubr.msk.f32.mxu1 %vm85_vm0, %v75_v59 }
  0x40   :  { %4440 = vmatmul.mubr.msk.f32.gmra.mrb[26].mxu0 %vm85_vm0, %v44_v60  ;;  %4488 = vmatmul.mubr.msk.f32.gmra.mrb[26].mxu1 %vm85_vm0, %v76_v62 }
  0x41   :  { %4442 = vmatprep.mubr.msk.f32.mxu0 %vm85_vm0, %v45_v61  ;;  %4490 = vmatprep.mubr.msk.f32.mxu1 %vm85_vm0, %v77_v63 }
  0x44   :  { %4443 = vmatmul.mubr.msk.f32.gmra.mrb[28].mxu0 %vm85_vm0, %v46_v0  ;;  %4491 = vmatmul.mubr.msk.f32.gmra.mrb[28].mxu1 %vm85_vm0, %v78_v2 }
  0x45   :  { %4445 = vmatprep.mubr.msk.f32.mxu0 %vm85_vm0, %v47_v1  ;;  %4493 = vmatprep.mubr.msk.f32.mxu1 %vm85_vm0, %v79_v3 }
  0x48   :  { %4446 = vmatmul.mubr.msk.f32.gmra.mrb[30].mxu0 %vm85_vm0, %v48_v4  ;;  %4494 = vmatmul.mubr.msk.f32.gmra.mrb[30].mxu1 %vm85_vm0, %v80_v5 }
  0xdf   :  { %v4402_v7 = vpop.f32.mrb[0].mxu0 }
  0xe0   :  { %v664_v9 = vmul.f32 0.25, %v4402_v7  ;;  %v724_v10 = vmul.f32 0.75, %v4402_v7  ;;  %v344_v11 = vpop.f32.mrb[1].mxu0 }
  0xe1   :  { %v663_v12 = vmul.f32 0.25, %v344_v11  ;;  %v723_v13 = vmul.f32 0.75, %v344_v11 }
  0xe2   :  { %v788_v14 = vadd.f32 %v724_v10, %v664_v9 }
  0xe3   :  { %v787_v15 = vadd.f32 %v723_v13, %v663_v12  ;;  %v4405_v16 = vpop.f32.mrb[2].mxu0 }
  0xe4   :  { %v1002_v17 = vrot.slane %v788_v14, 7  ;;  %v1195_v18 = vrot.slane %v788_v14, 1  ;;  %v1387_v19 = vmul.f32 0.75, %v788_v14  ;;  %v5323_v20 = vmul.f32 0.25, %v4405_v16  ;;  %v354_v21 = vpop.f32.mrb[3].mxu0 }
  0xe5   :  { %v1001_v22 = vrot.slane %v787_v15, 7  ;;  %v1194_v23 = vrot.slane %v787_v15, 1  ;;  %v1386_v24 = vmul.f32 0.75, %v787_v15  ;;  %v726_v25 = vmul.f32 0.75, %v4405_v16 }
  0xe6   :  { %v1354_v26 = vsel %vm1193_vm1, %v1195_v18, %v788_v14  ;;  %v856_v27 = vadd.f32 %v724_v10, %v5323_v20  ;;  %v5327_v28 = vmul.f32 0.25, %v354_v21  ;;  %v5329_v29 = vmul.f32 0.75, %v354_v21 }
  0xe7   :  { %v1003_v30 = vsel %vm1000_vm3, %v1001_v22, %v1002_v17  ;;  %v1161_v31 = vsel %vm1000_vm3, %v787_v15, %v1001_v22  ;;  %v1196_v32 = vsel %vm1193_vm1, %v1194_v23, %v1195_v18  ;;  %v790_v33 = vadd.f32 %v726_v25, %v664_v9  ;;  %v4408_v34 = vpop.f32.mrb[4].mxu0 }
  0xe8   :  { %v1452_v35 = vsel %vm921_vm2, %v1196_v32, %v1161_v31  ;;  %v1453_v36 = vsel %vm921_vm2, %v1354_v26, %v1003_v30  ;;  %v1709_v37 = vrot.slane %v856_v27, 7  ;;  %v1901_v38 = vrot.slane %v856_v27, 1  ;;  %v364_v39 = vpop.f32.mrb[5].mxu0 }
  0xe9   :  { %v1516_v40 = vmul.f32 0.25, %v1452_v35  ;;  %v1517_v41 = vmul.f32 0.25, %v1453_v36  ;;  %v1005_v42 = vrot.slane %v790_v33, 7  ;;  %v1198_v43 = vrot.slane %v790_v33, 1 }
  0xea   :  { %v1389_v44 = vmul.f32 0.75, %v790_v33  ;;  %v2060_v45 = vsel %vm1193_vm1, %v1901_v38, %v856_v27  ;;  %v2093_v46 = vmul.f32 0.75, %v856_v27  ;;  %v789_v47 = vadd.f32 %v5329_v29, %v663_v12 }
  0xeb   :  { %v5340_v48 = vadd.f32 %v1516_v40, %v1386_v24  ;;  %v5342_v49 = vadd.f32 %v1517_v41, %v1387_v19  ;;  %v1355_v50 = vsel %vm1193_vm1, %v1198_v43, %v790_v33  ;;  %v855_v51 = vadd.f32 %v723_v13, %v5327_v28  ;;  %v5346_v52 = vpop.f32.mrb[6].mxu0 }
  0xec   :  { %v1004_v53 = vrot.slane %v789_v47, 7  ;;  %v1197_v54 = vrot.slane %v789_v47, 1  ;;  %v1388_v55 = vmul.f32 0.75, %v789_v47  ;;  %v5348_v56 = vmul.f32 0.25, %v4408_v34  ;;  %v5350_v57 = vpop.f32.mrb[7].mxu0 }
  0xed   :  { %8456 = vst [vmem:[#allocation2_spill] sm:$0xff] %v5340_v48  ;;  %8457 = vst [vmem:[#allocation3_spill] sm:$0xff] %v5342_v49  ;;  %v2348_v58 = vadd.f32 %v5342_v49, %v5340_v48  ;;  %v2487_v59 = vmul.f32 %v5340_v48, %v5340_v48  ;;  %v2488_v60 = vmul.f32 %v5342_v49, %v5342_v49  ;;  %v1708_v61 = vrot.slane %v855_v51, 7 }
  0xee   :  { %v1006_v62 = vsel %vm1000_vm3, %v1004_v53, %v1005_v42  ;;  %v1162_v63 = vsel %vm1000_vm3, %v789_v47, %v1004_v53  ;;  %v1199_v0 = vsel %vm1193_vm1, %v1197_v54, %v1198_v43  ;;  %v1900_v1 = vrot.slane %v855_v51, 1 }
  0xef   :  { %v2551_v2 = vadd.f32 %v2488_v60, %v2487_v59  ;;  %v1454_v3 = vsel %vm921_vm2, %v1199_v0, %v1162_v63  ;;  %v1455_v4 = vsel %vm921_vm2, %v1355_v50, %v1006_v62  ;;  %v1710_v5 = vsel %vm1000_vm3, %v1708_v61, %v1709_v37  ;;  %v5366_v7 = vpop.f32.mrb[8].mxu0 }
  0xf0   :  { %v1518_v9 = vmul.f32 0.25, %v1454_v3  ;;  %v1519_v10 = vmul.f32 0.25, %v1455_v4  ;;  %v1868_v11 = vsel %vm1000_vm3, %v855_v51, %v1708_v61  ;;  %v1902_v12 = vsel %vm1193_vm1, %v1900_v1, %v1901_v38  ;;  %v5370_v13 = vpop.f32.mrb[9].mxu0 }
  0xf1   :  { %v2092_v14 = vmul.f32 0.75, %v855_v51  ;;  %v2156_v15 = vsel %vm921_vm2, %v1902_v12, %v1868_v11  ;;  %v2157_v16 = vsel %vm921_vm2, %v2060_v45, %v1710_v5  ;;  %v728_v17 = vmul.f32 0.75, %v4408_v34 }
  0xf2   :  { %v5376_v18 = vadd.f32 %v1518_v9, %v1388_v55  ;;  %v5378_v19 = vadd.f32 %v1519_v10, %v1389_v44  ;;  %v2220_v21 = vmul.f32 0.25, %v2156_v15  ;;  %v2221_v22 = vmul.f32 0.25, %v2157_v16 }
  0xf3   :  { %v792_v23 = vadd.f32 %v728_v17, %v5323_v20  ;;  %v858_v24 = vadd.f32 %v726_v25, %v5348_v56  ;;  %v5382_v26 = vmul.f32 0.25, %v364_v39  ;;  %v5384_v27 = vmul.f32 0.75, %v364_v39  ;;  %v5386_v30 = vpop.f32.mrb[10].mxu0 }
  0xf4   :  { %8458 = vst [vmem:[#allocation4_spill] sm:$0xff] %v5376_v18  ;;  %8459 = vst [vmem:[#allocation5_spill] sm:$0xff] %v5378_v19  ;;  %v5388_v31 = vadd.f32 %v2220_v21, %v2092_v14  ;;  %v5390_v32 = vadd.f32 %v2221_v22, %v2093_v46  ;;  %v2349_v33 = vadd.f32 %v2348_v58, %v5376_v18  ;;  %v5395_v35 = vpop.f32.mrb[11].mxu0 }
  0xf5   :  { %v2489_v34 = vmul.f32 %v5376_v18, %v5376_v18  ;;  %v1008_v20 = vrot.slane %v792_v23, 7  ;;  %v1201_v36 = vrot.slane %v792_v23, 1  ;;  %v1391_v25 = vmul.f32 0.75, %v792_v23 }
  0xf6   :  { %8460 = vst [vmem:[#allocation6_spill] sm:$0xff] %v5388_v31  ;;  %8461 = vst [vmem:[#allocation7_spill] sm:$0xff] %v5390_v32  ;;  %v1712_v37 = vrot.slane %v858_v24, 7  ;;  %v2417_v38 = vadd.f32 %v5390_v32, %v5388_v31  ;;  %v2620_v40 = vmul.f32 %v5388_v31, %v5388_v31  ;;  %v2621_v41 = vmul.f32 %v5390_v32, %v5390_v32 }
  0xf7   :  { %v2552_v39 = vadd.f32 %v2551_v2, %v2489_v34  ;;  %v1356_v42 = vsel %vm1193_vm1, %v1201_v36, %v792_v23  ;;  %v1904_v43 = vrot.slane %v858_v24, 1  ;;  %v2095_v44 = vmul.f32 0.75, %v858_v24  ;;  %v5406_v46 = vpop.f32.mrb[12].mxu0 }
  0xf8   :  { %v791_v45 = vadd.f32 %v5384_v27, %v5327_v28  ;;  %v2684_v47 = vadd.f32 %v2621_v41, %v2620_v40  ;;  %v857_v50 = vadd.f32 %v5329_v29, %v5382_v26  ;;  %v2350_v51 = vadd.f32 %v2349_v33, %v5378_v19  ;;  %v5413_v54 = vpop.f32.mrb[13].mxu0 }
  0xf9   :  { %v2490_v53 = vmul.f32 %v5378_v19, %v5378_v19  ;;  %v2061_v55 = vsel %vm1193_vm1, %v1904_v43, %v858_v24  ;;  %v5420_v2 = vmul.f32 0.25, %v5346_v52  ;;  %v730_v23 = vmul.f32 0.75, %v5346_v52 }
  0xfa   :  { %v1007_v58 = vrot.slane %v791_v45, 7  ;;  %v1200_v59 = vrot.slane %v791_v45, 1  ;;  %v1390_v60 = vmul.f32 0.75, %v791_v45  ;;  %v1711_v61 = vrot.slane %v857_v50, 7 }
  0xfb   :  { %v1903_v28 = vrot.slane %v857_v50, 1  ;;  %v2094_v62 = vmul.f32 0.75, %v857_v50  ;;  %v2553_v63 = vadd.f32 %v2552_v39, %v2490_v53  ;;  %v5422_v3 = vpop.f32.mrb[14].mxu0  ;;  %v860_v24 = vadd.f32 %v728_v17, %v5420_v2 }
  0xfc   :  { %v1009_v0 = vsel %vm1000_vm3, %v1007_v58, %v1008_v20  ;;  %v1163_v29 = vsel %vm1000_vm3, %v791_v45, %v1007_v58  ;;  %v1202_v1 = vsel %vm1193_vm1, %v1200_v59, %v1201_v36  ;;  %v1713_v9 = vsel %vm1000_vm3, %v1711_v61, %v1712_v37  ;;  %v5430_v11 = vpop.f32.mrb[15].mxu0 }
  0xfd   :  { %v1456_v4 = vsel %vm921_vm2, %v1202_v1, %v1163_v29  ;;  %v1457_v5 = vsel %vm921_vm2, %v1356_v42, %v1009_v0  ;;  %v1869_v10 = vsel %vm1000_vm3, %v857_v50, %v1711_v61  ;;  %v1905_v15 = vsel %vm1193_vm1, %v1903_v28, %v1904_v43 }
  0xfe   :  { %v1520_v12 = vmul.f32 0.25, %v1456_v4  ;;  %v1521_v14 = vmul.f32 0.25, %v1457_v5  ;;  %v2159_v16 = vsel %vm921_vm2, %v2061_v55, %v1713_v9  ;;  %v2158_v21 = vsel %vm921_vm2, %v1905_v15, %v1869_v10 }
  0xff   :  { %v2223_v22 = vmul.f32 0.25, %v2159_v16  ;;  %v2222_v20 = vmul.f32 0.25, %v2158_v21  ;;  %v5444_v36 = vmul.f32 0.25, %v5350_v57  ;;  %v5446_v37 = vpop.f32.mrb[16].mxu0  ;;  %v794_v40 = vadd.f32 %v730_v23, %v5348_v56 }
 0x100   :  { %v5439_v33 = vadd.f32 %v1520_v12, %v1390_v60  ;;  %v5441_v34 = vadd.f32 %v1521_v14, %v1391_v25  ;;  %v1715_v41 = vrot.slane %v860_v24, 7  ;;  %v1907_v42 = vrot.slane %v860_v24, 1  ;;  %v5451_v43 = vpop.f32.mrb[17].mxu0 }
 0x101   :  { %v5448_v39 = vadd.f32 %v2223_v22, %v2095_v44  ;;  %v5453_v52 = vadd.f32 %v2222_v20, %v2094_v62  ;;  %v2097_v45 = vmul.f32 0.75, %v860_v24  ;;  %v1011_v50 = vrot.slane %v794_v40, 7 }
 0x102   :  { %8462 = vst [vmem:[#allocation8_spill] sm:$0xff] %v5439_v33  ;;  %8463 = vst [vmem:[#allocation9_spill] sm:$0xff] %v5441_v34  ;;  %v2351_v17 = vadd.f32 %v2350_v51, %v5439_v33  ;;  %v2491_v25 = vmul.f32 %v5439_v33, %v5439_v33  ;;  %v1204_v53 = vrot.slane %v794_v40, 1  ;;  %v1393_v55 = vmul.f32 0.75, %v794_v40 }
 0x103   :  { %8464 = vst [vmem:[#allocation10_spill] sm:$0xff] %v5448_v39  ;;  %8465 = vst [vmem:[#allocation11_spill] sm:$0xff] %v5453_v52  ;;  %v2062_v44 = vsel %vm1193_vm1, %v1907_v42, %v860_v24  ;;  %v2418_v58 = vadd.f32 %v2417_v38, %v5453_v52  ;;  %v2622_v59 = vmul.f32 %v5453_v52, %v5453_v52  ;;  %v5463_v60 = vmul.f32 0.75, %v5350_v57  ;;  %v5465_v61 = vpop.f32.mrb[18].mxu0 }
 0x104   :  { %v2554_v56 = vadd.f32 %v2553_v63, %v2491_v25  ;;  %v1357_v51 = vsel %vm1193_vm1, %v1204_v53, %v794_v40  ;;  %v859_v28 = vadd.f32 %v5384_v27, %v5444_v36  ;;  %v2352_v62 = vadd.f32 %v2351_v17, %v5441_v34  ;;  %v5473_v38 = vpop.f32.mrb[19].mxu0 }
 0x105   :  { %v2492_v0 = vmul.f32 %v5441_v34, %v5441_v34  ;;  %v2685_v63 = vadd.f32 %v2684_v47, %v2622_v59  ;;  %v793_v29 = vadd.f32 %v5463_v60, %v5382_v26  ;;  %v2419_v57 = vadd.f32 %v2418_v58, %v5448_v39 }
 0x106   :  { %v2623_v1 = vmul.f32 %v5448_v39, %v5448_v39  ;;  %v1714_v4 = vrot.slane %v859_v28, 7  ;;  %v1906_v5 = vrot.slane %v859_v28, 1  ;;  %v2096_v9 = vmul.f32 0.75, %v859_v28 }
 0x107   :  { %v2555_v27 = vadd.f32 %v2554_v56, %v2492_v0  ;;  %v1010_v10 = vrot.slane %v793_v29, 7  ;;  %v1203_v12 = vrot.slane %v793_v29, 1  ;;  %v1392_v14 = vmul.f32 0.75, %v793_v29  ;;  %v5480_v16 = vpop.f32.mrb[20].mxu0 }
 0x108   :  { %v2686_v15 = vadd.f32 %v2685_v63, %v2623_v1  ;;  %v1716_v47 = vsel %vm1000_vm3, %v1714_v4, %v1715_v41  ;;  %v1870_v21 = vsel %vm1000_vm3, %v859_v28, %v1714_v4  ;;  %v1908_v26 = vsel %vm1193_vm1, %v1906_v5, %v1907_v42  ;;  %v5488_v24 = vpop.f32.mrb[21].mxu0 }
 0x109   :  { %v5486_v22 = vmul.f32 0.25, %v5366_v7  ;;  %v1012_v20 = vsel %vm1000_vm3, %v1010_v10, %v1011_v50  ;;  %v1164_v40 = vsel %vm1000_vm3, %v793_v29, %v1010_v10  ;;  %v1205_v17 = vsel %vm1193_vm1, %v1203_v12, %v1204_v53 }
 0x10a   :  { %v2160_v25 = vsel %vm921_vm2, %v1908_v26, %v1870_v21  ;;  %v1458_v41 = vsel %vm921_vm2, %v1205_v17, %v1164_v40  ;;  %v1459_v42 = vsel %vm921_vm2, %v1357_v51, %v1012_v20  ;;  %v2161_v58 = vsel %vm921_vm2, %v2062_v44, %v1716_v47 }
 0x10b   :  { %v2224_v56 = vmul.f32 0.25, %v2160_v25  ;;  %v1522_v59 = vmul.f32 0.25, %v1458_v41  ;;  %v1523_v28 = vmul.f32 0.25, %v1459_v42  ;;  %v2225_v50 = vmul.f32 0.25, %v2161_v58  ;;  %v5504_v53 = vpop.f32.mrb[22].mxu0  ;;  %v5541_v42 = vpop.f32.mrb[0].mxu1 }
 0x10c   :  { %v5502_v0 = vmul.f32 0.75, %v5366_v7  ;;  %v862_v29 = vadd.f32 %v730_v23, %v5486_v22  ;;  %v5510_v1 = vmul.f32 0.25, %v5370_v13  ;;  %v5513_v51 = vmul.f32 0.75, %v5370_v13  ;;  %v5515_v44 = vpop.f32.mrb[23].mxu0 }
 0x10d   :  { %v5506_v63 = vadd.f32 %v2224_v56, %v2096_v9  ;;  %v5517_v4 = vadd.f32 %v1522_v59, %v1392_v14  ;;  %v5519_v5 = vadd.f32 %v1523_v28, %v1393_v55  ;;  %v5521_v7 = vadd.f32 %v2225_v50, %v2097_v45 }
 0x10e   :  { %v796_v9 = vadd.f32 %v5502_v0, %v5420_v2  ;;  %v1718_v12 = vrot.slane %v862_v29, 7  ;;  %v1910_v47 = vrot.slane %v862_v29, 1  ;;  %v2099_v40 = vmul.f32 0.75, %v862_v29 }
 0x10f   :  { %8466 = vst [vmem:[#allocation12_spill] sm:$0xff] %v5506_v63  ;;  %8467 = vst [vmem:[#allocation13_spill] sm:$0xff] %v5517_v4  ;;  %v2420_v10 = vadd.f32 %v2419_v57, %v5506_v63  ;;  %v2624_v23 = vmul.f32 %v5506_v63, %v5506_v63  ;;  %v2353_v13 = vadd.f32 %v2352_v62, %v5517_v4  ;;  %v5531_v26 = vpop.f32.mrb[24].mxu0 }
 0x110   :  { %8468 = vst [vmem:[#allocation14_spill] sm:$0xff] %v5519_v5  ;;  %8469 = vst [vmem:[#allocation15_spill] sm:$0xff] %v5521_v7  ;;  %v2493_v14 = vmul.f32 %v5517_v4, %v5517_v4  ;;  %v1014_v21 = vrot.slane %v796_v9, 7  ;;  %v1207_v55 = vrot.slane %v796_v9, 1  ;;  %v1395_v20 = vmul.f32 0.75, %v796_v9  ;;  %v5534_v57 = vpop.f32.mrb[25].mxu0 }
 0x111   :  { %v2687_v45 = vadd.f32 %v2686_v15, %v2624_v23  ;;  %v2063_v2 = vsel %vm1193_vm1, %v1910_v47, %v862_v29  ;;  %v795_v62 = vadd.f32 %v5513_v51, %v5444_v36  ;;  %v861_v41 = vadd.f32 %v5463_v60, %v5510_v1 }
 0x112   :  { %v2556_v17 = vadd.f32 %v2555_v27, %v2493_v14  ;;  %v1358_v25 = vsel %vm1193_vm1, %v1207_v55, %v796_v9  ;;  %v2354_v58 = vadd.f32 %v2353_v13, %v5519_v5  ;;  %v2421_v15 = vadd.f32 %v2420_v10, %v5521_v7 }
 0x113   :  { %v2494_v56 = vmul.f32 %v5519_v5, %v5519_v5  ;;  %v2625_v27 = vmul.f32 %v5521_v7, %v5521_v7  ;;  %v1013_v59 = vrot.slane %v795_v62, 7  ;;  %v1206_v28 = vrot.slane %v795_v62, 1  ;;  %v5549_v36 = vpop.f32.mrb[26].mxu0 }
 0x114   :  { %v1394_v50 = vmul.f32 0.75, %v795_v62  ;;  %v1717_v29 = vrot.slane %v861_v41, 7  ;;  %v1909_v9 = vrot.slane %v861_v41, 1  ;;  %v2098_v60 = vmul.f32 0.75, %v861_v41  ;;  %v5551_v6 = vpop.f32.mrb[27].mxu0 }
 0x115   :  { %v2557_v23 = vadd.f32 %v2556_v17, %v2494_v56  ;;  %v2688_v14 = vadd.f32 %v2687_v45, %v2625_v27  ;;  %v1015_v10 = vsel %vm1000_vm3, %v1013_v59, %v1014_v21  ;;  %v1165_v13 = vsel %vm1000_vm3, %v795_v62, %v1013_v59 }
 0x116   :  { %v1208_v63 = vsel %vm1193_vm1, %v1206_v28, %v1207_v55  ;;  %v1719_v7 = vsel %vm1000_vm3, %v1717_v29, %v1718_v12  ;;  %v1461_v52 = vsel %vm921_vm2, %v1358_v25, %v1015_v10  ;;  %v1871_v32 = vsel %vm1000_vm3, %v861_v41, %v1717_v29  ;;  %v5569_v12 = vpop.f32.mrb[1].mxu1 }
 0x117   :  { %v1460_v39 = vsel %vm921_vm2, %v1208_v63, %v1165_v13  ;;  %v1911_v45 = vsel %vm1193_vm1, %v1909_v9, %v1910_v47  ;;  %v1525_v56 = vmul.f32 0.25, %v1461_v52  ;;  %v2163_v55 = vsel %vm921_vm2, %v2063_v2, %v1719_v7  ;;  %v5567_v62 = vpop.f32.mrb[28].mxu0  ;;  %v5589_v2 = vpop.f32.mrb[2].mxu1 }
 0x118   :  { %v1524_v17 = vmul.f32 0.25, %v1460_v39  ;;  %v2162_v21 = vsel %vm921_vm2, %v1911_v45, %v1871_v32  ;;  %v2227_v27 = vmul.f32 0.25, %v2163_v55  ;;  %v5572_v25 = vmul.f32 0.25, %v5386_v30  ;;  %v5577_v39 = vpop.f32.mrb[29].mxu0 }
 0x119   :  { %v2226_v63 = vmul.f32 0.25, %v2162_v21  ;;  %v5575_v41 = vmul.f32 0.75, %v5386_v30  ;;  %v5581_v32 = vadd.f32 %v1525_v56, %v1395_v20  ;;  %v5584_v7 = vmul.f32 0.25, %v5395_v35 }
 0x11a   :  { %v5579_v52 = vadd.f32 %v1524_v17, %v1394_v50  ;;  %v5587_v47 = vmul.f32 0.75, %v5395_v35  ;;  %v5593_v28 = vadd.f32 %v2227_v27, %v2099_v40  ;;  %v864_v50 = vadd.f32 %v5502_v0, %v5572_v25 }
 0x11b   :  { %8471 = vst [vmem:[#allocation17_spill] sm:$0xff] %v5581_v32  ;;  %v5591_v59 = vadd.f32 %v2226_v63, %v2098_v60  ;;  %v798_v30 = vadd.f32 %v5575_v41, %v5486_v22  ;;  %v863_v9 = vadd.f32 %v5513_v51, %v5584_v7 }
 0x11c   :  { %8470 = vst [vmem:[#allocation16_spill] sm:$0xff] %v5579_v52  ;;  %8473 = vst [vmem:[#allocation19_spill] sm:$0xff] %v5593_v28  ;;  %v2355_v20 = vadd.f32 %v2354_v58, %v5579_v52  ;;  %v2495_v29 = vmul.f32 %v5579_v52, %v5579_v52  ;;  %v797_v35 = vadd.f32 %v5587_v47, %v5510_v1  ;;  %v1721_v45 = vrot.slane %v864_v50, 7 }
 0x11d   :  { %8472 = vst [vmem:[#allocation18_spill] sm:$0xff] %v5591_v59  ;;  %v2422_v40 = vadd.f32 %v2421_v15, %v5591_v59  ;;  %v2626_v60 = vmul.f32 %v5591_v59, %v5591_v59  ;;  %v1017_v22 = vrot.slane %v798_v30, 7  ;;  %v1210_v10 = vrot.slane %v798_v30, 1  ;;  %v5611_v15 = vpop.f32.mrb[30].mxu0 }
 0x11e   :  { %v2558_v13 = vadd.f32 %v2557_v23, %v2495_v29  ;;  %v1397_v0 = vmul.f32 0.75, %v798_v30  ;;  %v1913_v58 = vrot.slane %v864_v50, 1  ;;  %v2101_v21 = vmul.f32 0.75, %v864_v50 }
 0x11f   :  { %v2689_v17 = vadd.f32 %v2688_v14, %v2626_v60  ;;  %v1359_v56 = vsel %vm1193_vm1, %v1210_v10, %v798_v30  ;;  %v1016_v55 = vrot.slane %v797_v35, 7  ;;  %v1209_v63 = vrot.slane %v797_v35, 1 }
 0x120   :  { %v2064_v1 = vsel %vm1193_vm1, %v1913_v58, %v864_v50  ;;  %v1396_v51 = vmul.f32 0.75, %v797_v35  ;;  %v1720_v27 = vrot.slane %v863_v9, 7  ;;  %v1912_v23 = vrot.slane %v863_v9, 1 }
 0x121   :  { %v1018_v59 = vsel %vm1000_vm3, %v1016_v55, %v1017_v22  ;;  %v1166_v31 = vsel %vm1000_vm3, %v797_v35, %v1016_v55  ;;  %v2100_v29 = vmul.f32 0.75, %v863_v9  ;;  %v1211_v52 = vsel %vm1193_vm1, %v1209_v63, %v1210_v10  ;;  %v5640_v63 = vpop.f32.mrb[3].mxu1 }
 0x122   :  { %v1463_v14 = vsel %vm921_vm2, %v1359_v56, %v1018_v59  ;;  %v1722_v30 = vsel %vm1000_vm3, %v1720_v27, %v1721_v45  ;;  %v1872_v50 = vsel %vm1000_vm3, %v863_v9, %v1720_v27  ;;  %v1462_v60 = vsel %vm921_vm2, %v1211_v52, %v1166_v31 }
 0x123   :  { %v1527_v5 = vmul.f32 0.25, %v1463_v14  ;;  %v1914_v4 = vsel %vm1193_vm1, %v1912_v23, %v1913_v58  ;;  %v2165_v35 = vsel %vm921_vm2, %v2064_v1, %v1722_v30  ;;  %v1526_v22 = vmul.f32 0.25, %v1462_v60 }
 0x124   :  { %v2164_v10 = vsel %vm921_vm2, %v1914_v4, %v1872_v50  ;;  %v2229_v55 = vmul.f32 0.25, %v2165_v35  ;;  %v2356_v59 = vadd.f32 %v2355_v20, %v5581_v32  ;;  %v2423_v9 = vadd.f32 %v2422_v40, %v5593_v28 }
 0x125   :  { %v5628_v56 = vadd.f32 %v1527_v5, %v1397_v0  ;;  %v2228_v45 = vmul.f32 0.25, %v2164_v10  ;;  %v2496_v31 = vmul.f32 %v5581_v32, %v5581_v32  ;;  %v5633_v52 = vadd.f32 %v1526_v22, %v1396_v51  ;;  %v5655_v22 = vpop.f32.mrb[31].mxu0 }
 0x126   :  { %v5635_v58 = vadd.f32 %v2229_v55, %v2101_v21  ;;  %v2627_v1 = vmul.f32 %v5593_v28, %v5593_v28  ;;  %v676_v4 = vmul.f32 0.25, %v5406_v46  ;;  %v736_v0 = vmul.f32 0.75, %v5406_v46 }
 0x127   :  { %8474 = vst [vmem:[#allocation20_spill] sm:$0xff] %v5628_v56  ;;  %8475 = vst [vmem:[#allocation21_spill] sm:$0xff] %v5633_v52  ;;  %v5642_v20 = vadd.f32 %v2228_v45, %v2100_v29  ;;  %v2559_v5 = vadd.f32 %v2558_v13, %v2496_v31  ;;  %v675_v40 = vmul.f32 0.25, %v5413_v54  ;;  %v2357_v27 = vadd.f32 %v2356_v59, %v5633_v52 }
 0x128   :  { %8476 = vst [vmem:[#allocation22_spill] sm:$0xff] %v5635_v58  ;;  %v2497_v21 = vmul.f32 %v5633_v52, %v5633_v52  ;;  %v2690_v51 = vadd.f32 %v2689_v17, %v2627_v1  ;;  %v866_v23 = vadd.f32 %v5575_v41, %v676_v4  ;;  %v800_v29 = vadd.f32 %v736_v0, %v5572_v25 }
 0x129   :  { %8477 = vst [vmem:[#allocation23_spill] sm:$0xff] %v5642_v20  ;;  %v2424_v14 = vadd.f32 %v2423_v9, %v5642_v20  ;;  %v2628_v30 = vmul.f32 %v5642_v20, %v5642_v20  ;;  %v735_v13 = vmul.f32 0.75, %v5413_v54  ;;  %v865_v9 = vadd.f32 %v5587_v47, %v675_v40 }
 0x12a   :  { %v2560_v46 = vadd.f32 %v2559_v5, %v2497_v21  ;;  %v1724_v50 = vrot.slane %v866_v23, 7  ;;  %v1916_v60 = vrot.slane %v866_v23, 1  ;;  %v2103_v35 = vmul.f32 0.75, %v866_v23 }
 0x12b   :  { %v2691_v10 = vadd.f32 %v2690_v51, %v2628_v30  ;;  %v1020_v55 = vrot.slane %v800_v29, 7  ;;  %v1213_v17 = vrot.slane %v800_v29, 1  ;;  %v1399_v59 = vmul.f32 0.75, %v800_v29 }
 0x12c   :  { %v2065_v41 = vsel %vm1193_vm1, %v1916_v60, %v866_v23  ;;  %v799_v45 = vadd.f32 %v735_v13, %v5584_v7  ;;  %v2358_v25 = vadd.f32 %v2357_v27, %v5628_v56  ;;  %v2425_v31 = vadd.f32 %v2424_v14, %v5635_v58 }
 0x12d   :  { %v1360_v54 = vsel %vm1193_vm1, %v1213_v17, %v800_v29  ;;  %v2498_v1 = vmul.f32 %v5628_v56, %v5628_v56  ;;  %v2629_v5 = vmul.f32 %v5635_v58, %v5635_v58  ;;  %v1723_v23 = vrot.slane %v865_v9, 7 }
 0x12e   :  { %v1019_v21 = vrot.slane %v799_v45, 7  ;;  %v1212_v51 = vrot.slane %v799_v45, 1  ;;  %v1398_v30 = vmul.f32 0.75, %v799_v45  ;;  %v1915_v20 = vrot.slane %v865_v9, 1 }
 0x12f   :  { %v2102_v7 = vmul.f32 0.75, %v865_v9  ;;  %v2561_v28 = vadd.f32 %v2560_v46, %v2498_v1  ;;  %v2692_v47 = vadd.f32 %v2691_v10, %v2629_v5  ;;  %v1725_v52 = vsel %vm1000_vm3, %v1723_v23, %v1724_v50 }
 0x130   :  { %v1021_v27 = vsel %vm1000_vm3, %v1019_v21, %v1020_v55  ;;  %v1167_v29 = vsel %vm1000_vm3, %v799_v45, %v1019_v21  ;;  %v1214_v14 = vsel %vm1193_vm1, %v1212_v51, %v1213_v17  ;;  %v1873_v32 = vsel %vm1000_vm3, %v865_v9, %v1723_v23 }
 0x131   :  { %v1464_v56 = vsel %vm921_vm2, %v1214_v14, %v1167_v29  ;;  %v1465_v58 = vsel %vm921_vm2, %v1360_v54, %v1021_v27  ;;  %v1917_v34 = vsel %vm1193_vm1, %v1915_v20, %v1916_v60  ;;  %v2167_v17 = vsel %vm921_vm2, %v2065_v41, %v1725_v52 }
 0x132   :  { %v1528_v46 = vmul.f32 0.25, %v1464_v56  ;;  %v1529_v10 = vmul.f32 0.25, %v1465_v58  ;;  %v2166_v55 = vsel %vm921_vm2, %v1917_v34, %v1873_v32  ;;  %v2231_v50 = vmul.f32 0.25, %v2167_v17 }
 0x133   :  { %v2230_v45 = vmul.f32 0.25, %v2166_v55  ;;  %v5682_v1 = vmul.f32 0.25, %v5422_v3  ;;  %v738_v5 = vmul.f32 0.75, %v5422_v3  ;;  %v5690_v56 = vmul.f32 0.25, %v5430_v11 }
 0x134   :  { %v5685_v54 = vadd.f32 %v1528_v46, %v1398_v30  ;;  %v5687_v9 = vadd.f32 %v1529_v10, %v1399_v59  ;;  %v5693_v58 = vmul.f32 0.75, %v5430_v11  ;;  %v5697_v32 = vadd.f32 %v2231_v50, %v2103_v35  ;;  %v5708_v30 = vpop.f32.mrb[4].mxu1 }
 0x135   :  { %v5695_v34 = vadd.f32 %v2230_v45, %v2102_v7  ;;  %v802_v52 = vadd.f32 %v738_v5, %v676_v4  ;;  %v868_v20 = vadd.f32 %v736_v0, %v5682_v1  ;;  %v867_v41 = vadd.f32 %v735_v13, %v5690_v56 }
 0x136   :  { %8478 = vst [vmem:[#allocation24_spill] sm:$0xff] %v5685_v54  ;;  %8479 = vst [vmem:[#allocation25_spill] sm:$0xff] %v5687_v9  ;;  %v2359_v60 = vadd.f32 %v2358_v25, %v5685_v54  ;;  %v2499_v3 = vmul.f32 %v5685_v54, %v5685_v54  ;;  %v801_v59 = vadd.f32 %v5693_v58, %v675_v40 }
 0x137   :  { %8480 = vst [vmem:[#allocation26_spill] sm:$0xff] %v5695_v34  ;;  %8481 = vst [vmem:[#allocation27_spill] sm:$0xff] %v5697_v32  ;;  %v2426_v21 = vadd.f32 %v2425_v31, %v5695_v34  ;;  %v2630_v11 = vmul.f32 %v5695_v34, %v5695_v34  ;;  %v1023_v51 = vrot.slane %v802_v52, 7  ;;  %v1216_v35 = vrot.slane %v802_v52, 1 }
 0x138   :  { %v2562_v4 = vadd.f32 %v2561_v28, %v2499_v3  ;;  %v1401_v0 = vmul.f32 0.75, %v802_v52  ;;  %v1727_v23 = vrot.slane %v868_v20, 7  ;;  %v1919_v25 = vrot.slane %v868_v20, 1 }
 0x139   :  { %v2693_v7 = vadd.f32 %v2692_v47, %v2630_v11  ;;  %v1361_v27 = vsel %vm1193_vm1, %v1216_v35, %v802_v52  ;;  %v2105_v29 = vmul.f32 0.75, %v868_v20  ;;  %v1022_v40 = vrot.slane %v801_v59, 7 }
 0x13a   :  { %v2066_v13 = vsel %vm1193_vm1, %v1919_v25, %v868_v20  ;;  %v1215_v14 = vrot.slane %v801_v59, 1  ;;  %v1400_v31 = vmul.f32 0.75, %v801_v59  ;;  %v1726_v46 = vrot.slane %v867_v41, 7 }
 0x13b   :  { %v1024_v10 = vsel %vm1000_vm3, %v1022_v40, %v1023_v51  ;;  %v1168_v55 = vsel %vm1000_vm3, %v801_v59, %v1022_v40  ;;  %v1918_v17 = vrot.slane %v867_v41, 1  ;;  %v2104_v45 = vmul.f32 0.75, %v867_v41 }
 0x13c   :  { %v1217_v28 = vsel %vm1193_vm1, %v1215_v14, %v1216_v35  ;;  %v1467_v47 = vsel %vm921_vm2, %v1361_v27, %v1024_v10  ;;  %v1728_v50 = vsel %vm1000_vm3, %v1726_v46, %v1727_v23  ;;  %v1874_v52 = vsel %vm1000_vm3, %v867_v41, %v1726_v46 }
 0x13d   :  { %v1466_v20 = vsel %vm921_vm2, %v1217_v28, %v1168_v55  ;;  %v1531_v3 = vmul.f32 0.25, %v1467_v47  ;;  %v1920_v11 = vsel %vm1193_vm1, %v1918_v17, %v1919_v25  ;;  %v2169_v59 = vsel %vm921_vm2, %v2066_v13, %v1728_v50 }
 0x13e   :  { %v1530_v51 = vmul.f32 0.25, %v1466_v20  ;;  %v2168_v35 = vsel %vm921_vm2, %v1920_v11, %v1874_v52  ;;  %v2233_v40 = vmul.f32 0.25, %v2169_v59  ;;  %v2360_v27 = vadd.f32 %v2359_v60, %v5687_v9 }
 0x13f   :  { %v5727_v14 = vadd.f32 %v1531_v3, %v1401_v0  ;;  %v2232_v23 = vmul.f32 0.25, %v2168_v35  ;;  %v2427_v41 = vadd.f32 %v2426_v21, %v5697_v32  ;;  %v2500_v46 = vmul.f32 %v5687_v9, %v5687_v9  ;;  %v5743_v21 = vpop.f32.mrb[5].mxu1 }
 0x140   :  { %v5732_v10 = vadd.f32 %v1530_v51, %v1400_v31  ;;  %v5734_v25 = vadd.f32 %v2233_v40, %v2105_v29  ;;  %v2631_v13 = vmul.f32 %v5697_v32, %v5697_v32  ;;  %v680_v55 = vmul.f32 0.25, %v5446_v37  ;;  %v5763_v32 = vpop.f32.mrb[6].mxu1 }
 0x141   :  { %8482 = vst [vmem:[#allocation28_spill] sm:$0xff] %v5727_v14  ;;  %v5739_v17 = vadd.f32 %v2232_v23, %v2104_v45  ;;  %v2563_v60 = vadd.f32 %v2562_v4, %v2500_v46  ;;  %v740_v0 = vmul.f32 0.75, %v5446_v37  ;;  %v679_v28 = vmul.f32 0.25, %v5451_v43 }
 0x142   :  { %8483 = vst [vmem:[#allocation29_spill] sm:$0xff] %v5732_v10  ;;  %8484 = vst [vmem:[#allocation30_spill] sm:$0xff] %v5734_v25  ;;  %v2361_v47 = vadd.f32 %v2360_v27, %v5732_v10  ;;  %v2501_v29 = vmul.f32 %v5732_v10, %v5732_v10  ;;  %v2694_v31 = vadd.f32 %v2693_v7, %v2631_v13  ;;  %v739_v37 = vmul.f32 0.75, %v5451_v43 }
 0x143   :  { %8485 = vst [vmem:[#allocation31_spill] sm:$0xff] %v5739_v17  ;;  %v870_v50 = vadd.f32 %v738_v5, %v680_v55  ;;  %v2428_v52 = vadd.f32 %v2427_v41, %v5739_v17  ;;  %v2632_v45 = vmul.f32 %v5739_v17, %v5739_v17  ;;  %v804_v4 = vadd.f32 %v740_v0, %v5682_v1 }
 0x144   :  { %v2564_v20 = vadd.f32 %v2563_v60, %v2501_v29  ;;  %v803_v5 = vadd.f32 %v739_v37, %v5690_v56  ;;  %v869_v23 = vadd.f32 %v5693_v58, %v679_v28  ;;  %v2362_v41 = vadd.f32 %v2361_v47, %v5727_v14 }
 0x145   :  { %v1730_v3 = vrot.slane %v870_v50, 7  ;;  %v1922_v11 = vrot.slane %v870_v50, 1  ;;  %v2107_v59 = vmul.f32 0.75, %v870_v50  ;;  %v2695_v51 = vadd.f32 %v2694_v31, %v2632_v45 }
 0x146   :  { %v1026_v35 = vrot.slane %v804_v4, 7  ;;  %v1219_v40 = vrot.slane %v804_v4, 1  ;;  %v1403_v27 = vmul.f32 0.75, %v804_v4  ;;  %v2429_v43 = vadd.f32 %v2428_v52, %v5734_v25 }
 0x147   :  { %v2067_v7 = vsel %vm1193_vm1, %v1922_v11, %v870_v50  ;;  %v2502_v46 = vmul.f32 %v5727_v14, %v5727_v14  ;;  %v2633_v13 = vmul.f32 %v5734_v25, %v5734_v25  ;;  %v1025_v60 = vrot.slane %v803_v5, 7 }
 0x148   :  { %v1362_v1 = vsel %vm1193_vm1, %v1219_v40, %v804_v4  ;;  %v1218_v29 = vrot.slane %v803_v5, 1  ;;  %v1402_v31 = vmul.f32 0.75, %v803_v5  ;;  %v1729_v50 = vrot.slane %v869_v23, 7 }
 0x149   :  { %v1921_v45 = vrot.slane %v869_v23, 1  ;;  %v2106_v56 = vmul.f32 0.75, %v869_v23  ;;  %v2565_v17 = vadd.f32 %v2564_v20, %v2502_v46  ;;  %v2696_v58 = vadd.f32 %v2695_v51, %v2633_v13 }
 0x14a   :  { %v1027_v47 = vsel %vm1000_vm3, %v1025_v60, %v1026_v35  ;;  %v1169_v52 = vsel %vm1000_vm3, %v803_v5, %v1025_v60  ;;  %v1220_v4 = vsel %vm1193_vm1, %v1218_v29, %v1219_v40  ;;  %v1731_v34 = vsel %vm1000_vm3, %v1729_v50, %v1730_v3  ;;  %v5798_v29 = vpop.f32.mrb[7].mxu1 }
 0x14b   :  { %v1468_v25 = vsel %vm921_vm2, %v1220_v4, %v1169_v52  ;;  %v1469_v14 = vsel %vm921_vm2, %v1362_v1, %v1027_v47  ;;  %v1875_v10 = vsel %vm1000_vm3, %v869_v23, %v1729_v50  ;;  %v1923_v20 = vsel %vm1193_vm1, %v1921_v45, %v1922_v11 }
 0x14c   :  { %v1532_v51 = vmul.f32 0.25, %v1468_v25  ;;  %v1533_v46 = vmul.f32 0.25, %v1469_v14  ;;  %v2170_v35 = vsel %vm921_vm2, %v1923_v20, %v1875_v10  ;;  %v2171_v40 = vsel %vm921_vm2, %v2067_v7, %v1731_v34 }
 0x14d   :  { %v2234_v5 = vmul.f32 0.25, %v2170_v35  ;;  %v2235_v3 = vmul.f32 0.25, %v2171_v40  ;;  %v5780_v13 = vmul.f32 0.25, %v5465_v61  ;;  %v742_v60 = vmul.f32 0.75, %v5465_v61 }
 0x14e   :  { %v5783_v1 = vadd.f32 %v1532_v51, %v1402_v31  ;;  %v5785_v23 = vadd.f32 %v1533_v46, %v1403_v27  ;;  %v5788_v25 = vmul.f32 0.25, %v5473_v38  ;;  %v5791_v14 = vmul.f32 0.75, %v5473_v38 }
 0x14f   :  { %v5793_v10 = vadd.f32 %v2234_v5, %v2106_v56  ;;  %v5795_v34 = vadd.f32 %v2235_v3, %v2107_v59  ;;  %v806_v11 = vadd.f32 %v742_v60, %v680_v55  ;;  %v872_v7 = vadd.f32 %v740_v0, %v5780_v13 }
 0x150   :  { %8486 = vst [vmem:[#allocation32_spill] sm:$0xff] %v5783_v1  ;;  %8487 = vst [vmem:[#allocation33_spill] sm:$0xff] %v5785_v23  ;;  %v2363_v61 = vadd.f32 %v2362_v41, %v5783_v1  ;;  %v2503_v27 = vmul.f32 %v5783_v1, %v5783_v1  ;;  %v805_v31 = vadd.f32 %v5791_v14, %v679_v28 }
 0x151   :  { %8488 = vst [vmem:[#allocation34_spill] sm:$0xff] %v5793_v10  ;;  %8489 = vst [vmem:[#allocation35_spill] sm:$0xff] %v5795_v34  ;;  %v871_v50 = vadd.f32 %v739_v37, %v5788_v25  ;;  %v2430_v38 = vadd.f32 %v2429_v43, %v5793_v10  ;;  %v2634_v59 = vmul.f32 %v5793_v10, %v5793_v10  ;;  %v1029_v45 = vrot.slane %v806_v11, 7 }
 0x152   :  { %v1222_v55 = vrot.slane %v806_v11, 1  ;;  %v2566_v56 = vadd.f32 %v2565_v17, %v2503_v27  ;;  %v1405_v0 = vmul.f32 0.75, %v806_v11  ;;  %v1733_v47 = vrot.slane %v872_v7, 7 }
 0x153   :  { %v1925_v52 = vrot.slane %v872_v7, 1  ;;  %v2697_v4 = vadd.f32 %v2696_v58, %v2634_v59  ;;  %v2109_v20 = vmul.f32 0.75, %v872_v7  ;;  %v1028_v51 = vrot.slane %v805_v31, 7  ;;  %v5817_v59 = vpop.f32.mrb[8].mxu1 }
 0x154   :  { %v1363_v41 = vsel %vm1193_vm1, %v1222_v55, %v806_v11  ;;  %v1221_v46 = vrot.slane %v805_v31, 1  ;;  %v1404_v37 = vmul.f32 0.75, %v805_v31  ;;  %v1732_v35 = vrot.slane %v871_v50, 7 }
 0x155   :  { %v2068_v28 = vsel %vm1193_vm1, %v1925_v52, %v872_v7  ;;  %v1030_v43 = vsel %vm1000_vm3, %v1028_v51, %v1029_v45  ;;  %v1170_v40 = vsel %vm1000_vm3, %v805_v31, %v1028_v51  ;;  %v1924_v5 = vrot.slane %v871_v50, 1 }
 0x156   :  { %v2108_v3 = vmul.f32 0.75, %v871_v50  ;;  %v1223_v17 = vsel %vm1193_vm1, %v1221_v46, %v1222_v55  ;;  %v1471_v58 = vsel %vm921_vm2, %v1363_v41, %v1030_v43  ;;  %v1734_v11 = vsel %vm1000_vm3, %v1732_v35, %v1733_v47 }
 0x157   :  { %v1876_v27 = vsel %vm1000_vm3, %v871_v50, %v1732_v35  ;;  %v1470_v7 = vsel %vm921_vm2, %v1223_v17, %v1170_v40  ;;  %v1535_v10 = vmul.f32 0.25, %v1471_v58  ;;  %v1926_v45 = vsel %vm1193_vm1, %v1924_v5, %v1925_v52 }
 0x158   :  { %v2173_v31 = vsel %vm921_vm2, %v2068_v28, %v1734_v11  ;;  %v1534_v51 = vmul.f32 0.25, %v1470_v7  ;;  %v2172_v55 = vsel %vm921_vm2, %v1926_v45, %v1876_v27  ;;  %v2364_v47 = vadd.f32 %v2363_v61, %v5785_v23  ;;  %v5846_v11 = vpop.f32.mrb[9].mxu1 }
 0x159   :  { %v2237_v41 = vmul.f32 0.25, %v2173_v31  ;;  %v5827_v46 = vadd.f32 %v1535_v10, %v1405_v0  ;;  %v2236_v50 = vmul.f32 0.25, %v2172_v55  ;;  %v2431_v35 = vadd.f32 %v2430_v38, %v5795_v34 }
 0x15a   :  { %v2504_v43 = vmul.f32 %v5785_v23, %v5785_v23  ;;  %v5832_v40 = vadd.f32 %v1534_v51, %v1404_v37  ;;  %v2635_v28 = vmul.f32 %v5795_v34, %v5795_v34  ;;  %v684_v5 = vmul.f32 0.25, %v5480_v16 }
 0x15b   :  { %8490 = vst [vmem:[#allocation36_spill] sm:$0xff] %v5827_v46  ;;  %v5834_v52 = vadd.f32 %v2237_v41, %v2109_v20  ;;  %v5839_v17 = vadd.f32 %v2236_v50, %v2108_v3  ;;  %v744_v10 = vmul.f32 0.75, %v5480_v16  ;;  %v683_v0 = vmul.f32 0.25, %v5488_v24 }
 0x15c   :  { %8491 = vst [vmem:[#allocation37_spill] sm:$0xff] %v5832_v40  ;;  %v2567_v61 = vadd.f32 %v2566_v56, %v2504_v43  ;;  %v2365_v38 = vadd.f32 %v2364_v47, %v5832_v40  ;;  %v2505_v37 = vmul.f32 %v5832_v40, %v5832_v40  ;;  %v2698_v58 = vadd.f32 %v2697_v4, %v2635_v28  ;;  %v5863_v40 = vpop.f32.mrb[10].mxu1 }
 0x15d   :  { %8492 = vst [vmem:[#allocation38_spill] sm:$0xff] %v5834_v52  ;;  %8493 = vst [vmem:[#allocation39_spill] sm:$0xff] %v5839_v17  ;;  %v874_v20 = vadd.f32 %v742_v60, %v684_v5  ;;  %v2432_v27 = vadd.f32 %v2431_v35, %v5839_v17  ;;  %v2636_v3 = vmul.f32 %v5839_v17, %v5839_v17  ;;  %v743_v16 = vmul.f32 0.75, %v5488_v24 }
 0x15e   :  { %v808_v56 = vadd.f32 %v744_v10, %v5780_v13  ;;  %v2568_v7 = vadd.f32 %v2567_v61, %v2505_v37  ;;  %v873_v35 = vadd.f32 %v5791_v14, %v683_v0  ;;  %v2366_v43 = vadd.f32 %v2365_v38, %v5827_v46 }
 0x15f   :  { %v1736_v45 = vrot.slane %v874_v20, 7  ;;  %v1928_v31 = vrot.slane %v874_v20, 1  ;;  %v2111_v51 = vmul.f32 0.75, %v874_v20  ;;  %v2699_v55 = vadd.f32 %v2698_v58, %v2636_v3 }
 0x160   :  { %v1032_v41 = vrot.slane %v808_v56, 7  ;;  %v1225_v47 = vrot.slane %v808_v56, 1  ;;  %v1407_v4 = vmul.f32 0.75, %v808_v56  ;;  %v807_v50 = vadd.f32 %v743_v16, %v5788_v25 }
 0x161   :  { %v2069_v60 = vsel %vm1193_vm1, %v1928_v31, %v874_v20  ;;  %v2433_v24 = vadd.f32 %v2432_v27, %v5834_v52  ;;  %v2506_v28 = vmul.f32 %v5827_v46, %v5827_v46  ;;  %v2637_v61 = vmul.f32 %v5834_v52, %v5834_v52 }
 0x162   :  { %v1364_v13 = vsel %vm1193_vm1, %v1225_v47, %v808_v56  ;;  %v1031_v37 = vrot.slane %v807_v50, 7  ;;  %v1224_v58 = vrot.slane %v807_v50, 1  ;;  %v1406_v3 = vmul.f32 0.75, %v807_v50 }
 0x163   :  { %v1735_v20 = vrot.slane %v873_v35, 7  ;;  %v1927_v17 = vrot.slane %v873_v35, 1  ;;  %v2110_v25 = vmul.f32 0.75, %v873_v35  ;;  %v2569_v34 = vadd.f32 %v2568_v7, %v2506_v28 }
 0x164   :  { %v2700_v14 = vadd.f32 %v2699_v55, %v2637_v61  ;;  %v1033_v38 = vsel %vm1000_vm3, %v1031_v37, %v1032_v41  ;;  %v1171_v27 = vsel %vm1000_vm3, %v807_v50, %v1031_v37  ;;  %v1226_v56 = vsel %vm1193_vm1, %v1224_v58, %v1225_v47 }
 0x165   :  { %v1737_v46 = vsel %vm1000_vm3, %v1735_v20, %v1736_v45  ;;  %v1472_v52 = vsel %vm921_vm2, %v1226_v56, %v1171_v27  ;;  %v1473_v23 = vsel %vm921_vm2, %v1364_v13, %v1033_v38  ;;  %v1877_v1 = vsel %vm1000_vm3, %v873_v35, %v1735_v20 }
 0x166   :  { %v1929_v7 = vsel %vm1193_vm1, %v1927_v17, %v1928_v31  ;;  %v1536_v55 = vmul.f32 0.25, %v1472_v52  ;;  %v1537_v28 = vmul.f32 0.25, %v1473_v23  ;;  %v2175_v47 = vsel %vm921_vm2, %v2069_v60, %v1737_v46  ;;  %v5898_v60 = vpop.f32.mrb[11].mxu1 }
 0x167   :  { %v2174_v41 = vsel %vm921_vm2, %v1929_v7, %v1877_v1  ;;  %v2239_v45 = vmul.f32 0.25, %v2175_v47  ;;  %v5880_v61 = vmul.f32 0.25, %v5504_v53  ;;  %v746_v37 = vmul.f32 0.75, %v5504_v53  ;;  %8498 = vst [vmem:[#allocation44_spill] sm:$0xff] %v5898_v60 }
 0x168   :  { %v2238_v50 = vmul.f32 0.25, %v2174_v41  ;;  %v5883_v13 = vadd.f32 %v1536_v55, %v1406_v3  ;;  %v5885_v35 = vadd.f32 %v1537_v28, %v1407_v4  ;;  %v5888_v52 = vmul.f32 0.25, %v5515_v44 }
 0x169   :  { %v5891_v23 = vmul.f32 0.75, %v5515_v44  ;;  %v5895_v46 = vadd.f32 %v2239_v45, %v2111_v51  ;;  %v810_v17 = vadd.f32 %v746_v37, %v684_v5  ;;  %v876_v31 = vadd.f32 %v744_v10, %v5880_v61 }
 0x16a   :  { %8494 = vst [vmem:[#allocation40_spill] sm:$0xff] %v5883_v13  ;;  %8495 = vst [vmem:[#allocation41_spill] sm:$0xff] %v5885_v35  ;;  %v5893_v1 = vadd.f32 %v2238_v50, %v2110_v25  ;;  %v2367_v53 = vadd.f32 %v2366_v43, %v5883_v13  ;;  %v2507_v4 = vmul.f32 %v5883_v13, %v5883_v13 }
 0x16b   :  { %8497 = vst [vmem:[#allocation43_spill] sm:$0xff] %v5895_v46  ;;  %v809_v58 = vadd.f32 %v5891_v23, %v683_v0  ;;  %v875_v3 = vadd.f32 %v743_v16, %v5888_v52  ;;  %v1035_v20 = vrot.slane %v810_v17, 7  ;;  %v1228_v5 = vrot.slane %v810_v17, 1 }
 0x16c   :  { %8496 = vst [vmem:[#allocation42_spill] sm:$0xff] %v5893_v1  ;;  %v2434_v44 = vadd.f32 %v2433_v24, %v5893_v1  ;;  %v2638_v51 = vmul.f32 %v5893_v1, %v5893_v1  ;;  %v2570_v25 = vadd.f32 %v2569_v34, %v2507_v4  ;;  %v1409_v10 = vmul.f32 0.75, %v810_v17 }
 0x16d   :  { %v1739_v38 = vrot.slane %v876_v31, 7  ;;  %v1931_v27 = vrot.slane %v876_v31, 1  ;;  %v1365_v43 = vsel %vm1193_vm1, %v1228_v5, %v810_v17  ;;  %v2113_v7 = vmul.f32 0.75, %v876_v31 }
 0x16e   :  { %v2701_v56 = vadd.f32 %v2700_v14, %v2638_v51  ;;  %v1034_v55 = vrot.slane %v809_v58, 7  ;;  %v1227_v28 = vrot.slane %v809_v58, 1  ;;  %v1408_v16 = vmul.f32 0.75, %v809_v58  ;;  %v5917_v51 = vpop.f32.mrb[12].mxu1 }
 0x16f   :  { %v2070_v0 = vsel %vm1193_vm1, %v1931_v27, %v876_v31  ;;  %v1738_v41 = vrot.slane %v875_v3, 7  ;;  %v1930_v50 = vrot.slane %v875_v3, 1  ;;  %v2112_v45 = vmul.f32 0.75, %v875_v3  ;;  %8499 = vst [vmem:[#allocation45_spill] sm:$0xff] %v5917_v51 }
 0x170   :  { %v1036_v24 = vsel %vm1000_vm3, %v1034_v55, %v1035_v20  ;;  %v1172_v47 = vsel %vm1000_vm3, %v809_v58, %v1034_v55  ;;  %v1229_v34 = vsel %vm1193_vm1, %v1227_v28, %v1228_v5 }
 0x171   :  { %v1475_v14 = vsel %vm921_vm2, %v1365_v43, %v1036_v24  ;;  %v1740_v17 = vsel %vm1000_vm3, %v1738_v41, %v1739_v38  ;;  %v1878_v4 = vsel %vm1000_vm3, %v875_v3, %v1738_v41  ;;  %v1474_v31 = vsel %vm921_vm2, %v1229_v34, %v1172_v47 }
 0x172   :  { %v1539_v1 = vmul.f32 0.25, %v1475_v14  ;;  %v1932_v20 = vsel %vm1193_vm1, %v1930_v50, %v1931_v27  ;;  %v2177_v58 = vsel %vm921_vm2, %v2070_v0, %v1740_v17  ;;  %v1538_v55 = vmul.f32 0.25, %v1474_v31  ;;  %v5946_v17 = vpop.f32.mrb[13].mxu1 }
 0x173   :  { %v2176_v5 = vsel %vm921_vm2, %v1932_v20, %v1878_v4  ;;  %v2241_v43 = vmul.f32 0.25, %v2177_v58  ;;  %v2368_v38 = vadd.f32 %v2367_v53, %v5885_v35  ;;  %v2435_v41 = vadd.f32 %v2434_v44, %v5895_v46  ;;  %8504 = vst [vmem:[#allocation50_spill] sm:$0xff] %v5946_v17 }
 0x174   :  { %v5927_v28 = vadd.f32 %v1539_v1, %v1409_v10  ;;  %v2240_v3 = vmul.f32 0.25, %v2176_v5  ;;  %v2508_v24 = vmul.f32 %v5885_v35, %v5885_v35  ;;  %v5932_v47 = vadd.f32 %v1538_v55, %v1408_v16 }
 0x175   :  { %v5934_v27 = vadd.f32 %v2241_v43, %v2113_v7  ;;  %v2639_v0 = vmul.f32 %v5895_v46, %v5895_v46  ;;  %v688_v50 = vmul.f32 0.25, %v5531_v26  ;;  %v748_v1 = vmul.f32 0.75, %v5531_v26 }
 0x176   :  { %8500 = vst [vmem:[#allocation46_spill] sm:$0xff] %v5927_v28  ;;  %8501 = vst [vmem:[#allocation47_spill] sm:$0xff] %v5932_v47  ;;  %v5939_v34 = vadd.f32 %v2240_v3, %v2112_v45  ;;  %v2571_v53 = vadd.f32 %v2570_v25, %v2508_v24  ;;  %v687_v10 = vmul.f32 0.25, %v5534_v57  ;;  %v2369_v44 = vadd.f32 %v2368_v38, %v5932_v47 }
 0x177   :  { %8502 = vst [vmem:[#allocation48_spill] sm:$0xff] %v5934_v27  ;;  %v2509_v16 = vmul.f32 %v5932_v47, %v5932_v47  ;;  %v2702_v14 = vadd.f32 %v2701_v56, %v2639_v0  ;;  %v878_v7 = vadd.f32 %v746_v37, %v688_v50  ;;  %v812_v25 = vadd.f32 %v748_v1, %v5880_v61  ;;  %v5963_v47 = vpop.f32.mrb[14].mxu1 }
 0x178   :  { %8503 = vst [vmem:[#allocation49_spill] sm:$0xff] %v5939_v34  ;;  %v2436_v4 = vadd.f32 %v2435_v41, %v5939_v34  ;;  %v2640_v45 = vmul.f32 %v5939_v34, %v5939_v34  ;;  %v747_v26 = vmul.f32 0.75, %v5534_v57  ;;  %v877_v41 = vadd.f32 %v5891_v23, %v687_v10  ;;  %8505 = vst [vmem:[#allocation51_spill] sm:$0xff] %v5963_v47 }
 0x179   :  { %v2572_v31 = vadd.f32 %v2571_v53, %v2509_v16  ;;  %v1742_v20 = vrot.slane %v878_v7, 7  ;;  %v1934_v58 = vrot.slane %v878_v7, 1  ;;  %v2115_v55 = vmul.f32 0.75, %v878_v7 }
 0x17a   :  { %v2703_v5 = vadd.f32 %v2702_v14, %v2640_v45  ;;  %v1038_v43 = vrot.slane %v812_v25, 7  ;;  %v1231_v38 = vrot.slane %v812_v25, 1  ;;  %v1411_v56 = vmul.f32 0.75, %v812_v25 }
 0x17b   :  { %v2071_v37 = vsel %vm1193_vm1, %v1934_v58, %v878_v7  ;;  %v811_v3 = vadd.f32 %v747_v26, %v5888_v52  ;;  %v2370_v24 = vadd.f32 %v2369_v44, %v5927_v28  ;;  %v2437_v57 = vadd.f32 %v2436_v4, %v5934_v27 }
 0x17c   :  { %v1366_v61 = vsel %vm1193_vm1, %v1231_v38, %v812_v25  ;;  %v2510_v0 = vmul.f32 %v5927_v28, %v5927_v28  ;;  %v2641_v53 = vmul.f32 %v5934_v27, %v5934_v27  ;;  %v1741_v7 = vrot.slane %v877_v41, 7 }
 0x17d   :  { %v1037_v16 = vrot.slane %v811_v3, 7  ;;  %v1230_v14 = vrot.slane %v811_v3, 1  ;;  %v1410_v45 = vmul.f32 0.75, %v811_v3  ;;  %v1933_v34 = vrot.slane %v877_v41, 1 }
 0x17e   :  { %v2114_v52 = vmul.f32 0.75, %v877_v41  ;;  %v2573_v46 = vadd.f32 %v2572_v31, %v2510_v0  ;;  %v2704_v23 = vadd.f32 %v2703_v5, %v2641_v53  ;;  %v1743_v28 = vsel %vm1000_vm3, %v1741_v7, %v1742_v20 }
 0x17f   :  { %v1039_v44 = vsel %vm1000_vm3, %v1037_v16, %v1038_v43  ;;  %v1173_v4 = vsel %vm1000_vm3, %v811_v3, %v1037_v16  ;;  %v1232_v25 = vsel %vm1193_vm1, %v1230_v14, %v1231_v38  ;;  %v1879_v13 = vsel %vm1000_vm3, %v877_v41, %v1741_v7 }
 0x180   :  { %v1476_v27 = vsel %vm921_vm2, %v1232_v25, %v1173_v4  ;;  %v1477_v35 = vsel %vm921_vm2, %v1366_v61, %v1039_v44  ;;  %v1935_v31 = vsel %vm1193_vm1, %v1933_v34, %v1934_v58  ;;  %v2179_v38 = vsel %vm921_vm2, %v2071_v37, %v1743_v28  ;;  %v5998_v37 = vpop.f32.mrb[15].mxu1 }
 0x181   :  { %v1540_v5 = vmul.f32 0.25, %v1476_v27  ;;  %v1541_v0 = vmul.f32 0.25, %v1477_v35  ;;  %v2178_v43 = vsel %vm921_vm2, %v1935_v31, %v1879_v13  ;;  %v2243_v20 = vmul.f32 0.25, %v2179_v38  ;;  %8510 = vst [vmem:[#allocation56_spill] sm:$0xff] %v5998_v37 }
 0x182   :  { %v2242_v3 = vmul.f32 0.25, %v2178_v43  ;;  %v5980_v53 = vmul.f32 0.25, %v5549_v36  ;;  %v750_v16 = vmul.f32 0.75, %v5549_v36  ;;  %v5988_v27 = vmul.f32 0.25, %v5551_v6 }
 0x183   :  { %v5983_v61 = vadd.f32 %v1540_v5, %v1410_v45  ;;  %v5985_v41 = vadd.f32 %v1541_v0, %v1411_v56  ;;  %v5991_v35 = vmul.f32 0.75, %v5551_v6  ;;  %v5995_v28 = vadd.f32 %v2243_v20, %v2115_v55 }
 0x184   :  { %v5993_v13 = vadd.f32 %v2242_v3, %v2114_v52  ;;  %v814_v34 = vadd.f32 %v750_v16, %v688_v50  ;;  %v880_v58 = vadd.f32 %v748_v1, %v5980_v53  ;;  %v879_v45 = vadd.f32 %v747_v26, %v5988_v27 }
 0x185   :  { %8506 = vst [vmem:[#allocation52_spill] sm:$0xff] %v5983_v61  ;;  %8507 = vst [vmem:[#allocation53_spill] sm:$0xff] %v5985_v41  ;;  %v2371_v36 = vadd.f32 %v2370_v24, %v5983_v61  ;;  %v2511_v56 = vmul.f32 %v5983_v61, %v5983_v61  ;;  %v813_v14 = vadd.f32 %v5991_v35, %v687_v10 }
 0x186   :  { %8508 = vst [vmem:[#allocation54_spill] sm:$0xff] %v5993_v13  ;;  %8509 = vst [vmem:[#allocation55_spill] sm:$0xff] %v5995_v28  ;;  %v2438_v6 = vadd.f32 %v2437_v57, %v5993_v13  ;;  %v2642_v55 = vmul.f32 %v5993_v13, %v5993_v13  ;;  %v1041_v7 = vrot.slane %v814_v34, 7  ;;  %v1234_v50 = vrot.slane %v814_v34, 1 }
 0x187   :  { %v2574_v52 = vadd.f32 %v2573_v46, %v2511_v56  ;;  %v1413_v1 = vmul.f32 0.75, %v814_v34  ;;  %v1745_v44 = vrot.slane %v880_v58, 7  ;;  %v1937_v4 = vrot.slane %v880_v58, 1 }
 0x188   :  { %v2705_v25 = vadd.f32 %v2704_v23, %v2642_v55  ;;  %v1367_v24 = vsel %vm1193_vm1, %v1234_v50, %v814_v34  ;;  %v2117_v31 = vmul.f32 0.75, %v880_v58  ;;  %v1040_v5 = vrot.slane %v813_v14, 7  ;;  %v6017_v55 = vpop.f32.mrb[16].mxu1 }
 0x189   :  { %v2072_v10 = vsel %vm1193_vm1, %v1937_v4, %v880_v58  ;;  %v1233_v0 = vrot.slane %v813_v14, 1  ;;  %v1412_v26 = vmul.f32 0.75, %v813_v14  ;;  %v1744_v43 = vrot.slane %v879_v45, 7  ;;  %8511 = vst [vmem:[#allocation57_spill] sm:$0xff] %v6017_v55 }
 0x18a   :  { %v1042_v57 = vsel %vm1000_vm3, %v1040_v5, %v1041_v7  ;;  %v1174_v38 = vsel %vm1000_vm3, %v813_v14, %v1040_v5  ;;  %v1936_v3 = vrot.slane %v879_v45, 1  ;;  %v2116_v20 = vmul.f32 0.75, %v879_v45 }
 0x18b   :  { %v1235_v46 = vsel %vm1193_vm1, %v1233_v0, %v1234_v50  ;;  %v1479_v23 = vsel %vm921_vm2, %v1367_v24, %v1042_v57  ;;  %v1746_v34 = vsel %vm1000_vm3, %v1744_v43, %v1745_v44  ;;  %v1880_v56 = vsel %vm1000_vm3, %v879_v45, %v1744_v43 }
 0x18c   :  { %v1478_v58 = vsel %vm921_vm2, %v1235_v46, %v1174_v38  ;;  %v1543_v13 = vmul.f32 0.25, %v1479_v23  ;;  %v1938_v7 = vsel %vm1193_vm1, %v1936_v3, %v1937_v4  ;;  %v2181_v14 = vsel %vm921_vm2, %v2072_v10, %v1746_v34  ;;  %v6053_v34 = vpop.f32.mrb[17].mxu1 }
 0x18d   :  { %v1542_v5 = vmul.f32 0.25, %v1478_v58  ;;  %v2180_v50 = vsel %vm921_vm2, %v1938_v7, %v1880_v56  ;;  %v2245_v24 = vmul.f32 0.25, %v2181_v14  ;;  %v2372_v44 = vadd.f32 %v2371_v36, %v5985_v41  ;;  %8516 = vst [vmem:[#allocation62_spill] sm:$0xff] %v6053_v34 }
 0x18e   :  { %v6027_v0 = vadd.f32 %v1543_v13, %v1413_v1  ;;  %v2244_v45 = vmul.f32 0.25, %v2180_v50  ;;  %v2439_v43 = vadd.f32 %v2438_v6, %v5995_v28  ;;  %v2512_v57 = vmul.f32 %v5985_v41, %v5985_v41 }
 0x18f   :  { %v6032_v38 = vadd.f32 %v1542_v5, %v1412_v26  ;;  %v6034_v4 = vadd.f32 %v2245_v24, %v2117_v31  ;;  %v2643_v10 = vmul.f32 %v5995_v28, %v5995_v28  ;;  %v6039_v3 = vmul.f32 0.25, %v5567_v62 }
 0x190   :  { %8512 = vst [vmem:[#allocation58_spill] sm:$0xff] %v6027_v0  ;;  %v6041_v46 = vadd.f32 %v2244_v45, %v2116_v20  ;;  %v2575_v13 = vadd.f32 %v2574_v52, %v2512_v57  ;;  %v6044_v36 = vmul.f32 0.75, %v5567_v62  ;;  %v6047_v6 = vmul.f32 0.25, %v5577_v39 }
 0x191   :  { %8513 = vst [vmem:[#allocation59_spill] sm:$0xff] %v6032_v38  ;;  %8514 = vst [vmem:[#allocation60_spill] sm:$0xff] %v6034_v4  ;;  %v2373_v1 = vadd.f32 %v2372_v44, %v6032_v38  ;;  %v2513_v31 = vmul.f32 %v6032_v38, %v6032_v38  ;;  %v2706_v26 = vadd.f32 %v2705_v25, %v2643_v10  ;;  %v6061_v56 = vmul.f32 0.75, %v5577_v39  ;;  %v6075_v38 = vpop.f32.mrb[18].mxu1 }
 0x192   :  { %8515 = vst [vmem:[#allocation61_spill] sm:$0xff] %v6041_v46  ;;  %v882_v23 = vadd.f32 %v750_v16, %v6039_v3  ;;  %v2440_v20 = vadd.f32 %v2439_v43, %v6041_v46  ;;  %v2644_v52 = vmul.f32 %v6041_v46, %v6041_v46  ;;  %v816_v62 = vadd.f32 %v6044_v36, %v5980_v53 }
 0x193   :  { %v2576_v58 = vadd.f32 %v2575_v13, %v2513_v31  ;;  %v815_v45 = vadd.f32 %v6061_v56, %v5988_v27  ;;  %v881_v43 = vadd.f32 %v5991_v35, %v6047_v6  ;;  %v2374_v53 = vadd.f32 %v2373_v1, %v6027_v0  ;;  %8517 = vst [vmem:[#allocation63_spill] sm:$0xff] %v6075_v38 }
 0x194   :  { %v1748_v7 = vrot.slane %v882_v23, 7  ;;  %v1940_v14 = vrot.slane %v882_v23, 1  ;;  %v2119_v5 = vmul.f32 0.75, %v882_v23  ;;  %v2707_v25 = vadd.f32 %v2706_v26, %v2644_v52 }
 0x195   :  { %v1044_v50 = vrot.slane %v816_v62, 7  ;;  %v1237_v16 = vrot.slane %v816_v62, 1  ;;  %v1415_v24 = vmul.f32 0.75, %v816_v62  ;;  %v2441_v57 = vadd.f32 %v2440_v20, %v6034_v4 }
 0x196   :  { %v2073_v44 = vsel %vm1193_vm1, %v1940_v14, %v882_v23  ;;  %v2514_v10 = vmul.f32 %v6027_v0, %v6027_v0  ;;  %v2645_v13 = vmul.f32 %v6034_v4, %v6034_v4  ;;  %v1043_v31 = vrot.slane %v815_v45, 7 }
 0x197   :  { %v1368_v39 = vsel %vm1193_vm1, %v1237_v16, %v816_v62  ;;  %v1236_v26 = vrot.slane %v815_v45, 1  ;;  %v1414_v23 = vmul.f32 0.75, %v815_v45  ;;  %v1747_v52 = vrot.slane %v881_v43, 7 }
 0x198   :  { %v1939_v27 = vrot.slane %v881_v43, 1  ;;  %v2118_v46 = vmul.f32 0.75, %v881_v43  ;;  %v2577_v28 = vadd.f32 %v2576_v58, %v2514_v10  ;;  %v2708_v35 = vadd.f32 %v2707_v25, %v2645_v13 }
 0x199   :  { %v1045_v1 = vsel %vm1000_vm3, %v1043_v31, %v1044_v50  ;;  %v1175_v20 = vsel %vm1000_vm3, %v815_v45, %v1043_v31  ;;  %v1238_v62 = vsel %vm1193_vm1, %v1236_v26, %v1237_v16  ;;  %v1749_v0 = vsel %vm1000_vm3, %v1747_v52, %v1748_v7 }
 0x19a   :  { %v1480_v4 = vsel %vm921_vm2, %v1238_v62, %v1175_v20  ;;  %v1481_v41 = vsel %vm921_vm2, %v1368_v39, %v1045_v1  ;;  %v1881_v61 = vsel %vm1000_vm3, %v881_v43, %v1747_v52  ;;  %v1941_v58 = vsel %vm1193_vm1, %v1939_v27, %v1940_v14  ;;  %v6108_v43 = vpop.f32.mrb[19].mxu1 }
 0x19b   :  { %v1544_v25 = vmul.f32 0.25, %v1480_v4  ;;  %v1545_v10 = vmul.f32 0.25, %v1481_v41  ;;  %v2182_v50 = vsel %vm921_vm2, %v1941_v58, %v1881_v61  ;;  %v2183_v16 = vsel %vm921_vm2, %v2073_v44, %v1749_v0  ;;  %8521 = vst [vmem:[#allocation67_spill] sm:$0xff] %v6108_v43 }
 0x19c   :  { %v2246_v45 = vmul.f32 0.25, %v2182_v50  ;;  %v2247_v7 = vmul.f32 0.25, %v2183_v16  ;;  %v694_v13 = vmul.f32 0.25, %v5541_v42  ;;  %v756_v31 = vmul.f32 0.75, %v5541_v42 }
 0x19d   :  { %v6093_v26 = vadd.f32 %v1544_v25, %v1414_v23  ;;  %v6095_v39 = vadd.f32 %v1545_v10, %v1415_v24  ;;  %v693_v14 = vmul.f32 0.25, %v5569_v12  ;;  %v6099_v41 = vmul.f32 0.75, %v5569_v12 }
 0x19e   :  { %v6101_v4 = vadd.f32 %v2246_v45, %v2118_v46  ;;  %v6103_v61 = vadd.f32 %v2247_v7, %v2119_v5  ;;  %v820_v0 = vadd.f32 %v756_v31, %v694_v13  ;;  %v6106_v44 = vmul.f32 0.25, %v5589_v2 }
 0x19f   :  { %8518 = vst [vmem:[#allocation64_spill] sm:$0xff] %v6093_v26  ;;  %v6111_v42 = vadd.f32 %v2374_v53, %v6093_v26  ;;  %v2515_v24 = vmul.f32 %v6093_v26, %v6093_v26  ;;  %v819_v23 = vadd.f32 %v6099_v41, %v693_v14  ;;  %v6117_v12 = vmul.f32 0.75, %v5589_v2  ;;  %v6138_v26 = vpop.f32.mrb[20].mxu1 }
 0x1a0   :  { %8519 = vst [vmem:[#allocation65_spill] sm:$0xff] %v6101_v4  ;;  %8520 = vst [vmem:[#allocation66_spill] sm:$0xff] %v6103_v61  ;;  %v6120_v46 = vadd.f32 %v2441_v57, %v6101_v4  ;;  %v2646_v5 = vmul.f32 %v6101_v4, %v6101_v4  ;;  %v1050_v52 = vrot.slane %v820_v0, 7  ;;  %v1243_v27 = vrot.slane %v820_v0, 1  ;;  %v6174_v19 = vpop.f32.mrb[21].mxu1 }
 0x1a1   :  { %v6124_v1 = vadd.f32 %v2577_v28, %v2515_v24  ;;  %v1419_v53 = vmul.f32 0.75, %v820_v0  ;;  %v1049_v20 = vrot.slane %v819_v23, 7  ;;  %v1242_v62 = vrot.slane %v819_v23, 1  ;;  %8522 = vst [vmem:[#allocation68_spill] sm:$0xff] %v6138_v26  ;;  %8523 = vst [vmem:[#allocation69_spill] sm:$0xff] %v6174_v19 }
 0x1a2   :  { %v6126_v58 = vadd.f32 %v2708_v35, %v2646_v5  ;;  %v1370_v25 = vsel %vm1193_vm1, %v1243_v27, %v820_v0  ;;  %v1418_v10 = vmul.f32 0.75, %v819_v23  ;;  %v822_v2 = vadd.f32 %v6117_v12, %v694_v13 }
 0x1a3   :  { %v1051_v57 = vsel %vm1000_vm3, %v1049_v20, %v1050_v52  ;;  %v1177_v50 = vsel %vm1000_vm3, %v819_v23, %v1049_v20  ;;  %v1244_v16 = vsel %vm1193_vm1, %v1242_v62, %v1243_v27  ;;  %v888_v45 = vadd.f32 %v756_v31, %v6106_v44 }
 0x1a4   :  { %v1484_v28 = vsel %vm921_vm2, %v1244_v16, %v1177_v50  ;;  %v1485_v35 = vsel %vm921_vm2, %v1370_v25, %v1051_v57  ;;  %v1053_v7 = vrot.slane %v822_v2, 7  ;;  %v1246_v24 = vrot.slane %v822_v2, 1 }
 0x1a5   :  { %v1548_v0 = vmul.f32 0.25, %v1484_v28  ;;  %v1549_v5 = vmul.f32 0.25, %v1485_v35  ;;  %v1421_v4 = vmul.f32 0.75, %v822_v2  ;;  %v1757_v13 = vrot.slane %v888_v45, 7 }
 0x1a6   :  { %v1371_v23 = vsel %vm1193_vm1, %v1246_v24, %v822_v2  ;;  %v1949_v52 = vrot.slane %v888_v45, 1  ;;  %v2125_v27 = vmul.f32 0.75, %v888_v45  ;;  %v754_v31 = vmul.f32 0.75, %v5611_v15 }
 0x1a7   :  { %v6142_v20 = vadd.f32 %v1548_v0, %v1418_v10  ;;  %v6144_v62 = vadd.f32 %v1549_v5, %v1419_v53  ;;  %v852_v25 = vmul.f32 0.25, %v5611_v15  ;;  %v6148_v57 = vmul.f32 0.25, %v5640_v63 }
 0x1a8   :  { %v2076_v50 = vsel %vm1193_vm1, %v1949_v52, %v888_v45  ;;  %v818_v16 = vadd.f32 %v754_v31, %v6039_v3  ;;  %v6153_v28 = vmul.f32 0.75, %v5640_v63  ;;  %v753_v2 = vmul.f32 0.75, %v5655_v22 }
 0x1a9   :  { %v6158_v10 = vmul.f32 %v6142_v20, %v6142_v20  ;;  %v6162_v53 = vmul.f32 %v6144_v62, %v6144_v62  ;;  %v6165_v15 = vadd.f32 %v852_v25, %v6044_v36  ;;  %v6167_v35 = vadd.f32 %v852_v25, %v754_v31 }
 0x1aa   :  { %v1047_v45 = vrot.slane %v818_v16, 7  ;;  %v1240_v3 = vrot.slane %v818_v16, 1  ;;  %v1417_v0 = vmul.f32 0.75, %v818_v16  ;;  %v821_v63 = vadd.f32 %v6153_v28, %v693_v14 }
 0x1ab   :  { %v1751_v5 = vrot.slane %v6165_v15, 7  ;;  %v1754_v9 = vrot.slane %v6167_v35, 7  ;;  %v1943_v54 = vrot.slane %v6165_v15, 1  ;;  %v1946_v33 = vrot.slane %v6167_v35, 1 }
 0x1ac   :  { %v1369_v36 = vsel %vm1193_vm1, %v1240_v3, %v818_v16  ;;  %v6178_v31 = vmul.f32 0.75, %v6165_v15  ;;  %v6181_v25 = vmul.f32 0.75, %v6167_v35  ;;  %v887_v14 = vadd.f32 %v6099_v41, %v6148_v57 }
 0x1ad   :  { %v2074_v18 = vsel %vm1193_vm1, %v1943_v54, %v6165_v15  ;;  %v2075_v49 = vsel %vm1193_vm1, %v1946_v33, %v6167_v35  ;;  %v1052_v48 = vrot.slane %v821_v63, 7  ;;  %v1245_v26 = vrot.slane %v821_v63, 1 }
 0x1ae   :  { %v1420_v19 = vmul.f32 0.75, %v821_v63  ;;  %v1756_v43 = vrot.slane %v887_v14, 7  ;;  %v1948_v16 = vrot.slane %v887_v14, 1  ;;  %v2124_v38 = vmul.f32 0.75, %v887_v14 }
 0x1af   :  { %v1054_v34 = vsel %vm1000_vm3, %v1052_v48, %v1053_v7  ;;  %v1178_v55 = vsel %vm1000_vm3, %v821_v63, %v1052_v48  ;;  %v1247_v37 = vsel %vm1193_vm1, %v1245_v26, %v1246_v24  ;;  %v817_v41 = vadd.f32 %v753_v2, %v6047_v6  ;;  %v6205_v24 = vpop.f32.mrb[22].mxu1 }
 0x1b0   :  { %v1486_v15 = vsel %vm921_vm2, %v1247_v37, %v1178_v55  ;;  %v1487_v35 = vsel %vm921_vm2, %v1371_v23, %v1054_v34  ;;  %v1758_v47 = vsel %vm1000_vm3, %v1756_v43, %v1757_v13  ;;  %v1884_v17 = vsel %vm1000_vm3, %v887_v14, %v1756_v43 }
 0x1b1   :  { %v1550_v51 = vmul.f32 0.25, %v1486_v15  ;;  %v1551_v60 = vmul.f32 0.25, %v1487_v35  ;;  %v1950_v7 = vsel %vm1193_vm1, %v1948_v16, %v1949_v52  ;;  %v2189_v48 = vsel %vm921_vm2, %v2076_v50, %v1758_v47  ;;  %v6233_v35 = vpop.f32.mrb[23].mxu1 }
 0x1b2   :  { %v2188_v6 = vsel %vm921_vm2, %v1950_v7, %v1884_v17  ;;  %v2253_v26 = vmul.f32 0.25, %v2189_v48  ;;  %v851_v37 = vmul.f32 0.25, %v5655_v22  ;;  %v1046_v55 = vrot.slane %v817_v41, 7 }
 0x1b3   :  { %v6207_v34 = vadd.f32 %v1550_v51, %v1420_v19  ;;  %v6209_v13 = vadd.f32 %v1551_v60, %v1421_v4  ;;  %v2252_v43 = vmul.f32 0.25, %v2188_v6  ;;  %v1239_v23 = vrot.slane %v817_v41, 1 }
 0x1b4   :  { %v6211_v63 = vadd.f32 %v2253_v26, %v2125_v27  ;;  %v883_v52 = vadd.f32 %v851_v37, %v6061_v56  ;;  %v885_v47 = vadd.f32 %v851_v37, %v753_v2  ;;  %v1048_v50 = vsel %vm1000_vm3, %v1046_v55, %v1047_v45 }
 0x1b5   :  { %v6215_v17 = vadd.f32 %v2252_v43, %v2124_v38  ;;  %v6219_v22 = vmul.f32 %v6207_v34, %v6207_v34  ;;  %v1176_v19 = vsel %vm1000_vm3, %v817_v41, %v1046_v55  ;;  %v1241_v60 = vsel %vm1193_vm1, %v1239_v23, %v1240_v3 }
 0x1b6   :  { %8524 = vst [vmem:[#allocation70_spill] sm:$0xff] %v6211_v63  ;;  %v1416_v51 = vmul.f32 0.75, %v817_v41  ;;  %v1482_v4 = vsel %vm921_vm2, %v1241_v60, %v1176_v19  ;;  %v1483_v56 = vsel %vm921_vm2, %v1369_v36, %v1048_v50  ;;  %v1750_v27 = vrot.slane %v883_v52, 7 }
 0x1b7   :  { %8525 = vst [vmem:[#allocation71_spill] sm:$0xff] %v6215_v17  ;;  %v6229_v38 = vmul.f32 %v6215_v17, %v6215_v17  ;;  %v1546_v2 = vmul.f32 0.25, %v1482_v4  ;;  %v1547_v45 = vmul.f32 0.25, %v1483_v56  ;;  %v1753_v14 = vrot.slane %v885_v47, 7 }
 0x1b8   :  { %v1752_v16 = vsel %vm1000_vm3, %v1750_v27, %v1751_v5  ;;  %v1882_v15 = vsel %vm1000_vm3, %v883_v52, %v1750_v27  ;;  %v1942_v3 = vrot.slane %v883_v52, 1  ;;  %v1945_v41 = vrot.slane %v885_v47, 1 }
 0x1b9   :  { %v6235_v7 = vadd.f32 %v1546_v2, %v1416_v51  ;;  %v6237_v48 = vadd.f32 %v1547_v45, %v1417_v0  ;;  %v1755_v36 = vsel %vm1000_vm3, %v1753_v14, %v1754_v9  ;;  %v1883_v6 = vsel %vm1000_vm3, %v885_v47, %v1753_v14  ;;  %v6275_v45 = vpop.f32.mrb[24].mxu1 }
 0x1ba   :  { %v1944_v26 = vsel %vm1193_vm1, %v1942_v3, %v1943_v54  ;;  %v1947_v37 = vsel %vm1193_vm1, %v1945_v41, %v1946_v33  ;;  %v2120_v55 = vmul.f32 0.75, %v883_v52  ;;  %v2122_v5 = vmul.f32 0.75, %v885_v47 }
 0x1bb   :  { %v2184_v43 = vsel %vm921_vm2, %v1944_v26, %v1882_v15  ;;  %v2185_v23 = vsel %vm921_vm2, %v2074_v18, %v1752_v16  ;;  %v2186_v0 = vsel %vm921_vm2, %v1947_v37, %v1883_v6  ;;  %v2187_v9 = vsel %vm921_vm2, %v2075_v49, %v1755_v36 }
 0x1bc   :  { %v2248_v50 = vmul.f32 0.25, %v2184_v43  ;;  %v2249_v19 = vmul.f32 0.25, %v2185_v23  ;;  %v2250_v60 = vmul.f32 0.25, %v2186_v0  ;;  %v2251_v54 = vmul.f32 0.25, %v2187_v9 }
 0x1bd   :  { %v2376_v33 = vadd.f32 %v6111_v42, %v6095_v39  ;;  %v2443_v52 = vadd.f32 %v6120_v46, %v6103_v61  ;;  %v2516_v47 = vmul.f32 %v6095_v39, %v6095_v39  ;;  %v2517_v18 = vmul.f32 %v6235_v7, %v6235_v7 }
 0x1be   :  { %v6259_v51 = vadd.f32 %v2248_v50, %v2120_v55  ;;  %v6262_v49 = vadd.f32 %v2249_v19, %v6178_v31  ;;  %v6264_v4 = vadd.f32 %v2250_v60, %v2122_v5  ;;  %v6267_v56 = vadd.f32 %v2251_v54, %v6181_v25  ;;  %v6313_v54 = vpop.f32.mrb[25].mxu1 }
 0x1bf   :  { %v2377_v42 = vadd.f32 %v2376_v33, %v6235_v7  ;;  %v2518_v46 = vmul.f32 %v6237_v48, %v6237_v48  ;;  %v2579_v27 = vadd.f32 %v6124_v1, %v2516_v47  ;;  %v2647_v2 = vmul.f32 %v6103_v61, %v6103_v61 }
 0x1c0   :  { %8526 = vst [vmem:[#allocation72_spill] sm:$0xff] %v6259_v51  ;;  %8527 = vst [vmem:[#allocation73_spill] sm:$0xff] %v6262_v49  ;;  %v2444_v31 = vadd.f32 %v2443_v52, %v6259_v51  ;;  %v2648_v14 = vmul.f32 %v6259_v51, %v6259_v51  ;;  %v2649_v25 = vmul.f32 %v6262_v49, %v6262_v49  ;;  %v6290_v6 = vmul.f32 0.25, %v5708_v30 }
 0x1c1   :  { %8528 = vst [vmem:[#allocation74_spill] sm:$0xff] %v6264_v4  ;;  %8529 = vst [vmem:[#allocation75_spill] sm:$0xff] %v6267_v56  ;;  %v2650_v16 = vmul.f32 %v6264_v4, %v6264_v4  ;;  %v2378_v15 = vadd.f32 %v2377_v42, %v6237_v48  ;;  %v2580_v3 = vadd.f32 %v2579_v27, %v2517_v18  ;;  %v6293_v26 = vmul.f32 0.75, %v5708_v30 }
 0x1c2   :  { %v2651_v1 = vmul.f32 %v6267_v56, %v6267_v56  ;;  %v2710_v41 = vadd.f32 %v6126_v58, %v2647_v2  ;;  %v2445_v36 = vadd.f32 %v2444_v31, %v6262_v49  ;;  %v6296_v37 = vmul.f32 0.25, %v5743_v21 }
 0x1c3   :  { %v2379_v55 = vadd.f32 %v2378_v15, %v6142_v20  ;;  %v2581_v5 = vadd.f32 %v2580_v3, %v2518_v46  ;;  %v6300_v23 = vmul.f32 0.75, %v5743_v21  ;;  %v824_v0 = vadd.f32 %v6293_v26, %v6106_v44 }
 0x1c4   :  { %v2711_v43 = vadd.f32 %v2710_v41, %v2648_v14  ;;  %v2446_v58 = vadd.f32 %v2445_v36, %v6264_v4  ;;  %v890_v9 = vadd.f32 %v6117_v12, %v6290_v6  ;;  %v889_v30 = vadd.f32 %v6153_v28, %v6296_v37 }
 0x1c5   :  { %v2380_v50 = vadd.f32 %v2379_v55, %v6144_v62  ;;  %v2582_v19 = vadd.f32 %v2581_v5, %v6158_v10  ;;  %v823_v21 = vadd.f32 %v6300_v23, %v6148_v57  ;;  %v1056_v52 = vrot.slane %v824_v0, 7 }
 0x1c6   :  { %v2712_v60 = vadd.f32 %v2711_v43, %v2649_v25  ;;  %v2447_v33 = vadd.f32 %v2446_v58, %v6267_v56  ;;  %v1249_v44 = vrot.slane %v824_v0, 1  ;;  %v1423_v47 = vmul.f32 0.75, %v824_v0 }
 0x1c7   :  { %v2583_v12 = vadd.f32 %v2582_v19, %v6162_v53  ;;  %v1760_v42 = vrot.slane %v890_v9, 7  ;;  %v1952_v28 = vrot.slane %v890_v9, 1  ;;  %v2127_v27 = vmul.f32 0.75, %v890_v9 }
 0x1c8   :  { %v2713_v18 = vadd.f32 %v2712_v60, %v2650_v16  ;;  %v2448_v46 = vadd.f32 %v2447_v33, %v6215_v17  ;;  %v1372_v10 = vsel %vm1193_vm1, %v1249_v44, %v824_v0  ;;  %v1055_v2 = vrot.slane %v823_v21, 7 }
 0x1c9   :  { %v2077_v57 = vsel %vm1193_vm1, %v1952_v28, %v890_v9  ;;  %v1248_v14 = vrot.slane %v823_v21, 1  ;;  %v1422_v25 = vmul.f32 0.75, %v823_v21  ;;  %v1759_v41 = vrot.slane %v889_v30, 7  ;;  %v6330_v9 = vpop.f32.mrb[26].mxu1 }
 0x1ca   :  { %v2714_v31 = vadd.f32 %v2713_v18, %v2651_v1  ;;  %v1057_v15 = vsel %vm1000_vm3, %v1055_v2, %v1056_v52  ;;  %v1179_v3 = vsel %vm1000_vm3, %v823_v21, %v1055_v2  ;;  %v1951_v53 = vrot.slane %v889_v30, 1 }
 0x1cb   :  { %v1250_v36 = vsel %vm1193_vm1, %v1248_v14, %v1249_v44  ;;  %v1489_v55 = vsel %vm921_vm2, %v1372_v10, %v1057_v15  ;;  %v2126_v5 = vmul.f32 0.75, %v889_v30  ;;  %v1761_v58 = vsel %vm1000_vm3, %v1759_v41, %v1760_v42 }
 0x1cc   :  { %v2715_v16 = vadd.f32 %v2714_v31, %v6229_v38  ;;  %v1488_v1 = vsel %vm921_vm2, %v1250_v36, %v1179_v3  ;;  %v1553_v43 = vmul.f32 0.25, %v1489_v55  ;;  %v1885_v0 = vsel %vm1000_vm3, %v889_v30, %v1759_v41 }
 0x1cd   :  { %v1552_v19 = vmul.f32 0.25, %v1488_v1  ;;  %v1953_v60 = vsel %vm1193_vm1, %v1951_v53, %v1952_v28  ;;  %v2191_v38 = vsel %vm921_vm2, %v2077_v57, %v1761_v58  ;;  %v2381_v21 = vadd.f32 %v2380_v50, %v6207_v34 }
 0x1ce   :  { %v6336_v33 = vadd.f32 %v1553_v43, %v1423_v47  ;;  %v2190_v52 = vsel %vm921_vm2, %v1953_v60, %v1885_v0  ;;  %v2255_v44 = vmul.f32 0.25, %v2191_v38  ;;  %v2449_v18 = vadd.f32 %v2448_v46, %v6211_v63 }
 0x1cf   :  { %v6341_v42 = vadd.f32 %v1552_v19, %v1422_v25  ;;  %v2254_v30 = vmul.f32 0.25, %v2190_v52  ;;  %v2382_v10 = vadd.f32 %v2381_v21, %v6209_v13  ;;  %v2522_v28 = vmul.f32 %v6209_v13, %v6209_v13 }
 0x1d0   :  { %v6346_v2 = vadd.f32 %v2255_v44, %v2127_v27  ;;  %v2584_v50 = vadd.f32 %v2583_v12, %v6219_v22  ;;  %v2653_v47 = vmul.f32 %v6211_v63, %v6211_v63  ;;  %v700_v31 = vmul.f32 0.25, %v5763_v32  ;;  %v6360_v12 = vpop.f32.mrb[27].mxu1 }
 0x1d1   :  { %v6352_v57 = vadd.f32 %v2254_v30, %v2126_v5  ;;  %v2383_v46 = vadd.f32 %v2382_v10, %v6341_v42  ;;  %v2523_v14 = vmul.f32 %v6341_v42, %v6341_v42  ;;  %v762_v25 = vmul.f32 0.75, %v5763_v32 }
 0x1d2   :  { %8530 = vst [vmem:[#allocation76_spill] sm:$0xff] %v6346_v2  ;;  %v2585_v15 = vadd.f32 %v2584_v50, %v2522_v28  ;;  %v2716_v3 = vadd.f32 %v2715_v16, %v2653_v47  ;;  %v892_v27 = vadd.f32 %v6293_v26, %v700_v31  ;;  %v699_v22 = vmul.f32 0.25, %v5798_v29 }
 0x1d3   :  { %8531 = vst [vmem:[#allocation77_spill] sm:$0xff] %v6352_v57  ;;  %v2450_v41 = vadd.f32 %v2449_v18, %v6352_v57  ;;  %v2654_v53 = vmul.f32 %v6352_v57, %v6352_v57  ;;  %v826_v36 = vadd.f32 %v762_v25, %v6290_v6  ;;  %v761_v55 = vmul.f32 0.75, %v5798_v29 }
 0x1d4   :  { %v2586_v5 = vadd.f32 %v2585_v15, %v2523_v14  ;;  %v1763_v1 = vrot.slane %v892_v27, 7  ;;  %v1955_v32 = vrot.slane %v892_v27, 1  ;;  %v2129_v43 = vmul.f32 0.75, %v892_v27  ;;  %v6377_v14 = vpop.f32.mrb[28].mxu1 }
 0x1d5   :  { %v2717_v16 = vadd.f32 %v2716_v3, %v2654_v53  ;;  %v1059_v58 = vrot.slane %v826_v36, 7  ;;  %v1252_v26 = vrot.slane %v826_v36, 1  ;;  %v1425_v0 = vmul.f32 0.75, %v826_v36 }
 0x1d6   :  { %v2078_v19 = vsel %vm1193_vm1, %v1955_v32, %v892_v27  ;;  %v825_v60 = vadd.f32 %v761_v55, %v6296_v37  ;;  %v891_v38 = vadd.f32 %v6300_v23, %v699_v22  ;;  %v2384_v21 = vadd.f32 %v2383_v46, %v6336_v33 }
 0x1d7   :  { %v1373_v6 = vsel %vm1193_vm1, %v1252_v26, %v826_v36  ;;  %v2451_v29 = vadd.f32 %v2450_v41, %v6346_v2  ;;  %v2524_v52 = vmul.f32 %v6336_v33, %v6336_v33  ;;  %v2655_v44 = vmul.f32 %v6346_v2, %v6346_v2 }
 0x1d8   :  { %v1058_v18 = vrot.slane %v825_v60, 7  ;;  %v1251_v30 = vrot.slane %v825_v60, 1  ;;  %v1424_v10 = vmul.f32 0.75, %v825_v60  ;;  %v1762_v28 = vrot.slane %v891_v38, 7 }
 0x1d9   :  { %v1954_v50 = vrot.slane %v891_v38, 1  ;;  %v2128_v37 = vmul.f32 0.75, %v891_v38  ;;  %v2587_v47 = vadd.f32 %v2586_v5, %v2524_v52  ;;  %v2718_v23 = vadd.f32 %v2717_v16, %v2655_v44 }
 0x1da   :  { %v1060_v46 = vsel %vm1000_vm3, %v1058_v18, %v1059_v58  ;;  %v1180_v15 = vsel %vm1000_vm3, %v825_v60, %v1058_v18  ;;  %v1253_v3 = vsel %vm1193_vm1, %v1251_v30, %v1252_v26  ;;  %v1764_v27 = vsel %vm1000_vm3, %v1762_v28, %v1763_v1 }
 0x1db   :  { %v1490_v41 = vsel %vm921_vm2, %v1253_v3, %v1180_v15  ;;  %v1491_v53 = vsel %vm921_vm2, %v1373_v6, %v1060_v46  ;;  %v1886_v36 = vsel %vm1000_vm3, %v891_v38, %v1762_v28  ;;  %v1956_v5 = vsel %vm1193_vm1, %v1954_v50, %v1955_v32 }
 0x1dc   :  { %v1554_v16 = vmul.f32 0.25, %v1490_v41  ;;  %v1555_v52 = vmul.f32 0.25, %v1491_v53  ;;  %v2192_v58 = vsel %vm921_vm2, %v1956_v5, %v1886_v36  ;;  %v2193_v26 = vsel %vm921_vm2, %v2078_v19, %v1764_v27 }
 0x1dd   :  { %v2256_v60 = vmul.f32 0.25, %v2192_v58  ;;  %v2257_v1 = vmul.f32 0.25, %v2193_v26  ;;  %v6394_v44 = vmul.f32 0.25, %v5817_v59  ;;  %v6397_v18 = vmul.f32 0.75, %v5817_v59  ;;  %v6415_v59 = vpop.f32.mrb[29].mxu1 }
 0x1de   :  { %v6399_v6 = vadd.f32 %v1554_v16, %v1424_v10  ;;  %v6401_v38 = vadd.f32 %v1555_v52, %v1425_v0  ;;  %v6404_v32 = vmul.f32 0.25, %v5846_v11  ;;  %v6407_v30 = vmul.f32 0.75, %v5846_v11 }
 0x1df   :  { %v6409_v28 = vadd.f32 %v2256_v60, %v2128_v37  ;;  %v6411_v19 = vadd.f32 %v2257_v1, %v2129_v43  ;;  %v828_v50 = vadd.f32 %v6397_v18, %v700_v31  ;;  %v894_v46 = vadd.f32 %v762_v25, %v6394_v44 }
 0x1e0   :  { %v2385_v10 = vadd.f32 %v2384_v21, %v6399_v6  ;;  %v2525_v0 = vmul.f32 %v6399_v6, %v6399_v6  ;;  %v827_v15 = vadd.f32 %v6407_v30, %v699_v22  ;;  %v893_v11 = vadd.f32 %v761_v55, %v6404_v32 }
 0x1e1   :  { %8532 = vst [vmem:[#allocation78_spill] sm:$0xff] %v6409_v28  ;;  %8533 = vst [vmem:[#allocation79_spill] sm:$0xff] %v6411_v19  ;;  %v2452_v37 = vadd.f32 %v2451_v29, %v6409_v28  ;;  %v2656_v43 = vmul.f32 %v6409_v28, %v6409_v28  ;;  %v1062_v3 = vrot.slane %v828_v50, 7  ;;  %v1255_v31 = vrot.slane %v828_v50, 1 }
 0x1e2   :  { %v2588_v27 = vadd.f32 %v2587_v47, %v2525_v0  ;;  %v1427_v25 = vmul.f32 0.75, %v828_v50  ;;  %v1766_v41 = vrot.slane %v894_v46, 7  ;;  %v1958_v53 = vrot.slane %v894_v46, 1  ;;  %v6429_v47 = vpop.f32.mrb[30].mxu1 }
 0x1e3   :  { %v2719_v36 = vadd.f32 %v2718_v23, %v2656_v43  ;;  %v1374_v21 = vsel %vm1193_vm1, %v1255_v31, %v828_v50  ;;  %v2131_v5 = vmul.f32 0.75, %v894_v46  ;;  %v1061_v16 = vrot.slane %v827_v15, 7 }
 0x1e4   :  { %v2079_v22 = vsel %vm1193_vm1, %v1958_v53, %v894_v46  ;;  %v1254_v52 = vrot.slane %v827_v15, 1  ;;  %v1426_v55 = vmul.f32 0.75, %v827_v15  ;;  %v1765_v58 = vrot.slane %v893_v11, 7 }
 0x1e5   :  { %v1063_v29 = vsel %vm1000_vm3, %v1061_v16, %v1062_v3  ;;  %v1181_v26 = vsel %vm1000_vm3, %v827_v15, %v1061_v16  ;;  %v1957_v60 = vrot.slane %v893_v11, 1  ;;  %v2130_v1 = vmul.f32 0.75, %v893_v11 }
 0x1e6   :  { %v1256_v0 = vsel %vm1193_vm1, %v1254_v52, %v1255_v31  ;;  %v1493_v23 = vsel %vm921_vm2, %v1374_v21, %v1063_v29  ;;  %v1767_v50 = vsel %vm1000_vm3, %v1765_v58, %v1766_v41  ;;  %v1887_v46 = vsel %vm1000_vm3, %v893_v11, %v1765_v58 }
 0x1e7   :  { %v1492_v43 = vsel %vm921_vm2, %v1256_v0, %v1181_v26  ;;  %v1557_v28 = vmul.f32 0.25, %v1493_v23  ;;  %v1959_v3 = vsel %vm1193_vm1, %v1957_v60, %v1958_v53  ;;  %v2195_v15 = vsel %vm921_vm2, %v2079_v22, %v1767_v50 }
 0x1e8   :  { %v1556_v16 = vmul.f32 0.25, %v1492_v43  ;;  %v2194_v31 = vsel %vm921_vm2, %v1959_v3, %v1887_v46  ;;  %v2259_v52 = vmul.f32 0.25, %v2195_v15  ;;  %v2386_v21 = vadd.f32 %v2385_v10, %v6401_v38 }
 0x1e9   :  { %v6444_v29 = vadd.f32 %v1557_v28, %v1427_v25  ;;  %v2258_v41 = vmul.f32 0.25, %v2194_v31  ;;  %v2453_v11 = vadd.f32 %v2452_v37, %v6411_v19  ;;  %v2526_v58 = vmul.f32 %v6401_v38, %v6401_v38  ;;  %v8536_v25 = vld [vmem:[#allocation44_spill] sm:$0xff]  ;;  %v6460_v37 = vpop.f32.mrb[31].mxu1 }
 0x1ea   :  { %v6449_v26 = vadd.f32 %v1556_v16, %v1426_v55  ;;  %v6451_v53 = vadd.f32 %v2259_v52, %v2131_v5  ;;  %v2657_v22 = vmul.f32 %v6411_v19, %v6411_v19  ;;  %v704_v60 = vmul.f32 0.25, %v5863_v40 }
 0x1eb   :  { %v6456_v0 = vadd.f32 %v2258_v41, %v2130_v1  ;;  %v2589_v10 = vadd.f32 %v2588_v27, %v2526_v58  ;;  %v766_v28 = vmul.f32 0.75, %v5863_v40  ;;  %v703_v23 = vmul.f32 0.25, %v8536_v25 }
 0x1ec   :  { %8534 = vst [vmem:[#allocation80_spill] sm:$0xff] %v6451_v53  ;;  %v2387_v50 = vadd.f32 %v2386_v21, %v6449_v26  ;;  %v2527_v5 = vmul.f32 %v6449_v26, %v6449_v26  ;;  %v2720_v55 = vadd.f32 %v2719_v36, %v2657_v22  ;;  %v896_v46 = vadd.f32 %v6397_v18, %v704_v60 }
 0x1ed   :  { %8535 = vst [vmem:[#allocation81_spill] sm:$0xff] %v6456_v0  ;;  %v2454_v43 = vadd.f32 %v2453_v11, %v6456_v0  ;;  %v2658_v1 = vmul.f32 %v6456_v0, %v6456_v0  ;;  %v830_v27 = vadd.f32 %v766_v28, %v6394_v44  ;;  %v765_v40 = vmul.f32 0.75, %v8536_v25 }
 0x1ee   :  { %v2590_v3 = vadd.f32 %v2589_v10, %v2527_v5  ;;  %v1769_v15 = vrot.slane %v896_v46, 7  ;;  %v1961_v16 = vrot.slane %v896_v46, 1  ;;  %v2133_v31 = vmul.f32 0.75, %v896_v46 }
 0x1ef   :  { %v2721_v52 = vadd.f32 %v2720_v55, %v2658_v1  ;;  %v1065_v21 = vrot.slane %v830_v27, 7  ;;  %v1258_v41 = vrot.slane %v830_v27, 1  ;;  %v1429_v58 = vmul.f32 0.75, %v830_v27 }
 0x1f0   :  { %v2080_v36 = vsel %vm1193_vm1, %v1961_v16, %v896_v46  ;;  %v829_v18 = vadd.f32 %v765_v40, %v6404_v32  ;;  %v895_v11 = vadd.f32 %v6407_v30, %v703_v23  ;;  %v2388_v22 = vadd.f32 %v2387_v50, %v6444_v29 }
 0x1f1   :  { %v1375_v44 = vsel %vm1193_vm1, %v1258_v41, %v830_v27  ;;  %v2455_v25 = vadd.f32 %v2454_v43, %v6451_v53  ;;  %v2528_v10 = vmul.f32 %v6444_v29, %v6444_v29  ;;  %v2659_v5 = vmul.f32 %v6451_v53, %v6451_v53 }
 0x1f2   :  { %v1064_v55 = vrot.slane %v829_v18, 7  ;;  %v1257_v1 = vrot.slane %v829_v18, 1  ;;  %v1428_v0 = vmul.f32 0.75, %v829_v18  ;;  %v1768_v46 = vrot.slane %v895_v11, 7 }
 0x1f3   :  { %v1960_v19 = vrot.slane %v895_v11, 1  ;;  %v2132_v32 = vmul.f32 0.75, %v895_v11  ;;  %v2591_v2 = vadd.f32 %v2590_v3, %v2528_v10  ;;  %v2722_v30 = vadd.f32 %v2721_v52, %v2659_v5  ;;  %v8537_v10 = vld [vmem:[#allocation45_spill] sm:$0xff] }
 0x1f4   :  { %v1066_v50 = vsel %vm1000_vm3, %v1064_v55, %v1065_v21  ;;  %v1182_v27 = vsel %vm1000_vm3, %v829_v18, %v1064_v55  ;;  %v1259_v43 = vsel %vm1193_vm1, %v1257_v1, %v1258_v41  ;;  %v1770_v57 = vsel %vm1000_vm3, %v1768_v46, %v1769_v15 }
 0x1f5   :  { %v1494_v63 = vsel %vm921_vm2, %v1259_v43, %v1182_v27  ;;  %v1495_v53 = vsel %vm921_vm2, %v1375_v44, %v1066_v50  ;;  %v1888_v17 = vsel %vm1000_vm3, %v895_v11, %v1768_v46  ;;  %v1962_v56 = vsel %vm1193_vm1, %v1960_v19, %v1961_v16  ;;  %v8538_v19 = vld [vmem:[#allocation50_spill] sm:$0xff] }
 0x1f6   :  { %v1558_v3 = vmul.f32 0.25, %v1494_v63  ;;  %v1559_v52 = vmul.f32 0.25, %v1495_v53  ;;  %v2196_v21 = vsel %vm921_vm2, %v1962_v56, %v1888_v17  ;;  %v2197_v41 = vsel %vm921_vm2, %v2080_v36, %v1770_v57 }
 0x1f7   :  { %v2260_v18 = vmul.f32 0.25, %v2196_v21  ;;  %v2261_v15 = vmul.f32 0.25, %v2197_v41  ;;  %v6496_v5 = vmul.f32 0.25, %v8537_v10  ;;  %v768_v55 = vmul.f32 0.75, %v8537_v10 }
 0x1f8   :  { %v6499_v44 = vadd.f32 %v1558_v3, %v1428_v0  ;;  %v6501_v11 = vadd.f32 %v1559_v52, %v1429_v58  ;;  %v6504_v63 = vmul.f32 0.25, %v8538_v19  ;;  %v6507_v53 = vmul.f32 0.75, %v8538_v19 }
 0x1f9   :  { %v6509_v17 = vadd.f32 %v2260_v18, %v2132_v32  ;;  %v6511_v56 = vadd.f32 %v2261_v15, %v2133_v31  ;;  %v832_v57 = vadd.f32 %v768_v55, %v704_v60  ;;  %v898_v16 = vadd.f32 %v766_v28, %v6496_v5 }
 0x1fa   :  { %v2389_v36 = vadd.f32 %v2388_v22, %v6499_v44  ;;  %v2529_v0 = vmul.f32 %v6499_v44, %v6499_v44  ;;  %v831_v58 = vadd.f32 %v6507_v53, %v703_v23  ;;  %v897_v1 = vadd.f32 %v765_v40, %v6504_v63 }
 0x1fb   :  { %8539 = vst [vmem:[#allocation44_spill] sm:$0xff] %v6509_v17  ;;  %8540 = vst [vmem:[#allocation45_spill] sm:$0xff] %v6511_v56  ;;  %v2456_v46 = vadd.f32 %v2455_v25, %v6509_v17  ;;  %v2660_v32 = vmul.f32 %v6509_v17, %v6509_v17  ;;  %v1068_v50 = vrot.slane %v832_v57, 7  ;;  %v1261_v31 = vrot.slane %v832_v57, 1 }
 0x1fc   :  { %v2592_v27 = vadd.f32 %v2591_v2, %v2529_v0  ;;  %v1431_v60 = vmul.f32 0.75, %v832_v57  ;;  %v1772_v43 = vrot.slane %v898_v16, 7  ;;  %v1964_v28 = vrot.slane %v898_v16, 1 }
 0x1fd   :  { %v2723_v3 = vadd.f32 %v2722_v30, %v2660_v32  ;;  %v1376_v22 = vsel %vm1193_vm1, %v1261_v31, %v832_v57  ;;  %v2135_v52 = vmul.f32 0.75, %v898_v16  ;;  %v1067_v21 = vrot.slane %v831_v58, 7 }
 0x1fe   :  { %v2081_v23 = vsel %vm1193_vm1, %v1964_v28, %v898_v16  ;;  %v1260_v41 = vrot.slane %v831_v58, 1  ;;  %v1430_v40 = vmul.f32 0.75, %v831_v58  ;;  %v1771_v18 = vrot.slane %v897_v1, 7 }
 0x1ff   :  { %v1069_v25 = vsel %vm1000_vm3, %v1067_v21, %v1068_v50  ;;  %v1183_v15 = vsel %vm1000_vm3, %v831_v58, %v1067_v21  ;;  %v1963_v10 = vrot.slane %v897_v1, 1  ;;  %v2134_v19 = vmul.f32 0.75, %v897_v1 }
 0x200   :  { %v1262_v2 = vsel %vm1193_vm1, %v1260_v41, %v1261_v31  ;;  %v1497_v30 = vsel %vm921_vm2, %v1376_v22, %v1069_v25  ;;  %v1773_v57 = vsel %vm1000_vm3, %v1771_v18, %v1772_v43  ;;  %v1889_v0 = vsel %vm1000_vm3, %v897_v1, %v1771_v18 }
 0x201   :  { %v1496_v16 = vsel %vm921_vm2, %v1262_v2, %v1183_v15  ;;  %v1561_v32 = vmul.f32 0.25, %v1497_v30  ;;  %v1965_v17 = vsel %vm1193_vm1, %v1963_v10, %v1964_v28  ;;  %v2199_v58 = vsel %vm921_vm2, %v2081_v23, %v1773_v57  ;;  %v8542_v15 = vld [vmem:[#allocation51_spill] sm:$0xff]  ;;  %v8544_v2 = vld [vmem:[#allocation56_spill] sm:$0xff] }
 0x202   :  { %v1560_v50 = vmul.f32 0.25, %v1496_v16  ;;  %v2198_v31 = vsel %vm921_vm2, %v1965_v17, %v1889_v0  ;;  %v2263_v21 = vmul.f32 0.25, %v2199_v58  ;;  %v2390_v22 = vadd.f32 %v2389_v36, %v6501_v11 }
 0x203   :  { %v6539_v41 = vadd.f32 %v1561_v32, %v1431_v60  ;;  %v2262_v43 = vmul.f32 0.25, %v2198_v31  ;;  %v2457_v1 = vadd.f32 %v2456_v46, %v6511_v56  ;;  %v2530_v18 = vmul.f32 %v6501_v11, %v6501_v11 }
 0x204   :  { %v6544_v25 = vadd.f32 %v1560_v50, %v1430_v40  ;;  %v6546_v28 = vadd.f32 %v2263_v21, %v2135_v52  ;;  %v2661_v23 = vmul.f32 %v6511_v56, %v6511_v56  ;;  %v708_v17 = vmul.f32 0.25, %v8542_v15 }
 0x205   :  { %v6551_v10 = vadd.f32 %v2262_v43, %v2134_v19  ;;  %v2593_v36 = vadd.f32 %v2592_v27, %v2530_v18  ;;  %v770_v60 = vmul.f32 0.75, %v8542_v15  ;;  %v707_v30 = vmul.f32 0.25, %v8544_v2 }
 0x206   :  { %8541 = vst [vmem:[#allocation50_spill] sm:$0xff] %v6546_v28  ;;  %v2391_v46 = vadd.f32 %v2390_v22, %v6544_v25  ;;  %v2531_v40 = vmul.f32 %v6544_v25, %v6544_v25  ;;  %v2724_v57 = vadd.f32 %v2723_v3, %v2661_v23  ;;  %v900_v52 = vadd.f32 %v768_v55, %v708_v17 }
 0x207   :  { %8543 = vst [vmem:[#allocation51_spill] sm:$0xff] %v6551_v10  ;;  %v2458_v0 = vadd.f32 %v2457_v1, %v6551_v10  ;;  %v2662_v16 = vmul.f32 %v6551_v10, %v6551_v10  ;;  %v834_v19 = vadd.f32 %v770_v60, %v6496_v5  ;;  %v769_v27 = vmul.f32 0.75, %v8544_v2 }
 0x208   :  { %v2594_v32 = vadd.f32 %v2593_v36, %v2531_v40  ;;  %v1775_v58 = vrot.slane %v900_v52, 7  ;;  %v1967_v50 = vrot.slane %v900_v52, 1  ;;  %v2137_v31 = vmul.f32 0.75, %v900_v52 }
 0x209   :  { %v2725_v21 = vadd.f32 %v2724_v57, %v2662_v16  ;;  %v1071_v22 = vrot.slane %v834_v19, 7  ;;  %v1264_v43 = vrot.slane %v834_v19, 1  ;;  %v1433_v18 = vmul.f32 0.75, %v834_v19 }
 0x20a   :  { %v2082_v3 = vsel %vm1193_vm1, %v1967_v50, %v900_v52  ;;  %v833_v55 = vadd.f32 %v769_v27, %v6504_v63  ;;  %v899_v1 = vadd.f32 %v6507_v53, %v707_v30  ;;  %v2392_v23 = vadd.f32 %v2391_v46, %v6539_v41 }
 0x20b   :  { %v1377_v5 = vsel %vm1193_vm1, %v1264_v43, %v834_v19  ;;  %v2459_v15 = vadd.f32 %v2458_v0, %v6546_v28  ;;  %v2532_v36 = vmul.f32 %v6539_v41, %v6539_v41  ;;  %v2663_v2 = vmul.f32 %v6546_v28, %v6546_v28 }
 0x20c   :  { %v1070_v40 = vrot.slane %v833_v55, 7  ;;  %v1263_v57 = vrot.slane %v833_v55, 1  ;;  %v1432_v16 = vmul.f32 0.75, %v833_v55  ;;  %v1774_v52 = vrot.slane %v899_v1, 7 }
 0x20d   :  { %v1966_v10 = vrot.slane %v899_v1, 1  ;;  %v2136_v63 = vmul.f32 0.75, %v899_v1  ;;  %v2595_v56 = vadd.f32 %v2594_v32, %v2532_v36  ;;  %v2726_v53 = vadd.f32 %v2725_v21, %v2663_v2  ;;  %v8545_v36 = vld [vmem:[#allocation57_spill] sm:$0xff] }
 0x20e   :  { %v1072_v46 = vsel %vm1000_vm3, %v1070_v40, %v1071_v22  ;;  %v1184_v19 = vsel %vm1000_vm3, %v833_v55, %v1070_v40  ;;  %v1265_v0 = vsel %vm1193_vm1, %v1263_v57, %v1264_v43  ;;  %v1776_v4 = vsel %vm1000_vm3, %v1774_v52, %v1775_v58 }
 0x20f   :  { %v1498_v49 = vsel %vm921_vm2, %v1265_v0, %v1184_v19  ;;  %v1499_v28 = vsel %vm921_vm2, %v1377_v5, %v1072_v46  ;;  %v1890_v51 = vsel %vm1000_vm3, %v899_v1, %v1774_v52  ;;  %v1968_v61 = vsel %vm1193_vm1, %v1966_v10, %v1967_v50  ;;  %v8548_v10 = vld [vmem:[#allocation62_spill] sm:$0xff] }
 0x210   :  { %v1562_v32 = vmul.f32 0.25, %v1498_v49  ;;  %v1563_v21 = vmul.f32 0.25, %v1499_v28  ;;  %v2200_v22 = vsel %vm921_vm2, %v1968_v61, %v1890_v51  ;;  %v2201_v43 = vsel %vm921_vm2, %v2082_v3, %v1776_v4 }
 0x211   :  { %v2264_v55 = vmul.f32 0.25, %v2200_v22  ;;  %v2265_v58 = vmul.f32 0.25, %v2201_v43  ;;  %v6588_v2 = vmul.f32 0.25, %v8545_v36  ;;  %v772_v40 = vmul.f32 0.75, %v8545_v36 }
 0x212   :  { %v6591_v5 = vadd.f32 %v1562_v32, %v1432_v16  ;;  %v6593_v1 = vadd.f32 %v1563_v21, %v1433_v18  ;;  %v6596_v49 = vmul.f32 0.25, %v8548_v10  ;;  %v6599_v28 = vmul.f32 0.75, %v8548_v10 }
 0x213   :  { %v6601_v61 = vadd.f32 %v2264_v55, %v2136_v63  ;;  %v6603_v51 = vadd.f32 %v2265_v58, %v2137_v31  ;;  %v836_v4 = vadd.f32 %v772_v40, %v708_v17  ;;  %v902_v50 = vadd.f32 %v770_v60, %v6588_v2 }
 0x214   :  { %8546 = vst [vmem:[#allocation56_spill] sm:$0xff] %v6591_v5  ;;  %8547 = vst [vmem:[#allocation57_spill] sm:$0xff] %v6593_v1  ;;  %v2393_v3 = vadd.f32 %v2392_v23, %v6591_v5  ;;  %v2533_v57 = vmul.f32 %v6591_v5, %v6591_v5  ;;  %v835_v18 = vadd.f32 %v6599_v28, %v707_v30 }
 0x215   :  { %8549 = vst [vmem:[#allocation62_spill] sm:$0xff] %v6601_v61  ;;  %8550 = vst [vmem:[#allocation82_spill] sm:$0xff] %v6603_v51  ;;  %v901_v16 = vadd.f32 %v769_v27, %v6596_v49  ;;  %v2460_v52 = vadd.f32 %v2459_v15, %v6601_v61  ;;  %v2664_v63 = vmul.f32 %v6601_v61, %v6601_v61  ;;  %v1074_v46 = vrot.slane %v836_v4, 7 }
 0x216   :  { %v1267_v31 = vrot.slane %v836_v4, 1  ;;  %v2596_v19 = vadd.f32 %v2595_v56, %v2533_v57  ;;  %v1435_v17 = vmul.f32 0.75, %v836_v4  ;;  %v1778_v0 = vrot.slane %v902_v50, 7 }
 0x217   :  { %v1970_v60 = vrot.slane %v902_v50, 1  ;;  %v2727_v32 = vadd.f32 %v2726_v53, %v2664_v63  ;;  %v2139_v21 = vmul.f32 0.75, %v902_v50  ;;  %v1073_v22 = vrot.slane %v835_v18, 7 }
 0x218   :  { %v1378_v23 = vsel %vm1193_vm1, %v1267_v31, %v836_v4  ;;  %v1266_v43 = vrot.slane %v835_v18, 1  ;;  %v1434_v27 = vmul.f32 0.75, %v835_v18  ;;  %v1777_v55 = vrot.slane %v901_v16, 7 }
 0x219   :  { %v2083_v30 = vsel %vm1193_vm1, %v1970_v60, %v902_v50  ;;  %v1075_v15 = vsel %vm1000_vm3, %v1073_v22, %v1074_v46  ;;  %v1185_v58 = vsel %vm1000_vm3, %v835_v18, %v1073_v22  ;;  %v1969_v36 = vrot.slane %v901_v16, 1 }
 0x21a   :  { %v2138_v10 = vmul.f32 0.75, %v901_v16  ;;  %v1268_v56 = vsel %vm1193_vm1, %v1266_v43, %v1267_v31  ;;  %v1501_v53 = vsel %vm921_vm2, %v1378_v23, %v1075_v15  ;;  %v1779_v4 = vsel %vm1000_vm3, %v1777_v55, %v1778_v0 }
 0x21b   :  { %v1891_v57 = vsel %vm1000_vm3, %v901_v16, %v1777_v55  ;;  %v1500_v50 = vsel %vm921_vm2, %v1268_v56, %v1185_v58  ;;  %v1565_v63 = vmul.f32 0.25, %v1501_v53  ;;  %v1971_v61 = vsel %vm1193_vm1, %v1969_v36, %v1970_v60  ;;  %v8554_v58 = vld [vmem:[#allocation63_spill] sm:$0xff] }
 0x21c   :  { %v2203_v18 = vsel %vm921_vm2, %v2083_v30, %v1779_v4  ;;  %v1564_v46 = vmul.f32 0.25, %v1500_v50  ;;  %v2202_v31 = vsel %vm921_vm2, %v1971_v61, %v1891_v57  ;;  %v2394_v23 = vadd.f32 %v2393_v3, %v6593_v1  ;;  %v8556_v56 = vld [vmem:[#allocation67_spill] sm:$0xff] }
 0x21d   :  { %v2267_v22 = vmul.f32 0.25, %v2203_v18  ;;  %v6631_v43 = vadd.f32 %v1565_v63, %v1435_v17  ;;  %v2266_v0 = vmul.f32 0.25, %v2202_v31  ;;  %v2461_v16 = vadd.f32 %v2460_v52, %v6603_v51 }
 0x21e   :  { %v2534_v55 = vmul.f32 %v6593_v1, %v6593_v1  ;;  %v6636_v15 = vadd.f32 %v1564_v46, %v1434_v27  ;;  %v2665_v30 = vmul.f32 %v6603_v51, %v6603_v51  ;;  %v712_v61 = vmul.f32 0.25, %v8554_v58 }
 0x21f   :  { %8551 = vst [vmem:[#allocation83_spill] sm:$0xff] %v6631_v43  ;;  %v6638_v60 = vadd.f32 %v2267_v22, %v2139_v21  ;;  %v6643_v36 = vadd.f32 %v2266_v0, %v2138_v10  ;;  %v774_v17 = vmul.f32 0.75, %v8554_v58  ;;  %v711_v53 = vmul.f32 0.25, %v8556_v56 }
 0x220   :  { %8552 = vst [vmem:[#allocation84_spill] sm:$0xff] %v6636_v15  ;;  %v2597_v3 = vadd.f32 %v2596_v19, %v2534_v55  ;;  %v2395_v52 = vadd.f32 %v2394_v23, %v6636_v15  ;;  %v2535_v27 = vmul.f32 %v6636_v15, %v6636_v15  ;;  %v2728_v4 = vadd.f32 %v2727_v32, %v2665_v30 }
 0x221   :  { %8553 = vst [vmem:[#allocation85_spill] sm:$0xff] %v6638_v60  ;;  %8555 = vst [vmem:[#allocation63_spill] sm:$0xff] %v6643_v36  ;;  %v904_v21 = vadd.f32 %v772_v40, %v712_v61  ;;  %v2462_v57 = vadd.f32 %v2461_v16, %v6643_v36  ;;  %v2666_v50 = vmul.f32 %v6643_v36, %v6643_v36  ;;  %v773_v19 = vmul.f32 0.75, %v8556_v56 }
 0x222   :  { %v838_v10 = vadd.f32 %v774_v17, %v6588_v2  ;;  %v2598_v63 = vadd.f32 %v2597_v3, %v2535_v27  ;;  %v903_v16 = vadd.f32 %v6599_v28, %v711_v53  ;;  %v2396_v30 = vadd.f32 %v2395_v52, %v6631_v43 }
 0x223   :  { %v1781_v18 = vrot.slane %v904_v21, 7  ;;  %v1973_v46 = vrot.slane %v904_v21, 1  ;;  %v2141_v31 = vmul.f32 0.75, %v904_v21  ;;  %v2729_v22 = vadd.f32 %v2728_v4, %v2666_v50 }
 0x224   :  { %v1077_v23 = vrot.slane %v838_v10, 7  ;;  %v1270_v0 = vrot.slane %v838_v10, 1  ;;  %v1437_v55 = vmul.f32 0.75, %v838_v10  ;;  %v837_v40 = vadd.f32 %v773_v19, %v6596_v49 }
 0x225   :  { %v2084_v32 = vsel %vm1193_vm1, %v1973_v46, %v904_v21  ;;  %v2463_v58 = vadd.f32 %v2462_v57, %v6638_v60  ;;  %v2536_v3 = vmul.f32 %v6631_v43, %v6631_v43  ;;  %v2667_v56 = vmul.f32 %v6638_v60, %v6638_v60 }
 0x226   :  { %v1379_v2 = vsel %vm1193_vm1, %v1270_v0, %v838_v10  ;;  %v1076_v27 = vrot.slane %v837_v40, 7  ;;  %v1269_v4 = vrot.slane %v837_v40, 1  ;;  %v1436_v50 = vmul.f32 0.75, %v837_v40 }
 0x227   :  { %v1780_v21 = vrot.slane %v903_v16, 7  ;;  %v1972_v36 = vrot.slane %v903_v16, 1  ;;  %v2140_v49 = vmul.f32 0.75, %v903_v16  ;;  %v2599_v51 = vadd.f32 %v2598_v63, %v2536_v3  ;;  %v8557_v3 = vld [vmem:[#allocation68_spill] sm:$0xff] }
 0x228   :  { %v2730_v28 = vadd.f32 %v2729_v22, %v2667_v56  ;;  %v1078_v52 = vsel %vm1000_vm3, %v1076_v27, %v1077_v23  ;;  %v1186_v10 = vsel %vm1000_vm3, %v837_v40, %v1076_v27  ;;  %v1271_v57 = vsel %vm1193_vm1, %v1269_v4, %v1270_v0 }
 0x229   :  { %v1782_v15 = vsel %vm1000_vm3, %v1780_v21, %v1781_v18  ;;  %v1502_v43 = vsel %vm921_vm2, %v1271_v57, %v1186_v10  ;;  %v1503_v60 = vsel %vm921_vm2, %v1379_v2, %v1078_v52  ;;  %v1892_v1 = vsel %vm1000_vm3, %v903_v16, %v1780_v21 }
 0x22a   :  { %v1974_v5 = vsel %vm1193_vm1, %v1972_v36, %v1973_v46  ;;  %v1566_v63 = vmul.f32 0.25, %v1502_v43  ;;  %v1567_v22 = vmul.f32 0.25, %v1503_v60  ;;  %v2205_v0 = vsel %vm921_vm2, %v2084_v32, %v1782_v15  ;;  %v8558_v36 = vld [vmem:[#allocation69_spill] sm:$0xff] }
 0x22b   :  { %v2204_v23 = vsel %vm921_vm2, %v1974_v5, %v1892_v1  ;;  %v2269_v18 = vmul.f32 0.25, %v2205_v0  ;;  %v6680_v56 = vmul.f32 0.25, %v8557_v3  ;;  %v776_v27 = vmul.f32 0.75, %v8557_v3 }
 0x22c   :  { %v2268_v40 = vmul.f32 0.25, %v2204_v23  ;;  %v6683_v2 = vadd.f32 %v1566_v63, %v1436_v50  ;;  %v6685_v16 = vadd.f32 %v1567_v22, %v1437_v55  ;;  %v6688_v43 = vmul.f32 0.25, %v8558_v36 }
 0x22d   :  { %v6691_v60 = vmul.f32 0.75, %v8558_v36  ;;  %v6695_v1 = vadd.f32 %v2269_v18, %v2141_v31  ;;  %v840_v15 = vadd.f32 %v776_v27, %v712_v61  ;;  %v906_v46 = vadd.f32 %v774_v17, %v6680_v56 }
 0x22e   :  { %v6693_v5 = vadd.f32 %v2268_v40, %v2140_v49  ;;  %v2397_v32 = vadd.f32 %v2396_v30, %v6683_v2  ;;  %v2537_v4 = vmul.f32 %v6683_v2, %v6683_v2  ;;  %v905_v50 = vadd.f32 %v773_v19, %v6688_v43 }
 0x22f   :  { %8560 = vst [vmem:[#allocation68_spill] sm:$0xff] %v6695_v1  ;;  %v839_v55 = vadd.f32 %v6691_v60, %v711_v53  ;;  %v1080_v52 = vrot.slane %v840_v15, 7  ;;  %v1273_v31 = vrot.slane %v840_v15, 1  ;;  %v1439_v61 = vmul.f32 0.75, %v840_v15 }
 0x230   :  { %8559 = vst [vmem:[#allocation67_spill] sm:$0xff] %v6693_v5  ;;  %v2464_v21 = vadd.f32 %v2463_v58, %v6693_v5  ;;  %v2668_v49 = vmul.f32 %v6693_v5, %v6693_v5  ;;  %v2600_v10 = vadd.f32 %v2599_v51, %v2537_v4  ;;  %v1784_v57 = vrot.slane %v906_v46, 7 }
 0x231   :  { %v1976_v17 = vrot.slane %v906_v46, 1  ;;  %v1380_v30 = vsel %vm1193_vm1, %v1273_v31, %v840_v15  ;;  %v2143_v22 = vmul.f32 0.75, %v906_v46  ;;  %v1079_v23 = vrot.slane %v839_v55, 7 }
 0x232   :  { %v2731_v63 = vadd.f32 %v2730_v28, %v2668_v49  ;;  %v1272_v0 = vrot.slane %v839_v55, 1  ;;  %v1438_v19 = vmul.f32 0.75, %v839_v55  ;;  %v1783_v40 = vrot.slane %v905_v50, 7 }
 0x233   :  { %v2085_v53 = vsel %vm1193_vm1, %v1976_v17, %v906_v46  ;;  %v1081_v58 = vsel %vm1000_vm3, %v1079_v23, %v1080_v52  ;;  %v1187_v18 = vsel %vm1000_vm3, %v839_v55, %v1079_v23  ;;  %v1975_v3 = vrot.slane %v905_v50, 1 }
 0x234   :  { %v2142_v36 = vmul.f32 0.75, %v905_v50  ;;  %v1274_v51 = vsel %vm1193_vm1, %v1272_v0, %v1273_v31  ;;  %v1505_v28 = vsel %vm921_vm2, %v1380_v30, %v1081_v58  ;;  %v1785_v15 = vsel %vm1000_vm3, %v1783_v40, %v1784_v57 }
 0x235   :  { %v1893_v4 = vsel %vm1000_vm3, %v905_v50, %v1783_v40  ;;  %v1504_v46 = vsel %vm921_vm2, %v1274_v51, %v1187_v18  ;;  %v1569_v49 = vmul.f32 0.25, %v1505_v28  ;;  %v1977_v5 = vsel %vm1193_vm1, %v1975_v3, %v1976_v17 }
 0x236   :  { %v2207_v55 = vsel %vm921_vm2, %v2085_v53, %v1785_v15  ;;  %v1568_v52 = vmul.f32 0.25, %v1504_v46  ;;  %v2206_v31 = vsel %vm921_vm2, %v1977_v5, %v1893_v4  ;;  %v2398_v30 = vadd.f32 %v2397_v32, %v6685_v16 }
 0x237   :  { %v2271_v23 = vmul.f32 0.25, %v2207_v55  ;;  %v6723_v0 = vadd.f32 %v1569_v49, %v1439_v61  ;;  %v2270_v57 = vmul.f32 0.25, %v2206_v31  ;;  %v2465_v50 = vadd.f32 %v2464_v21, %v6695_v1 }
 0x238   :  { %v2538_v40 = vmul.f32 %v6685_v16, %v6685_v16  ;;  %v6728_v58 = vadd.f32 %v1568_v52, %v1438_v19  ;;  %v2669_v53 = vmul.f32 %v6695_v1, %v6695_v1  ;;  %v716_v5 = vmul.f32 0.25, %v6205_v24 }
 0x239   :  { %8561 = vst [vmem:[#allocation69_spill] sm:$0xff] %v6723_v0  ;;  %v6730_v17 = vadd.f32 %v2271_v23, %v2143_v22  ;;  %v6735_v18 = vadd.f32 %v2270_v57, %v2142_v36  ;;  %v778_v61 = vmul.f32 0.75, %v6205_v24  ;;  %v715_v3 = vmul.f32 0.25, %v6233_v35 }
 0x23a   :  { %8562 = vst [vmem:[#allocation86_spill] sm:$0xff] %v6728_v58  ;;  %v2601_v32 = vadd.f32 %v2600_v10, %v2538_v40  ;;  %v2399_v21 = vadd.f32 %v2398_v30, %v6728_v58  ;;  %v2539_v19 = vmul.f32 %v6728_v58, %v6728_v58  ;;  %v2732_v51 = vadd.f32 %v2731_v63, %v2669_v53 }
 0x23b   :  { %8563 = vst [vmem:[#allocation87_spill] sm:$0xff] %v6730_v17  ;;  %8564 = vst [vmem:[#allocation88_spill] sm:$0xff] %v6735_v18  ;;  %v908_v22 = vadd.f32 %v776_v27, %v716_v5  ;;  %v2466_v28 = vadd.f32 %v2465_v50, %v6735_v18  ;;  %v2670_v15 = vmul.f32 %v6735_v18, %v6735_v18  ;;  %v777_v10 = vmul.f32 0.75, %v6233_v35 }
 0x23c   :  { %v842_v36 = vadd.f32 %v778_v61, %v6680_v56  ;;  %v2602_v4 = vadd.f32 %v2601_v32, %v2539_v19  ;;  %v907_v30 = vadd.f32 %v6691_v60, %v715_v3  ;;  %v2400_v56 = vadd.f32 %v2399_v21, %v6723_v0 }
 0x23d   :  { %v1787_v24 = vrot.slane %v908_v22, 7  ;;  %v1979_v46 = vrot.slane %v908_v22, 1  ;;  %v2733_v49 = vadd.f32 %v2732_v51, %v2670_v15  ;;  %v2145_v31 = vmul.f32 0.75, %v908_v22 }
 0x23e   :  { %v1083_v55 = vrot.slane %v842_v36, 7  ;;  %v1276_v52 = vrot.slane %v842_v36, 1  ;;  %v1441_v23 = vmul.f32 0.75, %v842_v36  ;;  %v841_v27 = vadd.f32 %v777_v10, %v6688_v43 }
 0x23f   :  { %v2086_v63 = vsel %vm1193_vm1, %v1979_v46, %v908_v22  ;;  %v2467_v35 = vadd.f32 %v2466_v28, %v6730_v17  ;;  %v2540_v50 = vmul.f32 %v6723_v0, %v6723_v0  ;;  %v1786_v32 = vrot.slane %v907_v30, 7 }
 0x240   :  { %v1381_v57 = vsel %vm1193_vm1, %v1276_v52, %v842_v36  ;;  %v1082_v40 = vrot.slane %v841_v27, 7  ;;  %v1275_v53 = vrot.slane %v841_v27, 1  ;;  %v2671_v19 = vmul.f32 %v6730_v17, %v6730_v17 }
 0x241   :  { %v1440_v51 = vmul.f32 0.75, %v841_v27  ;;  %v1978_v22 = vrot.slane %v907_v30, 1  ;;  %v2144_v43 = vmul.f32 0.75, %v907_v30  ;;  %v2603_v15 = vadd.f32 %v2602_v4, %v2540_v50 }
 0x242   :  { %v1084_v60 = vsel %vm1000_vm3, %v1082_v40, %v1083_v55  ;;  %v1188_v36 = vsel %vm1000_vm3, %v841_v27, %v1082_v40  ;;  %v1277_v21 = vsel %vm1193_vm1, %v1275_v53, %v1276_v52  ;;  %v1788_v28 = vsel %vm1000_vm3, %v1786_v32, %v1787_v24 }
 0x243   :  { %v1506_v18 = vsel %vm921_vm2, %v1277_v21, %v1188_v36  ;;  %v1507_v1 = vsel %vm921_vm2, %v1381_v57, %v1084_v60  ;;  %v1894_v17 = vsel %vm1000_vm3, %v907_v30, %v1786_v32  ;;  %v1980_v0 = vsel %vm1193_vm1, %v1978_v22, %v1979_v46 }
 0x244   :  { %v1570_v58 = vmul.f32 0.25, %v1506_v18  ;;  %v1571_v4 = vmul.f32 0.25, %v1507_v1  ;;  %v2208_v55 = vsel %vm921_vm2, %v1980_v0, %v1894_v17  ;;  %v2209_v52 = vsel %vm921_vm2, %v2086_v63, %v1788_v28 }
 0x245   :  { %v2272_v27 = vmul.f32 0.25, %v2208_v55  ;;  %v2273_v24 = vmul.f32 0.25, %v2209_v52  ;;  %v718_v50 = vmul.f32 0.25, %v6275_v45  ;;  %v780_v40 = vmul.f32 0.75, %v6275_v45 }
 0x246   :  { %v6773_v53 = vadd.f32 %v1570_v58, %v1440_v51  ;;  %v6775_v57 = vadd.f32 %v1571_v4, %v1441_v23  ;;  %v6778_v46 = vmul.f32 0.25, %v6313_v54  ;;  %v6781_v1 = vmul.f32 0.75, %v6313_v54 }
 0x247   :  { %v6783_v0 = vadd.f32 %v2272_v27, %v2144_v43  ;;  %v6785_v17 = vadd.f32 %v2273_v24, %v2145_v31  ;;  %v844_v18 = vadd.f32 %v780_v40, %v716_v5  ;;  %v910_v63 = vadd.f32 %v778_v61, %v718_v50 }
 0x248   :  { %v2541_v30 = vmul.f32 %v6773_v53, %v6773_v53  ;;  %v2734_v45 = vadd.f32 %v2733_v49, %v2671_v19  ;;  %v843_v58 = vadd.f32 %v6781_v1, %v715_v3  ;;  %v909_v23 = vadd.f32 %v777_v10, %v6778_v46 }
 0x249   :  { %8565 = vst [vmem:[#allocation89_spill] sm:$0xff] %v6783_v0  ;;  %8566 = vst [vmem:[#allocation90_spill] sm:$0xff] %v6785_v17  ;;  %v2401_v32 = vadd.f32 %v2400_v56, %v6773_v53  ;;  %v2468_v51 = vadd.f32 %v2467_v35, %v6783_v0  ;;  %v1086_v54 = vrot.slane %v844_v18, 7  ;;  %v1279_v22 = vrot.slane %v844_v18, 1 }
 0x24a   :  { %v2604_v43 = vadd.f32 %v2603_v15, %v2541_v30  ;;  %v2672_v31 = vmul.f32 %v6783_v0, %v6783_v0  ;;  %v1790_v5 = vrot.slane %v910_v63, 7  ;;  %v1982_v61 = vrot.slane %v910_v63, 1 }
 0x24b   :  { %v1382_v60 = vsel %vm1193_vm1, %v1279_v22, %v844_v18  ;;  %v1443_v36 = vmul.f32 0.75, %v844_v18  ;;  %v2147_v49 = vmul.f32 0.75, %v910_v63  ;;  %v1085_v19 = vrot.slane %v843_v58, 7 }
 0x24c   :  { %v2087_v3 = vsel %vm1193_vm1, %v1982_v61, %v910_v63  ;;  %v1278_v10 = vrot.slane %v843_v58, 1  ;;  %v1442_v21 = vmul.f32 0.75, %v843_v58  ;;  %v1789_v56 = vrot.slane %v909_v23, 7 }
 0x24d   :  { %v1087_v35 = vsel %vm1000_vm3, %v1085_v19, %v1086_v54  ;;  %v1189_v28 = vsel %vm1000_vm3, %v843_v58, %v1085_v19  ;;  %v1981_v15 = vrot.slane %v909_v23, 1  ;;  %v2146_v4 = vmul.f32 0.75, %v909_v23 }
 0x24e   :  { %v1280_v55 = vsel %vm1193_vm1, %v1278_v10, %v1279_v22  ;;  %v1509_v52 = vsel %vm921_vm2, %v1382_v60, %v1087_v35  ;;  %v1791_v27 = vsel %vm1000_vm3, %v1789_v56, %v1790_v5  ;;  %v1895_v24 = vsel %vm1000_vm3, %v909_v23, %v1789_v56 }
 0x24f   :  { %v1508_v18 = vsel %vm921_vm2, %v1280_v55, %v1189_v28  ;;  %v1573_v63 = vmul.f32 0.25, %v1509_v52  ;;  %v1983_v30 = vsel %vm1193_vm1, %v1981_v15, %v1982_v61  ;;  %v2211_v58 = vsel %vm921_vm2, %v2087_v3, %v1791_v27 }
 0x250   :  { %v2735_v54 = vadd.f32 %v2734_v45, %v2672_v31  ;;  %v1572_v19 = vmul.f32 0.25, %v1508_v18  ;;  %v2210_v22 = vsel %vm921_vm2, %v1983_v30, %v1895_v24  ;;  %v2275_v10 = vmul.f32 0.25, %v2211_v58 }
 0x251   :  { %v6811_v60 = vadd.f32 %v1573_v63, %v1443_v36  ;;  %v2274_v5 = vmul.f32 0.25, %v2210_v22  ;;  %v2402_v23 = vadd.f32 %v2401_v32, %v6775_v57  ;;  %v2542_v56 = vmul.f32 %v6775_v57, %v6775_v57 }
 0x252   :  { %v6816_v35 = vadd.f32 %v1572_v19, %v1442_v21  ;;  %v6818_v61 = vadd.f32 %v2275_v10, %v2147_v49  ;;  %v2469_v3 = vadd.f32 %v2468_v51, %v6785_v17  ;;  %v720_v45 = vmul.f32 0.25, %v6330_v9 }
 0x253   :  { %8567 = vst [vmem:[#allocation91_spill] sm:$0xff] %v6811_v60  ;;  %v6822_v31 = vadd.f32 %v2274_v5, %v2146_v4  ;;  %v2605_v28 = vadd.f32 %v2604_v43, %v2542_v56  ;;  %v2673_v36 = vmul.f32 %v6785_v17, %v6785_v17  ;;  %v782_v15 = vmul.f32 0.75, %v6330_v9 }
 0x254   :  { %8568 = vst [vmem:[#allocation92_spill] sm:$0xff] %v6816_v35  ;;  %8569 = vst [vmem:[#allocation93_spill] sm:$0xff] %v6818_v61  ;;  %v912_v32 = vadd.f32 %v780_v40, %v720_v45  ;;  %v719_v55 = vmul.f32 0.25, %v6360_v12  ;;  %v2543_v21 = vmul.f32 %v6816_v35, %v6816_v35  ;;  %v781_v51 = vmul.f32 0.75, %v6360_v12 }
 0x255   :  { %8570 = vst [vmem:[#allocation94_spill] sm:$0xff] %v6822_v31  ;;  %v2736_v49 = vadd.f32 %v2735_v54, %v2673_v36  ;;  %v846_v52 = vadd.f32 %v782_v15, %v718_v50  ;;  %v2403_v27 = vadd.f32 %v2402_v23, %v6816_v35  ;;  %v2470_v43 = vadd.f32 %v2469_v3, %v6822_v31 }
 0x256   :  { %v1985_v4 = vrot.slane %v912_v32, 1  ;;  %v2606_v24 = vadd.f32 %v2605_v28, %v2543_v21  ;;  %v2674_v18 = vmul.f32 %v6822_v31, %v6822_v31  ;;  %v1793_v63 = vrot.slane %v912_v32, 7 }
 0x257   :  { %v1282_v9 = vrot.slane %v846_v52, 1  ;;  %v1089_v40 = vrot.slane %v846_v52, 7  ;;  %v845_v30 = vadd.f32 %v781_v51, %v6778_v46  ;;  %v911_v58 = vadd.f32 %v6781_v1, %v719_v55 }
 0x258   :  { %v2737_v54 = vadd.f32 %v2736_v49, %v2674_v18  ;;  %v1445_v50 = vmul.f32 0.75, %v846_v52  ;;  %v2088_v12 = vsel %vm1193_vm1, %v1985_v4, %v912_v32  ;;  %v2149_v19 = vmul.f32 0.75, %v912_v32 }
 0x259   :  { %v1383_v22 = vsel %vm1193_vm1, %v1282_v9, %v846_v52  ;;  %v1088_v10 = vrot.slane %v845_v30, 7  ;;  %v1281_v5 = vrot.slane %v845_v30, 1  ;;  %v1792_v23 = vrot.slane %v911_v58, 7 }
 0x25a   :  { %v1444_v56 = vmul.f32 0.75, %v845_v30  ;;  %v1984_v3 = vrot.slane %v911_v58, 1  ;;  %v2148_v28 = vmul.f32 0.75, %v911_v58  ;;  %v2471_v36 = vadd.f32 %v2470_v43, %v6818_v61 }
 0x25b   :  { %v1090_v21 = vsel %vm1000_vm3, %v1088_v10, %v1089_v40  ;;  %v1190_v46 = vsel %vm1000_vm3, %v845_v30, %v1088_v10  ;;  %v1283_v1 = vsel %vm1193_vm1, %v1281_v5, %v1282_v9  ;;  %v1794_v49 = vsel %vm1000_vm3, %v1792_v23, %v1793_v63 }
 0x25c   :  { %v1510_v32 = vsel %vm921_vm2, %v1283_v1, %v1190_v46  ;;  %v1511_v52 = vsel %vm921_vm2, %v1383_v22, %v1090_v21  ;;  %v1896_v18 = vsel %vm1000_vm3, %v911_v58, %v1792_v23  ;;  %v1986_v31 = vsel %vm1193_vm1, %v1984_v3, %v1985_v4 }
 0x25d   :  { %v1574_v17 = vmul.f32 0.25, %v1510_v32  ;;  %v1575_v43 = vmul.f32 0.25, %v1511_v52  ;;  %v2212_v40 = vsel %vm921_vm2, %v1986_v31, %v1896_v18  ;;  %v2213_v9 = vsel %vm921_vm2, %v2088_v12, %v1794_v49 }
 0x25e   :  { %v2276_v30 = vmul.f32 0.25, %v2212_v40  ;;  %v2277_v63 = vmul.f32 0.25, %v2213_v9  ;;  %v722_v10 = vmul.f32 0.25, %v6377_v14  ;;  %v784_v5 = vmul.f32 0.75, %v6377_v14 }
 0x25f   :  { %v6856_v46 = vadd.f32 %v1574_v17, %v1444_v56  ;;  %v6858_v22 = vadd.f32 %v1575_v43, %v1445_v50  ;;  %v721_v4 = vmul.f32 0.25, %v6415_v59  ;;  %v783_v58 = vmul.f32 0.75, %v6415_v59 }
 0x260   :  { %v6862_v23 = vadd.f32 %v2276_v30, %v2148_v28  ;;  %v6864_v31 = vadd.f32 %v2277_v63, %v2149_v19  ;;  %v848_v3 = vadd.f32 %v784_v5, %v720_v45  ;;  %v914_v12 = vadd.f32 %v782_v15, %v722_v10 }
 0x261   :  { %8571 = vst [vmem:[#allocation95_spill] sm:$0xff] %v6856_v46  ;;  %v2544_v21 = vmul.f32 %v6811_v60, %v6811_v60  ;;  %v2675_v14 = vmul.f32 %v6818_v61, %v6818_v61  ;;  %v847_v17 = vadd.f32 %v783_v58, %v719_v55  ;;  %v913_v56 = vadd.f32 %v781_v51, %v721_v4 }
 0x262   :  { %8572 = vst [vmem:[#allocation96_spill] sm:$0xff] %v6862_v23  ;;  %8573 = vst [vmem:[#allocation97_spill] sm:$0xff] %v6864_v31  ;;  %v2404_v50 = vadd.f32 %v2403_v27, %v6811_v60  ;;  %v1092_v1 = vrot.slane %v848_v3, 7  ;;  %v1285_v49 = vrot.slane %v848_v3, 1  ;;  %v1796_v28 = vrot.slane %v914_v12, 7 }
 0x263   :  { %v6871_v32 = vadd.f32 %v2606_v24, %v2544_v21  ;;  %v2738_v59 = vadd.f32 %v2737_v54, %v2675_v14  ;;  %v1988_v19 = vrot.slane %v914_v12, 1  ;;  %v2472_v45 = vadd.f32 %v2471_v36, %v6862_v23 }
 0x264   :  { %v2676_v15 = vmul.f32 %v6862_v23, %v6862_v23  ;;  %v1384_v52 = vsel %vm1193_vm1, %v1285_v49, %v848_v3  ;;  %v1091_v18 = vrot.slane %v847_v17, 7  ;;  %v2151_v51 = vmul.f32 0.75, %v914_v12 }
 0x265   :  { %v2089_v55 = vsel %vm1193_vm1, %v1988_v19, %v914_v12  ;;  %v1284_v43 = vrot.slane %v847_v17, 1  ;;  %v1795_v27 = vrot.slane %v913_v56, 7  ;;  %v1446_v54 = vmul.f32 0.75, %v847_v17 }
 0x266   :  { %v1093_v40 = vsel %vm1000_vm3, %v1091_v18, %v1092_v1  ;;  %v1191_v24 = vsel %vm1000_vm3, %v847_v17, %v1091_v18  ;;  %v1987_v9 = vrot.slane %v913_v56, 1  ;;  %v2150_v23 = vmul.f32 0.75, %v913_v56 }
 0x267   :  { %v1286_v30 = vsel %vm1193_vm1, %v1284_v43, %v1285_v49  ;;  %v1513_v36 = vsel %vm921_vm2, %v1384_v52, %v1093_v40  ;;  %v1797_v63 = vsel %vm1000_vm3, %v1795_v27, %v1796_v28  ;;  %v1897_v21 = vsel %vm1000_vm3, %v913_v56, %v1795_v27 }
 0x268   :  { %v1512_v12 = vsel %vm921_vm2, %v1286_v30, %v1191_v24  ;;  %v1989_v14 = vsel %vm1193_vm1, %v1987_v9, %v1988_v19  ;;  %v2215_v1 = vsel %vm921_vm2, %v2089_v55, %v1797_v63  ;;  %v2739_v17 = vadd.f32 %v2738_v59, %v2676_v15 }
 0x269   :  { %v1576_v18 = vmul.f32 0.25, %v1512_v12  ;;  %v2214_v49 = vsel %vm921_vm2, %v1989_v14, %v1897_v21  ;;  %v2279_v43 = vmul.f32 0.25, %v2215_v1  ;;  %v2473_v28 = vadd.f32 %v2472_v45, %v6864_v31 }
 0x26a   :  { %v2278_v52 = vmul.f32 0.25, %v2214_v49  ;;  %v786_v27 = vmul.f32 0.75, %v6429_v47  ;;  %v854_v40 = vmul.f32 0.25, %v6429_v47  ;;  %v785_v56 = vmul.f32 0.75, %v6460_v37 }
 0x26b   :  { %v6895_v24 = vadd.f32 %v1576_v18, %v1446_v54  ;;  %v6897_v19 = vadd.f32 %v2279_v43, %v2151_v51  ;;  %v853_v59 = vmul.f32 0.25, %v6460_v37  ;;  %v2405_v15 = vadd.f32 %v2404_v50, %v6856_v46 }
 0x26c   :  { %v6902_v55 = vadd.f32 %v2278_v52, %v2150_v23  ;;  %v850_v9 = vadd.f32 %v786_v27, %v722_v10  ;;  %v916_v30 = vadd.f32 %v854_v40, %v784_v5  ;;  %v2677_v45 = vmul.f32 %v6864_v31, %v6864_v31 }
 0x26d   :  { %8574 = vst [vmem:[#allocation98_spill] sm:$0xff] %v6897_v19  ;;  %v918_v63 = vadd.f32 %v854_v40, %v786_v27  ;;  %v849_v21 = vadd.f32 %v785_v56, %v721_v4  ;;  %v915_v47 = vadd.f32 %v853_v59, %v783_v58  ;;  %v2545_v51 = vmul.f32 %v6856_v46, %v6856_v46 }
 0x26e   :  { %8575 = vst [vmem:[#allocation99_spill] sm:$0xff] %v6902_v55  ;;  %v1447_v54 = vmul.f32 0.75, %v848_v3  ;;  %v1577_v12 = vmul.f32 0.25, %v1513_v36  ;;  %v1288_v14 = vrot.slane %v850_v9, 1  ;;  %v2474_v37 = vadd.f32 %v2473_v28, %v6902_v55 }
 0x26f   :  { %v2740_v1 = vadd.f32 %v2739_v17, %v2677_v45  ;;  %v1095_v50 = vrot.slane %v850_v9, 7  ;;  %v1991_v23 = vrot.slane %v916_v30, 1  ;;  %v1449_v5 = vmul.f32 0.75, %v850_v9 }
 0x270   :  { %v1385_v10 = vsel %vm1193_vm1, %v1288_v14, %v850_v9  ;;  %v1799_v18 = vrot.slane %v916_v30, 7  ;;  %v1802_v49 = vrot.slane %v918_v63, 7  ;;  %v1994_v43 = vrot.slane %v918_v63, 1 }
 0x271   :  { %v2153_v52 = vmul.f32 0.75, %v916_v30  ;;  %v917_v4 = vadd.f32 %v853_v59, %v785_v56  ;;  %v1094_v58 = vrot.slane %v849_v21, 7  ;;  %v2090_v27 = vsel %vm1193_vm1, %v1991_v23, %v916_v30 }
 0x272   :  { %v1287_v40 = vrot.slane %v849_v21, 1  ;;  %v1448_v3 = vmul.f32 0.75, %v849_v21  ;;  %v1798_v36 = vrot.slane %v915_v47, 7  ;;  %v1990_v45 = vrot.slane %v915_v47, 1 }
 0x273   :  { %v1096_v31 = vsel %vm1000_vm3, %v1094_v58, %v1095_v50  ;;  %v1192_v17 = vsel %vm1000_vm3, %v849_v21, %v1094_v58  ;;  %v1801_v28 = vrot.slane %v917_v4, 7  ;;  %v1993_v46 = vrot.slane %v917_v4, 1 }
 0x274   :  { %v1289_v61 = vsel %vm1193_vm1, %v1287_v40, %v1288_v14  ;;  %v1800_v9 = vsel %vm1000_vm3, %v1798_v36, %v1799_v18  ;;  %v1898_v0 = vsel %vm1000_vm3, %v915_v47, %v1798_v36  ;;  %v1992_v50 = vsel %vm1193_vm1, %v1990_v45, %v1991_v23 }
 0x275   :  { %v1514_v56 = vsel %vm921_vm2, %v1289_v61, %v1192_v17  ;;  %v1803_v59 = vsel %vm1000_vm3, %v1801_v28, %v1802_v49  ;;  %v1899_v30 = vsel %vm1000_vm3, %v917_v4, %v1801_v28  ;;  %v1995_v21 = vsel %vm1193_vm1, %v1993_v46, %v1994_v43 }
 0x276   :  { %v1578_v60 = vmul.f32 0.25, %v1514_v56  ;;  %v2152_v58 = vmul.f32 0.75, %v915_v47  ;;  %v2154_v35 = vmul.f32 0.75, %v917_v4  ;;  %v2091_v14 = vsel %vm1193_vm1, %v1994_v43, %v918_v63 }
 0x277   :  { %v2216_v18 = vsel %vm921_vm2, %v1992_v50, %v1898_v0  ;;  %v2217_v40 = vsel %vm921_vm2, %v2090_v27, %v1800_v9  ;;  %v2218_v61 = vsel %vm921_vm2, %v1995_v21, %v1899_v30  ;;  %v2608_v46 = vadd.f32 %v6871_v32, %v2545_v51 }
 0x278   :  { %v6929_v49 = vadd.f32 %v1578_v60, %v1448_v3  ;;  %v2280_v36 = vmul.f32 0.25, %v2216_v18  ;;  %v2281_v23 = vmul.f32 0.25, %v2217_v40  ;;  %v2282_v17 = vmul.f32 0.25, %v2218_v61 }
 0x279   :  { %v2678_v47 = vmul.f32 %v6902_v55, %v6902_v55  ;;  %v1515_v43 = vsel %vm921_vm2, %v1385_v10, %v1096_v31  ;;  %v6936_v0 = vadd.f32 %v1577_v12, %v1447_v54  ;;  %v2155_v4 = vmul.f32 0.75, %v918_v63 }
 0x27a   :  { %v6938_v27 = vadd.f32 %v2280_v36, %v2152_v58  ;;  %v6940_v28 = vadd.f32 %v2282_v17, %v2154_v35  ;;  %v1579_v60 = vmul.f32 0.25, %v1515_v43  ;;  %v2219_v3 = vsel %vm921_vm2, %v2091_v14, %v1803_v59 }
 0x27b   :  { %v6944_v45 = vadd.f32 %v2281_v23, %v2153_v52  ;;  %v2406_v32 = vadd.f32 %v2405_v15, %v6858_v22  ;;  %v2475_v51 = vadd.f32 %v2474_v37, %v6897_v19  ;;  %v2741_v9 = vadd.f32 %v2740_v1, %v2678_v47 }
 0x27c   :  { %8576 = vst [vmem:[#allocation100_spill] sm:$0xff] %v6938_v27  ;;  %8577 = vst [vmem:[#allocation101_spill] sm:$0xff] %v6940_v28  ;;  %v6948_v56 = vadd.f32 %v1579_v60, %v1449_v5  ;;  %v2283_v31 = vmul.f32 0.25, %v2219_v3  ;;  %v2546_v63 = vmul.f32 %v6858_v22, %v6858_v22  ;;  %v2547_v12 = vmul.f32 %v6895_v24, %v6895_v24 }
 0x27d   :  { %8578 = vst [vmem:[#allocation102_spill] sm:$0xff] %v6944_v45  ;;  %v2407_v35 = vadd.f32 %v2406_v32, %v6895_v24  ;;  %v2476_v54 = vadd.f32 %v2475_v51, %v6938_v27  ;;  %v2679_v15 = vmul.f32 %v6897_v19, %v6897_v19  ;;  %v2680_v5 = vmul.f32 %v6938_v27, %v6938_v27 }
 0x27e   :  { %v6956_v10 = vadd.f32 %v2283_v31, %v2155_v4  ;;  %v2609_v52 = vadd.f32 %v2608_v46, %v2546_v63  ;;  %v2548_v59 = vmul.f32 %v6936_v0, %v6936_v0  ;;  %v2549_v14 = vmul.f32 %v6929_v49, %v6929_v49 }
 0x27f   :  { %v2408_v37 = vadd.f32 %v2407_v35, %v6936_v0  ;;  %v2477_v1 = vadd.f32 %v2476_v54, %v6944_v45  ;;  %v2742_v50 = vadd.f32 %v2741_v9, %v2679_v15  ;;  %v2681_v40 = vmul.f32 %v6944_v45, %v6944_v45 }
 0x280   :  { %8579 = vst [vmem:[#allocation103_spill] sm:$0xff] %v6956_v10  ;;  %v2610_v30 = vadd.f32 %v2609_v52, %v2547_v12  ;;  %v2550_v17 = vmul.f32 %v6948_v56, %v6948_v56  ;;  %v2682_v47 = vmul.f32 %v6940_v28, %v6940_v28  ;;  %v2683_v32 = vmul.f32 %v6956_v10, %v6956_v10 }
 0x281   :  { %v2409_v21 = vadd.f32 %v2408_v37, %v6929_v49  ;;  %v2478_v58 = vadd.f32 %v2477_v1, %v6940_v28  ;;  %v2743_v61 = vadd.f32 %v2742_v50, %v2680_v5 }
 0x282   :  { %v2611_v18 = vadd.f32 %v2610_v30, %v2548_v59 }
 0x283   :  { %v2410_v36 = vadd.f32 %v2409_v21, %v6948_v56  ;;  %v2479_v23 = vadd.f32 %v2478_v58, %v6956_v10  ;;  %v2744_v43 = vadd.f32 %v2743_v61, %v2681_v40 }
 0x284   :  { %v2612_v46 = vadd.f32 %v2611_v18, %v2549_v14 }
 0x285   :  { %v2411_v4 = vrot.slane %v2410_v36, 4  ;;  %v2480_v60 = vrot.slane %v2479_v23, 4  ;;  %v2745_v51 = vadd.f32 %v2744_v43, %v2682_v47 }
 0x286   :  { %v2613_v3 = vadd.f32 %v2612_v46, %v2550_v17 }
 0x287   :  { %v2412_v9 = vadd.f32 %v2411_v4, %v2410_v36  ;;  %v2481_v31 = vadd.f32 %v2480_v60, %v2479_v23  ;;  %v2746_v35 = vadd.f32 %v2745_v51, %v2683_v32 }
 0x288   :  { %v2614_v63 = vrot.slane %v2613_v3, 4 }
 0x289   :  { %v2413_v54 = vrot.slane %v2412_v9, 2  ;;  %v2482_v12 = vrot.slane %v2481_v31, 2  ;;  %v2747_v15 = vrot.slane %v2746_v35, 4 }
 0x28a   :  { %v2615_v52 = vadd.f32 %v2614_v63, %v2613_v3 }
 0x28b   :  { %v2414_v37 = vadd.f32 %v2413_v54, %v2412_v9  ;;  %v2483_v1 = vadd.f32 %v2482_v12, %v2481_v31  ;;  %v2748_v59 = vadd.f32 %v2747_v15, %v2746_v35  ;;  %v2764_v54 = vld [vmem:[%s8339_s2] sm:$0x1] }
 0x28c   :  { %v2616_v5 = vrot.slane %v2615_v52, 2 }
 0x28d   :  { %v2415_v30 = vrot.slane %v2414_v37, 1  ;;  %v2484_v50 = vrot.slane %v2483_v1, 1  ;;  %v2749_v58 = vrot.slane %v2748_v59, 2 }
 0x28e   :  { %v2617_v21 = vadd.f32 %v2616_v5, %v2615_v52  ;;  %v8580_v52 = vlaneseq }
 0x28f   :  { %v2416_v14 = vadd.f32 %v2415_v30, %v2414_v37  ;;  %v2485_v18 = vadd.f32 %v2484_v50, %v2483_v1  ;;  %v2750_v61 = vadd.f32 %v2749_v58, %v2748_v59  ;;  %v2768_v1 = vld [vmem:[%s8340_s3] sm:$0x1] }
 0x290   :  { %v2618_v40 = vrot.slane %v2617_v21, 1  ;;  %v2773_v15 = vshrl.u32 %v8580_v52, 7 }
 0x291   :  { %v2486_v36 = vadd.f32 %v2485_v18, %v2416_v14  ;;  %v2751_v23 = vrot.slane %v2750_v61, 1  ;;  %v8582_v14 = vld [vmem:[#allocation3_spill] sm:$0xff] }
 0x292   :  { %v2619_v17 = vadd.f32 %v2618_v40, %v2617_v21  ;;  %v2774_v5 = vsub.s32 0, %v2773_v15  ;;  %v8581_v21 = vld [vmem:[#allocation2_spill] sm:$0xff]  ;;  %v8583_v40 = vld [vmem:[#allocation4_spill] sm:$0xff] }
 0x293   :  { %2754 = vrot.lane.b32.xlu0 %v2486_v36, %s5024_s0  ;;  %v2752_v46 = vadd.f32 %v2751_v23, %v2750_v61 }
 0x295   :  { %v2753_v47 = vadd.f32 %v2752_v46, %v2619_v17  ;;  %v8585_v17 = vld [vmem:[#allocation8_spill] sm:$0xff] }
 0x297   :  { %2758 = vrot.lane.b32.xlu0 %v2753_v47, %s5024_s0 }
 0x305   :  { %v2755_v43 = vpop.permute.xlu0 %2754 }
 0x306   :  { %v2756_v60 = vadd.f32 %v2755_v43, %v2486_v36  ;;  %v8584_v36 = vld [vmem:[#allocation5_spill] sm:$0xff] }
 0x308   :  { %v2757_v32 = vmul.f32 0.00048828125, %v2756_v60  ;;  %v8586_v60 = vld [vmem:[#allocation9_spill] sm:$0xff] }
 0x309   :  { %v2759_v4 = vpop.permute.xlu0 %2758 }
 0x30a   :  { %v2760_v3 = vadd.f32 %v2759_v4, %v2753_v47  ;;  %v2762_v9 = vmul.f32 %v2757_v32, %v2757_v32 }
 0x30c   :  { %v2761_v51 = vmul.f32 0.00048828125, %v2760_v3 }
 0x30e   :  { %v2763_v31 = vsub.f32 %v2761_v51, %v2762_v9  ;;  %v8587_v51 = vld [vmem:[#allocation13_spill] sm:$0xff] }
 0x310   :  { %v2765_v63 = vadd.f32 1e-05, %v2763_v31 }
 0x312   :  { %4510 = vrsqrt.f32 %v2765_v63  ;;  %v8588_v63 = vld [vmem:[#allocation14_spill] sm:$0xff] }
 0x31c   :  { %v4511_v35 = vpop.eup %4510 }
 0x31d   :  { %v2767_v12 = vmul.f32 %v4511_v35, %v2764_v54  ;;  %v8589_v54 = vld [vmem:[#allocation16_spill] sm:$0xff] }
 0x31f   :  { %v2769_v37 = vmul.f32 %v2767_v12, %v2757_v32  ;;  %v6987_v30 = vrot.slane %v2767_v12, %v2774_v5 }
 0x321   :  { %v2770_v59 = vsub.f32 %v2768_v1, %v2769_v37  ;;  %v2777_v58 = vmul.f32 %v6987_v30, %v8581_v21  ;;  %v2778_v18 = vmul.f32 %v6987_v30, %v8582_v14  ;;  %v2779_v61 = vmul.f32 %v6987_v30, %v8583_v40 }
 0x322   :  { %v2780_v23 = vmul.f32 %v6987_v30, %v8584_v36  ;;  %v2781_v46 = vmul.f32 %v6987_v30, %v8585_v17  ;;  %v2782_v3 = vmul.f32 %v6987_v30, %v8586_v60  ;;  %v2783_v9 = vmul.f32 %v6987_v30, %v8587_v51 }
 0x323   :  { %v6989_v50 = vrot.slane %v2770_v59, %v2774_v5  ;;  %v2784_v35 = vmul.f32 %v6987_v30, %v8588_v63  ;;  %v2785_v12 = vmul.f32 %v6987_v30, %v8589_v54  ;;  %v8590_v59 = vld [vmem:[#allocation17_spill] sm:$0xff] }
 0x324   :  { %v2786_v21 = vmul.f32 %v6987_v30, %v8590_v59  ;;  %v8595_v63 = vld [vmem:[#allocation29_spill] sm:$0xff] }
 0x325   :  { %v2847_v47 = vadd.f32 %v6989_v50, %v2777_v58  ;;  %v2848_v43 = vadd.f32 %v6989_v50, %v2778_v18  ;;  %v2849_v4 = vadd.f32 %v6989_v50, %v2779_v61  ;;  %v2850_v32 = vadd.f32 %v6989_v50, %v2780_v23  ;;  %v8591_v18 = vld [vmem:[#allocation21_spill] sm:$0xff]  ;;  %v8592_v23 = vld [vmem:[#allocation20_spill] sm:$0xff] }
 0x326   :  { %v2851_v31 = vadd.f32 %v6989_v50, %v2781_v46  ;;  %v2852_v52 = vadd.f32 %v6989_v50, %v2782_v3  ;;  %v2853_v15 = vadd.f32 %v6989_v50, %v2783_v9  ;;  %v2854_v58 = vadd.f32 %v6989_v50, %v2784_v35 }
 0x327   :  { %v4132_v37 = vmul.f32 -1.442695, %v2847_v47  ;;  %v4133_v1 = vmul.f32 -1.442695, %v2848_v43  ;;  %v4134_v5 = vmul.f32 -1.442695, %v2849_v4  ;;  %v2787_v40 = vmul.f32 %v6987_v30, %v8591_v18 }
 0x328   :  { %v4135_v14 = vmul.f32 -1.442695, %v2850_v32  ;;  %v2855_v61 = vadd.f32 %v6989_v50, %v2785_v12  ;;  %v4136_v36 = vmul.f32 -1.442695, %v2851_v31  ;;  %v2788_v17 = vmul.f32 %v6987_v30, %v8592_v23  ;;  %v8593_v43 = vld [vmem:[#allocation24_spill] sm:$0xff]  ;;  %v8594_v32 = vld [vmem:[#allocation25_spill] sm:$0xff] }
 0x329   :  { %4512 = vpow2.f32 %v4132_v37  ;;  %v2856_v46 = vadd.f32 %v6989_v50, %v2786_v21  ;;  %v4137_v47 = vmul.f32 -1.442695, %v2852_v52  ;;  %v2789_v4 = vmul.f32 %v6987_v30, %v8593_v43  ;;  %v8596_v52 = vld [vmem:[#allocation28_spill] sm:$0xff] }
 0x32a   :  { %4514 = vpow2.f32 %v4133_v1  ;;  %v2857_v60 = vadd.f32 %v6989_v50, %v2787_v40  ;;  %v4138_v3 = vmul.f32 -1.442695, %v2853_v15  ;;  %v2790_v51 = vmul.f32 %v6987_v30, %v8594_v32  ;;  %v8601_v32 = vld [vmem:[#allocation40_spill] sm:$0xff] }
 0x32b   :  { %4516 = vpow2.f32 %v4134_v5  ;;  %v2858_v9 = vadd.f32 %v6989_v50, %v2788_v17  ;;  %v4139_v31 = vmul.f32 -1.442695, %v2854_v58  ;;  %v2791_v35 = vmul.f32 %v6987_v30, %v8595_v63  ;;  %v8597_v5 = vld [vmem:[#allocation32_spill] sm:$0xff] }
 0x32c   :  { %4518 = vpow2.f32 %v4135_v14  ;;  %v2859_v54 = vadd.f32 %v6989_v50, %v2789_v4  ;;  %v4140_v12 = vmul.f32 -1.442695, %v2855_v61  ;;  %v2792_v37 = vmul.f32 %v6987_v30, %v8596_v52  ;;  %v8598_v14 = vld [vmem:[#allocation33_spill] sm:$0xff] }
 0x32d   :  { %4520 = vpow2.f32 %v4136_v36  ;;  %v2860_v1 = vadd.f32 %v6989_v50, %v2790_v51  ;;  %v4141_v15 = vmul.f32 -1.442695, %v2856_v46  ;;  %v2793_v59 = vmul.f32 %v6987_v30, %v8597_v5  ;;  %v8599_v36 = vld [vmem:[#allocation37_spill] sm:$0xff] }
 0x32e   :  { %4522 = vpow2.f32 %v4137_v47  ;;  %v2861_v21 = vadd.f32 %v6989_v50, %v2791_v35  ;;  %v4142_v58 = vmul.f32 -1.442695, %v2857_v60  ;;  %v2794_v18 = vmul.f32 %v6987_v30, %v8598_v14  ;;  %v8600_v47 = vld [vmem:[#allocation36_spill] sm:$0xff]  ;;  %v8602_v35 = vld [vmem:[#allocation41_spill] sm:$0xff] }
 0x32f   :  { %4524 = vpow2.f32 %v4138_v3  ;;  %v2862_v40 = vadd.f32 %v6989_v50, %v2792_v37  ;;  %v4143_v61 = vmul.f32 -1.442695, %v2858_v9  ;;  %v2795_v23 = vmul.f32 %v6987_v30, %v8599_v36 }
 0x330   :  { %4526 = vpow2.f32 %v4139_v31  ;;  %v2863_v17 = vadd.f32 %v6989_v50, %v2793_v59  ;;  %v4144_v46 = vmul.f32 -1.442695, %v2859_v54  ;;  %v2796_v43 = vmul.f32 %v6987_v30, %v8600_v47 }
 0x331   :  { %4528 = vpow2.f32 %v4140_v12  ;;  %v2864_v4 = vadd.f32 %v6989_v50, %v2794_v18  ;;  %v4145_v60 = vmul.f32 -1.442695, %v2860_v1  ;;  %v2797_v51 = vmul.f32 %v6987_v30, %v8601_v32  ;;  %v8603_v1 = vld [vmem:[#allocation47_spill] sm:$0xff] }
 0x332   :  { %4530 = vpow2.f32 %v4141_v15  ;;  %v2865_v9 = vadd.f32 %v6989_v50, %v2795_v23  ;;  %v4146_v31 = vmul.f32 -1.442695, %v2861_v21  ;;  %v2798_v54 = vmul.f32 %v6987_v30, %v8602_v35  ;;  %v8604_v21 = vld [vmem:[#allocation46_spill] sm:$0xff] }
 0x333   :  { %v7049_v3 = vpop.eup %4512  ;;  %4532 = vpow2.f32 %v4142_v58  ;;  %v2866_v12 = vadd.f32 %v6989_v50, %v2796_v43  ;;  %v4147_v52 = vmul.f32 -1.442695, %v2862_v40  ;;  %v2799_v15 = vmul.f32 %v6987_v30, %v8603_v1  ;;  %v8605_v40 = vld [vmem:[#allocation52_spill] sm:$0xff] }
 0x334   :  { %v7054_v63 = vpop.eup %4514  ;;  %4534 = vpow2.f32 %v4143_v61  ;;  %v2867_v5 = vadd.f32 %v6989_v50, %v2797_v51  ;;  %v4148_v59 = vmul.f32 -1.442695, %v2863_v17  ;;  %v2800_v14 = vmul.f32 %v6987_v30, %v8604_v21  ;;  %v8606_v17 = vld [vmem:[#allocation53_spill] sm:$0xff] }
 0x335   :  { %v7059_v37 = vpop.eup %4516  ;;  %4536 = vpow2.f32 %v4144_v46  ;;  %v2868_v18 = vadd.f32 %v6989_v50, %v2798_v54  ;;  %v4149_v36 = vmul.f32 -1.442695, %v2864_v4  ;;  %v2801_v23 = vmul.f32 %v6987_v30, %v8605_v40  ;;  %v8607_v4 = vld [vmem:[#allocation59_spill] sm:$0xff] }
 0x336   :  { %v7064_v58 = vpop.eup %4518  ;;  %4538 = vpow2.f32 %v4145_v60  ;;  %v2869_v47 = vadd.f32 %v6989_v50, %v2799_v15  ;;  %v4150_v43 = vmul.f32 -1.442695, %v2865_v9  ;;  %v2802_v32 = vmul.f32 %v6987_v30, %v8606_v17  ;;  %v8608_v9 = vld [vmem:[#allocation58_spill] sm:$0xff] }
 0x337   :  { %v7069_v61 = vpop.eup %4520  ;;  %4540 = vpow2.f32 %v4146_v31  ;;  %v2870_v51 = vadd.f32 %v6989_v50, %v2800_v14  ;;  %v4151_v35 = vmul.f32 -1.442695, %v2866_v12  ;;  %v2803_v54 = vmul.f32 %v6987_v30, %v8607_v4  ;;  %v8609_v12 = vld [vmem:[#allocation64_spill] sm:$0xff] }
 0x338   :  { %v7074_v46 = vpop.eup %4522  ;;  %4542 = vpow2.f32 %v4147_v52  ;;  %v2871_v1 = vadd.f32 %v6989_v50, %v2801_v23  ;;  %v4152_v15 = vmul.f32 -1.442695, %v2867_v5  ;;  %v2804_v21 = vmul.f32 %v6987_v30, %v8608_v9 }
 0x339   :  { %v7079_v60 = vpop.eup %4524  ;;  %4544 = vpow2.f32 %v4148_v59  ;;  %v2872_v40 = vadd.f32 %v6989_v50, %v2802_v32  ;;  %v4153_v14 = vmul.f32 -1.442695, %v2868_v18  ;;  %v2805_v17 = vmul.f32 %v6987_v30, %v8609_v12 }
 0x33a   :  { %v7084_v31 = vpop.eup %4526  ;;  %4546 = vpow2.f32 %v4149_v36  ;;  %v2873_v4 = vadd.f32 %v6989_v50, %v2803_v54  ;;  %v4154_v23 = vmul.f32 -1.442695, %v2869_v47  ;;  %v2806_v5 = vmul.f32 %v6987_v30, %v6095_v39 }
 0x33b   :  { %v7089_v52 = vpop.eup %4528  ;;  %4548 = vpow2.f32 %v4150_v43  ;;  %v2874_v9 = vadd.f32 %v6989_v50, %v2804_v21  ;;  %v4155_v32 = vmul.f32 -1.442695, %v2870_v51  ;;  %v2807_v18 = vmul.f32 %v6987_v30, %v6235_v7 }
 0x33c   :  { %v7094_v59 = vpop.eup %4530  ;;  %4550 = vpow2.f32 %v4151_v35  ;;  %v2875_v12 = vadd.f32 %v6989_v50, %v2805_v17  ;;  %v4156_v54 = vmul.f32 -1.442695, %v2871_v1  ;;  %v2808_v47 = vmul.f32 %v6987_v30, %v6237_v48 }
 0x33d   :  { %v7099_v36 = vpop.eup %4532  ;;  %4552 = vpow2.f32 %v4152_v15  ;;  %v2876_v39 = vadd.f32 %v6989_v50, %v2806_v5  ;;  %v4157_v21 = vmul.f32 -1.442695, %v2872_v40  ;;  %v2809_v51 = vmul.f32 %v6987_v30, %v6142_v20 }
 0x33e   :  { %v7104_v43 = vpop.eup %4534  ;;  %4554 = vpow2.f32 %v4153_v14  ;;  %v2877_v7 = vadd.f32 %v6989_v50, %v2807_v18  ;;  %v4158_v17 = vmul.f32 -1.442695, %v2873_v4  ;;  %v2810_v1 = vmul.f32 %v6987_v30, %v6144_v62 }
 0x33f   :  { %v7109_v35 = vpop.eup %4536  ;;  %4556 = vpow2.f32 %v4154_v23  ;;  %v2878_v48 = vadd.f32 %v6989_v50, %v2808_v47  ;;  %v4159_v5 = vmul.f32 -1.442695, %v2874_v9  ;;  %v2811_v40 = vmul.f32 %v6987_v30, %v6207_v34 }
 0x340   :  { %v7114_v15 = vpop.eup %4538  ;;  %4558 = vpow2.f32 %v4155_v32  ;;  %v2879_v20 = vadd.f32 %v6989_v50, %v2809_v51  ;;  %v4160_v18 = vmul.f32 -1.442695, %v2875_v12  ;;  %v2812_v4 = vmul.f32 %v6987_v30, %v6209_v13 }
 0x341   :  { %v7119_v14 = vpop.eup %4540  ;;  %4560 = vpow2.f32 %v4156_v54  ;;  %v2880_v62 = vadd.f32 %v6989_v50, %v2810_v1  ;;  %v4161_v47 = vmul.f32 -1.442695, %v2876_v39  ;;  %v2813_v9 = vmul.f32 %v6987_v30, %v6341_v42 }
 0x342   :  { %v7124_v23 = vpop.eup %4542  ;;  %4562 = vpow2.f32 %v4157_v21  ;;  %v2881_v34 = vadd.f32 %v6989_v50, %v2811_v40  ;;  %v4162_v51 = vmul.f32 -1.442695, %v2877_v7  ;;  %v2814_v12 = vmul.f32 %v6987_v30, %v6336_v33 }
 0x343   :  { %v7129_v32 = vpop.eup %4544  ;;  %4564 = vpow2.f32 %v4158_v17  ;;  %v2882_v13 = vadd.f32 %v6989_v50, %v2812_v4  ;;  %v4163_v1 = vmul.f32 -1.442695, %v2878_v48  ;;  %v2815_v39 = vmul.f32 %v6987_v30, %v6399_v6 }
 0x344   :  { %v7134_v54 = vpop.eup %4546  ;;  %4566 = vpow2.f32 %v4159_v5  ;;  %v2883_v42 = vadd.f32 %v6989_v50, %v2813_v9  ;;  %v4164_v40 = vmul.f32 -1.442695, %v2879_v20  ;;  %v2816_v7 = vmul.f32 %v6987_v30, %v6401_v38 }
 0x345   :  { %v7139_v21 = vpop.eup %4548  ;;  %4568 = vpow2.f32 %v4160_v18  ;;  %v2884_v33 = vadd.f32 %v6989_v50, %v2814_v12  ;;  %v4165_v4 = vmul.f32 -1.442695, %v2880_v62  ;;  %v2817_v48 = vmul.f32 %v6987_v30, %v6449_v26 }
 0x346   :  { %v7144_v17 = vpop.eup %4550  ;;  %4570 = vpow2.f32 %v4161_v47  ;;  %v2885_v6 = vadd.f32 %v6989_v50, %v2815_v39  ;;  %v4166_v9 = vmul.f32 -1.442695, %v2881_v34  ;;  %v2818_v20 = vmul.f32 %v6987_v30, %v6444_v29 }
 0x347   :  { %v7149_v5 = vpop.eup %4552  ;;  %4572 = vpow2.f32 %v4162_v51  ;;  %v2886_v38 = vadd.f32 %v6989_v50, %v2816_v7  ;;  %v4167_v12 = vmul.f32 -1.442695, %v2882_v13  ;;  %v2819_v62 = vmul.f32 %v6987_v30, %v6499_v44 }
 0x348   :  { %v7154_v18 = vpop.eup %4554  ;;  %4574 = vpow2.f32 %v4163_v1  ;;  %v2887_v26 = vadd.f32 %v6989_v50, %v2817_v48  ;;  %v4168_v39 = vmul.f32 -1.442695, %v2883_v42  ;;  %v2820_v34 = vmul.f32 %v6987_v30, %v6501_v11 }
 0x349   :  { %v7159_v47 = vpop.eup %4556  ;;  %4576 = vpow2.f32 %v4164_v40  ;;  %v2888_v29 = vadd.f32 %v6989_v50, %v2818_v20  ;;  %v4169_v7 = vmul.f32 -1.442695, %v2884_v33  ;;  %v2821_v13 = vmul.f32 %v6987_v30, %v6544_v25  ;;  %v8610_v33 = vld [vmem:[#allocation56_spill] sm:$0xff] }
 0x34a   :  { %v7164_v51 = vpop.eup %4558  ;;  %4578 = vpow2.f32 %v4165_v4  ;;  %v2889_v44 = vadd.f32 %v6989_v50, %v2819_v62  ;;  %v4170_v48 = vmul.f32 -1.442695, %v2885_v6  ;;  %v2822_v42 = vmul.f32 %v6987_v30, %v6539_v41  ;;  %v8611_v6 = vld [vmem:[#allocation57_spill] sm:$0xff] }
 0x34b   :  { %v7169_v1 = vpop.eup %4560  ;;  %4580 = vpow2.f32 %v4166_v9  ;;  %v2890_v11 = vadd.f32 %v6989_v50, %v2820_v34  ;;  %v4171_v20 = vmul.f32 -1.442695, %v2886_v38  ;;  %v2823_v10 = vmul.f32 %v6987_v30, %v8610_v33  ;;  %v8612_v38 = vld [vmem:[#allocation84_spill] sm:$0xff] }
 0x34c   :  { %v7174_v40 = vpop.eup %4562  ;;  %4582 = vpow2.f32 %v4167_v12  ;;  %v2891_v25 = vadd.f32 %v6989_v50, %v2821_v13  ;;  %v4172_v62 = vmul.f32 -1.442695, %v2887_v26  ;;  %v2824_v28 = vmul.f32 %v6987_v30, %v8611_v6  ;;  %v8613_v26 = vld [vmem:[#allocation83_spill] sm:$0xff] }
 0x34d   :  { %v7179_v4 = vpop.eup %4564  ;;  %4584 = vpow2.f32 %v4168_v39  ;;  %v2892_v41 = vadd.f32 %v6989_v50, %v2822_v42  ;;  %v4173_v34 = vmul.f32 -1.442695, %v2888_v29  ;;  %v2825_v45 = vmul.f32 %v6987_v30, %v8612_v38 }
 0x34e   :  { %v7184_v9 = vpop.eup %4566  ;;  %4586 = vpow2.f32 %v4169_v7  ;;  %v2893_v33 = vadd.f32 %v6989_v50, %v2823_v10  ;;  %v4174_v13 = vmul.f32 -1.442695, %v2889_v44  ;;  %v2826_v27 = vmul.f32 %v6987_v30, %v8613_v26 }
 0x34f   :  { %v7189_v12 = vpop.eup %4568  ;;  %4588 = vpow2.f32 %v4170_v48  ;;  %v2894_v6 = vadd.f32 %v6989_v50, %v2824_v28  ;;  %v4175_v42 = vmul.f32 -1.442695, %v2890_v11  ;;  %v2827_v29 = vmul.f32 %v6987_v30, %v6683_v2  ;;  %v8614_v11 = vld [vmem:[#allocation86_spill] sm:$0xff] }
 0x350   :  { %v7194_v39 = vpop.eup %4570  ;;  %4590 = vpow2.f32 %v4171_v20  ;;  %v2895_v38 = vadd.f32 %v6989_v50, %v2825_v45  ;;  %v4176_v10 = vmul.f32 -1.442695, %v2891_v25  ;;  %v2828_v44 = vmul.f32 %v6987_v30, %v6685_v16  ;;  %v8615_v25 = vld [vmem:[#allocation69_spill] sm:$0xff] }
 0x351   :  { %v7199_v7 = vpop.eup %4572  ;;  %4592 = vpow2.f32 %v4172_v62  ;;  %v2896_v26 = vadd.f32 %v6989_v50, %v2826_v27  ;;  %v4177_v28 = vmul.f32 -1.442695, %v2892_v41  ;;  %v2829_v19 = vmul.f32 %v6987_v30, %v8614_v11 }
 0x352   :  { %v7204_v48 = vpop.eup %4574  ;;  %4594 = vpow2.f32 %v4173_v34  ;;  %v2897_v2 = vadd.f32 %v6989_v50, %v2827_v29  ;;  %v4178_v45 = vmul.f32 -1.442695, %v2893_v33  ;;  %v2830_v55 = vmul.f32 %v6987_v30, %v8615_v25 }
 0x353   :  { %v7209_v20 = vpop.eup %4576  ;;  %4596 = vpow2.f32 %v4174_v13  ;;  %v2898_v16 = vadd.f32 %v6989_v50, %v2828_v44  ;;  %v4179_v27 = vmul.f32 -1.442695, %v2894_v6  ;;  %v2831_v41 = vmul.f32 %v6987_v30, %v6773_v53  ;;  %v8619_v6 = vld [vmem:[#allocation92_spill] sm:$0xff] }
 0x354   :  { %v7214_v62 = vpop.eup %4578  ;;  %4598 = vpow2.f32 %v4175_v42  ;;  %v2899_v11 = vadd.f32 %v6989_v50, %v2829_v19  ;;  %v4180_v29 = vmul.f32 -1.442695, %v2895_v38  ;;  %v2832_v33 = vmul.f32 %v6987_v30, %v6775_v57  ;;  %v8620_v38 = vld [vmem:[#allocation91_spill] sm:$0xff] }
 0x355   :  { %v7219_v34 = vpop.eup %4580  ;;  %4600 = vpow2.f32 %v4176_v10  ;;  %v2900_v25 = vadd.f32 %v6989_v50, %v2830_v55  ;;  %v4181_v44 = vmul.f32 -1.442695, %v2896_v26  ;;  %v2901_v53 = vadd.f32 %v6989_v50, %v2831_v41  ;;  %v8621_v26 = vld [vmem:[#allocation95_spill] sm:$0xff] }
 0x356   :  { %8616 = vst [vmem:[#allocation2_spill] sm:$0xff] %v7219_v34  ;;  %v7224_v13 = vpop.eup %4582  ;;  %4602 = vpow2.f32 %v4177_v28  ;;  %v2833_v34 = vmul.f32 %v6987_v30, %v8619_v6  ;;  %v4182_v19 = vmul.f32 -1.442695, %v2897_v2  ;;  %v2902_v57 = vadd.f32 %v6989_v50, %v2832_v33 }
 0x357   :  { %8617 = vst [vmem:[#allocation3_spill] sm:$0xff] %v7224_v13  ;;  %v7229_v42 = vpop.eup %4584  ;;  %4604 = vpow2.f32 %v4178_v45  ;;  %v2834_v13 = vmul.f32 %v6987_v30, %v8620_v38  ;;  %v4183_v55 = vmul.f32 -1.442695, %v2898_v16  ;;  %v4184_v41 = vmul.f32 -1.442695, %v2899_v11 }
 0x358   :  { %8618 = vst [vmem:[#allocation4_spill] sm:$0xff] %v7229_v42  ;;  %v7234_v10 = vpop.eup %4586  ;;  %4606 = vpow2.f32 %v4179_v27  ;;  %v2835_v42 = vmul.f32 %v6987_v30, %v8621_v26  ;;  %v2903_v6 = vadd.f32 %v6989_v50, %v2833_v34  ;;  %v2836_v2 = vmul.f32 %v6987_v30, %v6858_v22 }
 0x359   :  { %v7239_v28 = vpop.eup %4588  ;;  %4608 = vpow2.f32 %v4180_v29  ;;  %v2904_v38 = vadd.f32 %v6989_v50, %v2834_v13  ;;  %v4185_v33 = vmul.f32 -1.442695, %v2900_v25  ;;  %v2837_v16 = vmul.f32 %v6987_v30, %v6895_v24 }
 0x35a   :  { %v7244_v45 = vpop.eup %4590  ;;  %4610 = vpow2.f32 %v4181_v44  ;;  %v2905_v26 = vadd.f32 %v6989_v50, %v2835_v42  ;;  %v4186_v34 = vmul.f32 -1.442695, %v2901_v53  ;;  %v2838_v11 = vmul.f32 %v6987_v30, %v6936_v0 }
 0x35b   :  { %v7249_v27 = vpop.eup %4592  ;;  %4612 = vpow2.f32 %v4182_v19  ;;  %v2906_v22 = vadd.f32 %v6989_v50, %v2836_v2  ;;  %v4187_v13 = vmul.f32 -1.442695, %v2902_v57  ;;  %v2839_v25 = vmul.f32 %v6987_v30, %v6929_v49 }
 0x35c   :  { %v7254_v29 = vpop.eup %4594  ;;  %4614 = vpow2.f32 %v4183_v55  ;;  %v2907_v24 = vadd.f32 %v6989_v50, %v2837_v16  ;;  %v4188_v42 = vmul.f32 -1.442695, %v2903_v6  ;;  %v2840_v53 = vmul.f32 %v6987_v30, %v6948_v56 }
 0x35d   :  { %v7259_v44 = vpop.eup %4596  ;;  %4616 = vpow2.f32 %v4184_v41  ;;  %v2908_v0 = vadd.f32 %v6989_v50, %v2838_v11  ;;  %v4189_v2 = vmul.f32 -1.442695, %v2904_v38  ;;  %v2909_v57 = vadd.f32 %v6989_v50, %v2839_v25 }
 0x35e   :  { %8622 = vst [vmem:[#allocation5_spill] sm:$0xff] %v7259_v44  ;;  %v7264_v19 = vpop.eup %4598  ;;  %4618 = vpow2.f32 %v4185_v33  ;;  %v4190_v44 = vmul.f32 -1.442695, %v2905_v26  ;;  %v2910_v41 = vadd.f32 %v6989_v50, %v2840_v53  ;;  %v4191_v6 = vmul.f32 -1.442695, %v2906_v22 }
 0x35f   :  { %8623 = vst [vmem:[#allocation8_spill] sm:$0xff] %v7264_v19  ;;  %v7269_v55 = vpop.eup %4600  ;;  %4620 = vpow2.f32 %v4186_v34  ;;  %v4192_v56 = vmul.f32 -1.442695, %v2907_v24  ;;  %v4193_v38 = vmul.f32 -1.442695, %v2908_v0  ;;  %v3103_v22 = vadd.f32 1.0, %v7049_v3 }
 0x360   :  { %v7272_v49 = vpop.eup %4602  ;;  %4622 = vpow2.f32 %v4187_v13  ;;  %v4194_v11 = vmul.f32 -1.442695, %v2909_v57  ;;  %v4195_v26 = vmul.f32 -1.442695, %v2910_v41  ;;  %v3104_v24 = vadd.f32 1.0, %v7054_v63 }
 0x361   :  { %v7275_v16 = vpop.eup %4604  ;;  %4624 = vpow2.f32 %v4188_v42  ;;  %v3106_v0 = vadd.f32 1.0, %v7064_v58  ;;  %v3107_v57 = vadd.f32 1.0, %v7069_v61  ;;  %v926_v41 = vand.u32 63, %v5320_v8 }
 0x362   :  { %v7277_v19 = vpop.eup %4606  ;;  %4626 = vpow2.f32 %v4189_v2  ;;  %v3108_v63 = vadd.f32 1.0, %v7074_v46  ;;  %v3110_v58 = vadd.f32 1.0, %v7084_v31  ;;  %v3111_v61 = vadd.f32 1.0, %v7089_v52 }
 0x363   :  { %v7279_v33 = vpop.eup %4608  ;;  %4628 = vpow2.f32 %v4190_v44  ;;  %v3105_v44 = vadd.f32 1.0, %v7059_v37  ;;  %v3109_v37 = vadd.f32 1.0, %v7079_v60  ;;  %vm934_vm4 = vcmp.lt.s32.totalorder %v926_v41, 32 }
 0x364   :  { %v7281_v34 = vpop.eup %4610  ;;  %4630 = vpow2.f32 %v4191_v6  ;;  %v3112_v8 = vadd.f32 1.0, %v7094_v59  ;;  %v3113_v60 = vadd.f32 1.0, %v7099_v36  ;;  %v3114_v31 = vadd.f32 1.0, %v7104_v43 }
 0x365   :  { %v7283_v25 = vpop.eup %4612  ;;  %4632 = vpow2.f32 %v4192_v56  ;;  %v5025_v52 = vmov 0.0   ;;  %v3118_v43 = vadd.f32 1.0, %v7124_v23  ;;  %v3121_v23 = vadd.f32 1.0, %v7139_v21 }
 0x366   :  { %v7286_v13 = vpop.eup %4614  ;;  %4634 = vpow2.f32 %v4193_v38  ;;  %v3123_v21 = vadd.f32 1.0, %v7149_v5  ;;  %v3125_v5 = vadd.f32 1.0, %v7159_v47  ;;  %v3127_v47 = vadd.f32 1.0, %v7169_v1 }
 0x367   :  { %v7289_v42 = vpop.eup %4616  ;;  %4636 = vpow2.f32 %v4194_v11  ;;  %v3129_v1 = vadd.f32 1.0, %v7179_v4  ;;  %v3131_v4 = vadd.f32 1.0, %v7189_v12  ;;  %v3133_v12 = vadd.f32 1.0, %v7199_v7 }
 0x368   :  { %v7292_v53 = vpop.eup %4618  ;;  %4638 = vpow2.f32 %v4195_v26  ;;  %v3135_v7 = vadd.f32 1.0, %v7209_v20 }
 0x369   :  { %v7295_v2 = vpop.eup %4620  ;;  %4640 = vrcp.f32 %v3103_v22 }
 0x36a   :  { %v7298_v3 = vpop.eup %4622  ;;  %4642 = vrcp.f32 %v3104_v24  ;;  %v7322_v24 = vsel %vm934_vm4, 0.5, %v5025_v52 }
 0x36b   :  { %v7302_v6 = vpop.eup %4624  ;;  %4644 = vrcp.f32 %v3105_v44  ;;  %v3115_v44 = vadd.f32 1.0, %v7109_v35 }
 0x36c   :  { %v7305_v56 = vpop.eup %4626  ;;  %4646 = vrcp.f32 %v3106_v0  ;;  %v3116_v0 = vadd.f32 1.0, %v7114_v15  ;;  %v3120_v15 = vadd.f32 1.0, %v7134_v54  ;;  %v3122_v54 = vadd.f32 1.0, %v7144_v17 }
 0x36d   :  { %v7308_v38 = vpop.eup %4628  ;;  %4648 = vrcp.f32 %v3107_v57  ;;  %v3117_v57 = vadd.f32 1.0, %v7119_v14  ;;  %v3124_v17 = vadd.f32 1.0, %v7154_v18  ;;  %v3126_v18 = vadd.f32 1.0, %v7164_v51 }
 0x36e   :  { %v7311_v11 = vpop.eup %4630  ;;  %4650 = vrcp.f32 %v3108_v63  ;;  %v3128_v51 = vadd.f32 1.0, %v7174_v40  ;;  %v3130_v40 = vadd.f32 1.0, %v7184_v9  ;;  %v3132_v9 = vadd.f32 1.0, %v7194_v39 }
 0x36f   :  { %v7314_v46 = vpop.eup %4632  ;;  %4652 = vrcp.f32 %v3109_v37  ;;  %v3134_v39 = vadd.f32 1.0, %v7204_v48  ;;  %v3136_v48 = vadd.f32 1.0, %v7214_v62 }
 0x370   :  { %v7317_v26 = vpop.eup %4634  ;;  %4654 = vrcp.f32 %v3110_v58  ;;  %v3119_v58 = vadd.f32 1.0, %v7129_v32 }
 0x371   :  { %v7320_v22 = vpop.eup %4636  ;;  %4656 = vrcp.f32 %v3111_v61 }
 0x372   :  { %v7325_v59 = vpop.eup %4638  ;;  %4658 = vrcp.f32 %v3112_v8 }
 0x373   :  { %v4641_v36 = vpop.eup %4640  ;;  %4660 = vrcp.f32 %v3113_v60 }
 0x374   :  { %v4643_v41 = vpop.eup %4642  ;;  %4662 = vrcp.f32 %v3114_v31  ;;  %v3295_v63 = vmax.f32 %v4641_v36, %v7322_v24 }
 0x375   :  { %v4645_v37 = vpop.eup %4644  ;;  %4664 = vrcp.f32 %v3115_v44  ;;  %v3296_v35 = vmax.f32 %v4643_v41, %v7322_v24 }
 0x376   :  { %v4647_v61 = vpop.eup %4646  ;;  %4666 = vrcp.f32 %v3116_v0  ;;  %v3297_v8 = vmax.f32 %v4645_v37, %v7322_v24  ;;  %3359 = vst [vmem:[%s8341_s4] sm:$0xff] %v3295_v63 }
 0x377   :  { %v4649_v14 = vpop.eup %4648  ;;  %4668 = vrcp.f32 %v3117_v57  ;;  %v3298_v60 = vmax.f32 %v4647_v61, %v7322_v24  ;;  %3360 = vst [vmem:[%s8341_s4 + $0x8] sm:$0xff] %v3296_v35 }
 0x378   :  { %v4651_v32 = vpop.eup %4650  ;;  %4670 = vrcp.f32 %v3118_v43  ;;  %v3299_v31 = vmax.f32 %v4649_v14, %v7322_v24  ;;  %3361 = vst [vmem:[%s8341_s4 + $0x10] sm:$0xff] %v3297_v8 }
 0x379   :  { %v4653_v52 = vpop.eup %4652  ;;  %4672 = vrcp.f32 %v3119_v58  ;;  %v3300_v44 = vmax.f32 %v4651_v32, %v7322_v24  ;;  %3362 = vst [vmem:[%s8341_s4 + $0x18] sm:$0xff] %v3298_v60 }
 0x37a   :  { %v4655_v0 = vpop.eup %4654  ;;  %4674 = vrcp.f32 %v3120_v15  ;;  %v3301_v36 = vmax.f32 %v4653_v52, %v7322_v24  ;;  %3363 = vst [vmem:[%s8341_s4 + $0x20] sm:$0xff] %v3299_v31 }
 0x37b   :  { %v4657_v57 = vpop.eup %4656  ;;  %4676 = vrcp.f32 %v3121_v23  ;;  %v3302_v41 = vmax.f32 %v4655_v0, %v7322_v24  ;;  %3364 = vst [vmem:[%s8341_s4 + $0x28] sm:$0xff] %v3300_v44 }
 0x37c   :  { %v4659_v43 = vpop.eup %4658  ;;  %4678 = vrcp.f32 %v3122_v54  ;;  %v3303_v63 = vmax.f32 %v4657_v57, %v7322_v24  ;;  %3365 = vst [vmem:[%s8341_s4 + $0x30] sm:$0xff] %v3301_v36 }
 0x37d   :  { %v4661_v37 = vpop.eup %4660  ;;  %4680 = vrcp.f32 %v3123_v21  ;;  %v3304_v58 = vmax.f32 %v4659_v43, %v7322_v24  ;;  %3366 = vst [vmem:[%s8341_s4 + $0x38] sm:$0xff] %v3302_v41  ;;  %v8624_v43 = vld [vmem:[#allocation2_spill] sm:$0xff] }
 0x37e   :  { %v4663_v35 = vpop.eup %4662  ;;  %4682 = vrcp.f32 %v3124_v17  ;;  %v3305_v61 = vmax.f32 %v4661_v37, %v7322_v24  ;;  %3367 = vst [vmem:[%s8341_s4 + $0x40] sm:$0xff] %v3303_v63  ;;  %v3137_v20 = vadd.f32 1.0, %v8624_v43  ;;  %v8625_v37 = vld [vmem:[#allocation3_spill] sm:$0xff] }
 0x37f   :  { %v4665_v15 = vpop.eup %4664  ;;  %4684 = vrcp.f32 %v3125_v5  ;;  %v3306_v8 = vmax.f32 %v4663_v35, %v7322_v24  ;;  %3368 = vst [vmem:[%s8341_s4 + $0x48] sm:$0xff] %v3304_v58  ;;  %v3138_v62 = vadd.f32 1.0, %v8625_v37  ;;  %v8626_v35 = vld [vmem:[#allocation4_spill] sm:$0xff]  ;;  %v3147_v37 = vadd.f32 1.0, %v7269_v55  ;;  %v8635_v55 = vld [vmem:[#allocation18_spill] sm:$0xff] }
 0x380   :  { %v4667_v14 = vpop.eup %4666  ;;  %4686 = vrcp.f32 %v3126_v18  ;;  %v3307_v23 = vmax.f32 %v4665_v15, %v7322_v24  ;;  %3369 = vst [vmem:[%s8341_s4 + $0x50] sm:$0xff] %v3305_v61 }
 0x381   :  { %v4669_v60 = vpop.eup %4668  ;;  %4688 = vrcp.f32 %v3127_v47  ;;  %v3308_v32 = vmax.f32 %v4667_v14, %v7322_v24  ;;  %3370 = vst [vmem:[%s8341_s4 + $0x58] sm:$0xff] %v3306_v8 }
 0x382   :  { %v4671_v54 = vpop.eup %4670  ;;  %4690 = vrcp.f32 %v3128_v51  ;;  %v3309_v31 = vmax.f32 %v4669_v60, %v7322_v24  ;;  %3371 = vst [vmem:[%s8341_s4 + $0x60] sm:$0xff] %v3307_v23  ;;  %v3139_v51 = vadd.f32 1.0, %v8626_v35 }
 0x383   :  { %v4673_v52 = vpop.eup %4672  ;;  %4692 = vrcp.f32 %v3129_v1  ;;  %v3310_v21 = vmax.f32 %v4671_v54, %v7322_v24  ;;  %3372 = vst [vmem:[%s8341_s4 + $0x68] sm:$0xff] %v3308_v32  ;;  %v3140_v1 = vadd.f32 1.0, %v7234_v10  ;;  %v3142_v10 = vadd.f32 1.0, %v7244_v45  ;;  %v8627_v32 = vld [vmem:[#allocation6_spill] sm:$0xff]  ;;  %v8628_v45 = vld [vmem:[#allocation7_spill] sm:$0xff] }
 0x384   :  { %v4675_v44 = vpop.eup %4674  ;;  %4694 = vrcp.f32 %v3130_v40  ;;  %v3311_v0 = vmax.f32 %v4673_v52, %v7322_v24  ;;  %3373 = vst [vmem:[%s8341_s4 + $0x70] sm:$0xff] %v3309_v31  ;;  %v3141_v40 = vadd.f32 1.0, %v7239_v28  ;;  %v7450_v28 = vmul.f32 %v6987_v30, %v8627_v32 }
 0x385   :  { %v4677_v17 = vpop.eup %4676  ;;  %4696 = vrcp.f32 %v3131_v4  ;;  %v3312_v36 = vmax.f32 %v4675_v44, %v7322_v24  ;;  %3374 = vst [vmem:[%s8341_s4 + $0x78] sm:$0xff] %v3310_v21  ;;  %v7459_v52 = vmul.f32 %v6987_v30, %v8628_v45  ;;  %v3144_v21 = vadd.f32 1.0, %v7254_v29  ;;  %v8631_v29 = vld [vmem:[#allocation10_spill] sm:$0xff] }
 0x386   :  { %v4679_v57 = vpop.eup %4678  ;;  %4698 = vrcp.f32 %v3132_v9  ;;  %v3313_v5 = vmax.f32 %v4677_v17, %v7322_v24  ;;  %3375 = vst [vmem:[%s8341_s4 + $0x80] sm:$0xff] %v3311_v0  ;;  %v3143_v9 = vadd.f32 1.0, %v7249_v27  ;;  %v8629_v27 = vld [vmem:[#allocation11_spill] sm:$0xff]  ;;  %v8630_v17 = vld [vmem:[#allocation5_spill] sm:$0xff] }
 0x387   :  { %v4681_v41 = vpop.eup %4680  ;;  %4700 = vrcp.f32 %v3133_v12  ;;  %v3314_v18 = vmax.f32 %v4679_v57, %v7322_v24  ;;  %3376 = vst [vmem:[%s8341_s4 + $0x88] sm:$0xff] %v3312_v36  ;;  %v7477_v57 = vmul.f32 %v6987_v30, %v8631_v29  ;;  %v3154_v29 = vadd.f32 1.0, %v7286_v13  ;;  %v8642_v13 = vld [vmem:[#allocation30_spill] sm:$0xff] }
 0x388   :  { %v4683_v63 = vpop.eup %4682  ;;  %4702 = vrcp.f32 %v3134_v39  ;;  %v3315_v47 = vmax.f32 %v4681_v41, %v7322_v24  ;;  %3377 = vst [vmem:[%s8341_s4 + $0x90] sm:$0xff] %v3313_v5  ;;  %v7468_v39 = vmul.f32 %v6987_v30, %v8629_v27  ;;  %v8632_v5 = vld [vmem:[#allocation8_spill] sm:$0xff] }
 0x389   :  { %v4685_v58 = vpop.eup %4684  ;;  %4704 = vrcp.f32 %v3135_v7  ;;  %v3316_v61 = vmax.f32 %v4683_v63, %v7322_v24  ;;  %3378 = vst [vmem:[%s8341_s4 + $0x98] sm:$0xff] %v3314_v18  ;;  %v3145_v7 = vadd.f32 1.0, %v8630_v17  ;;  %v3146_v41 = vadd.f32 1.0, %v8632_v5 }
 0x38a   :  { %v4687_v15 = vpop.eup %4686  ;;  %4706 = vrcp.f32 %v3136_v48  ;;  %v3317_v8 = vmax.f32 %v4685_v58, %v7322_v24  ;;  %3379 = vst [vmem:[%s8341_s4 + $0xa0] sm:$0xff] %v3315_v47  ;;  %v8634_v47 = vld [vmem:[#allocation15_spill] sm:$0xff] }
 0x38b   :  { %v4689_v14 = vpop.eup %4688  ;;  %4708 = vrcp.f32 %v3137_v20  ;;  %v3318_v23 = vmax.f32 %v4687_v15, %v7322_v24  ;;  %3380 = vst [vmem:[%s8341_s4 + $0xa8] sm:$0xff] %v3316_v61  ;;  %v8633_v20 = vld [vmem:[#allocation12_spill] sm:$0xff]  ;;  %v7495_v58 = vmul.f32 %v6987_v30, %v8634_v47  ;;  %v7504_v15 = vmul.f32 %v6987_v30, %v8635_v55 }
 0x38c   :  { %v4691_v60 = vpop.eup %4690  ;;  %4710 = vrcp.f32 %v3138_v62  ;;  %v3319_v4 = vmax.f32 %v4689_v14, %v7322_v24  ;;  %3381 = vst [vmem:[%s8341_s4 + $0xb0] sm:$0xff] %v3317_v8  ;;  %v7486_v18 = vmul.f32 %v6987_v30, %v8633_v20  ;;  %v3149_v8 = vadd.f32 1.0, %v7275_v16  ;;  %v8637_v16 = vld [vmem:[#allocation23_spill] sm:$0xff] }
 0x38d   :  { %v4693_v54 = vpop.eup %4692  ;;  %4712 = vrcp.f32 %v3139_v51  ;;  %v3320_v31 = vmax.f32 %v4691_v60, %v7322_v24  ;;  %3382 = vst [vmem:[%s8341_s4 + $0xb8] sm:$0xff] %v3318_v23  ;;  %v3148_v51 = vadd.f32 1.0, %v7272_v49  ;;  %v8636_v49 = vld [vmem:[#allocation19_spill] sm:$0xff]  ;;  %v3150_v60 = vadd.f32 1.0, %v7277_v19  ;;  %v8638_v19 = vld [vmem:[#allocation22_spill] sm:$0xff] }
 0x38e   :  { %v4695_v12 = vpop.eup %4694  ;;  %4714 = vrcp.f32 %v3140_v1  ;;  %v3321_v44 = vmax.f32 %v4693_v54, %v7322_v24  ;;  %3383 = vst [vmem:[%s8341_s4 + $0xc0] sm:$0xff] %v3319_v4  ;;  %v7522_v4 = vmul.f32 %v6987_v30, %v8637_v16  ;;  %v3151_v54 = vadd.f32 1.0, %v7279_v33  ;;  %v8639_v33 = vld [vmem:[#allocation26_spill] sm:$0xff] }
 0x38f   :  { %v4697_v0 = vpop.eup %4696  ;;  %4716 = vrcp.f32 %v3141_v40  ;;  %v3322_v36 = vmax.f32 %v4695_v12, %v7322_v24  ;;  %3384 = vst [vmem:[%s8341_s4 + $0xc8] sm:$0xff] %v3320_v31  ;;  %v7513_v40 = vmul.f32 %v6987_v30, %v8636_v49  ;;  %v7531_v31 = vmul.f32 %v6987_v30, %v8638_v19 }
 0x390   :  { %v4699_v48 = vpop.eup %4698  ;;  %4718 = vrcp.f32 %v3142_v10  ;;  %v3323_v43 = vmax.f32 %v4697_v0, %v7322_v24  ;;  %3385 = vst [vmem:[%s8341_s4 + $0xd0] sm:$0xff] %v3321_v44  ;;  %v3152_v12 = vadd.f32 1.0, %v7281_v34  ;;  %v7540_v44 = vmul.f32 %v6987_v30, %v8639_v33  ;;  %v8640_v34 = vld [vmem:[#allocation27_spill] sm:$0xff] }
 0x391   :  { %v4701_v63 = vpop.eup %4700  ;;  %4720 = vrcp.f32 %v3143_v9  ;;  %v3324_v62 = vmax.f32 %v4699_v48, %v7322_v24  ;;  %3386 = vst [vmem:[%s8341_s4 + $0xd8] sm:$0xff] %v3322_v36  ;;  %v3153_v0 = vadd.f32 1.0, %v7283_v25  ;;  %v8641_v25 = vld [vmem:[#allocation31_spill] sm:$0xff] }
 0x392   :  { %v4703_v35 = vpop.eup %4702  ;;  %4722 = vrcp.f32 %v3144_v21  ;;  %v3325_v61 = vmax.f32 %v4701_v63, %v7322_v24  ;;  %3387 = vst [vmem:[%s8341_s4 + $0xe0] sm:$0xff] %v3323_v43  ;;  %v7558_v5 = vmul.f32 %v6987_v30, %v8641_v25  ;;  %v3155_v43 = vadd.f32 1.0, %v7289_v42  ;;  %v8643_v42 = vld [vmem:[#allocation34_spill] sm:$0xff] }
 0x393   :  { %v4705_v1 = vpop.eup %4704  ;;  %4724 = vrcp.f32 %v3145_v7  ;;  %v3326_v14 = vmax.f32 %v4703_v35, %v7322_v24  ;;  %3388 = vst [vmem:[%s8341_s4 + $0xe8] sm:$0xff] %v3324_v62  ;;  %v7549_v7 = vmul.f32 %v6987_v30, %v8640_v34  ;;  %v7567_v63 = vmul.f32 %v6987_v30, %v8642_v13 }
 0x394   :  { %v4707_v23 = vpop.eup %4706  ;;  %4726 = vrcp.f32 %v3146_v41  ;;  %v3327_v10 = vmax.f32 %v4705_v1, %v7322_v24  ;;  %3389 = vst [vmem:[%s8341_s4 + $0xf0] sm:$0xff] %v3325_v61  ;;  %v3156_v62 = vadd.f32 1.0, %v7292_v53  ;;  %v7576_v35 = vmul.f32 %v6987_v30, %v8643_v42  ;;  %v8644_v53 = vld [vmem:[#allocation35_spill] sm:$0xff] }
 0x395   :  { %v4709_v32 = vpop.eup %4708  ;;  %4728 = vrcp.f32 %v3147_v37  ;;  %v3328_v9 = vmax.f32 %v4707_v23, %v7322_v24  ;;  %3390 = vst [vmem:[%s8341_s4 + $0xf8] sm:$0xff] %v3326_v14  ;;  %v3157_v61 = vadd.f32 1.0, %v7295_v2  ;;  %v7585_v1 = vmul.f32 %v6987_v30, %v8644_v53  ;;  %v8645_v2 = vld [vmem:[#allocation39_spill] sm:$0xff] }
 0x396   :  { %v4711_v45 = vpop.eup %4710  ;;  %4730 = vrcp.f32 %v3148_v51  ;;  %v3329_v21 = vmax.f32 %v4709_v32, %v7322_v24  ;;  %3391 = vst [vmem:[%s8341_s4 + $0x100] sm:$0xff] %v3327_v10  ;;  %v3158_v14 = vadd.f32 1.0, %v7298_v3  ;;  %v7594_v23 = vmul.f32 %v6987_v30, %v8645_v2  ;;  %v8646_v3 = vld [vmem:[#allocation38_spill] sm:$0xff] }
 0x397   :  { %v4713_v27 = vpop.eup %4712  ;;  %4732 = vrcp.f32 %v3149_v8  ;;  %v3330_v17 = vmax.f32 %v4711_v45, %v7322_v24  ;;  %3392 = vst [vmem:[%s8341_s4 + $0x108] sm:$0xff] %v3328_v9  ;;  %v3159_v10 = vadd.f32 1.0, %v7302_v6  ;;  %v7603_v32 = vmul.f32 %v6987_v30, %v8646_v3  ;;  %v8647_v6 = vld [vmem:[#allocation42_spill] sm:$0xff] }
 0x398   :  { %v4715_v36 = vpop.eup %4714  ;;  %4734 = vrcp.f32 %v3150_v60  ;;  %v3331_v48 = vmax.f32 %v4713_v27, %v7322_v24  ;;  %3393 = vst [vmem:[%s8341_s4 + $0x110] sm:$0xff] %v3329_v21  ;;  %v3160_v9 = vadd.f32 1.0, %v7305_v56  ;;  %v7612_v45 = vmul.f32 %v6987_v30, %v8647_v6  ;;  %v8648_v56 = vld [vmem:[#allocation43_spill] sm:$0xff] }
 0x399   :  { %v4717_v41 = vpop.eup %4716  ;;  %4736 = vrcp.f32 %v3151_v54  ;;  %v3332_v20 = vmax.f32 %v4715_v36, %v7322_v24  ;;  %3394 = vst [vmem:[%s8341_s4 + $0x118] sm:$0xff] %v3330_v17  ;;  %v3161_v21 = vadd.f32 1.0, %v7308_v38  ;;  %v7621_v27 = vmul.f32 %v6987_v30, %v8648_v56  ;;  %v8649_v38 = vld [vmem:[#allocation49_spill] sm:$0xff] }
 0x39a   :  { %v4719_v37 = vpop.eup %4718  ;;  %4738 = vrcp.f32 %v3152_v12  ;;  %v3333_v47 = vmax.f32 %v4717_v41, %v7322_v24  ;;  %3395 = vst [vmem:[%s8341_s4 + $0x120] sm:$0xff] %v3331_v48  ;;  %v3162_v17 = vadd.f32 1.0, %v7311_v11  ;;  %v7630_v36 = vmul.f32 %v6987_v30, %v8649_v38 }
 0x39b   :  { %v4721_v51 = vpop.eup %4720  ;;  %4740 = vrcp.f32 %v3153_v0  ;;  %v3334_v55 = vmax.f32 %v4719_v37, %v7322_v24  ;;  %3396 = vst [vmem:[%s8341_s4 + $0x128] sm:$0xff] %v3332_v20  ;;  %v3163_v48 = vadd.f32 1.0, %v7314_v46  ;;  %v3487_v11 = vadd.f32 %v7450_v28, %v6989_v50 }
 0x39c   :  { %v4723_v8 = vpop.eup %4722  ;;  %4742 = vrcp.f32 %v3154_v29  ;;  %v3335_v49 = vmax.f32 %v4721_v51, %v7322_v24  ;;  %3397 = vst [vmem:[%s8341_s4 + $0x130] sm:$0xff] %v3333_v47  ;;  %v3488_v46 = vadd.f32 %v7459_v52, %v6989_v50  ;;  %v3165_v37 = vadd.f32 1.0, %v7320_v22 }
 0x39d   :  { %v4725_v60 = vpop.eup %4724  ;;  %4744 = vrcp.f32 %v3155_v43  ;;  %v3336_v16 = vmax.f32 %v4723_v8, %v7322_v24  ;;  %3398 = vst [vmem:[%s8341_s4 + $0x138] sm:$0xff] %v3334_v55  ;;  %v3164_v43 = vadd.f32 1.0, %v7317_v26  ;;  %v3489_v26 = vadd.f32 %v7468_v39, %v6989_v50 }
 0x39e   :  { %v4727_v54 = vpop.eup %4726  ;;  %4746 = vrcp.f32 %v3156_v62  ;;  %v3337_v19 = vmax.f32 %v4725_v60, %v7322_v24  ;;  %3399 = vst [vmem:[%s8341_s4 + $0x140] sm:$0xff] %v3335_v49  ;;  %v3166_v47 = vadd.f32 1.0, %v7325_v59  ;;  %v3490_v22 = vadd.f32 %v7477_v57, %v6989_v50 }
 0x39f   :  { %v4729_v12 = vpop.eup %4728  ;;  %4748 = vrcp.f32 %v3157_v61  ;;  %v3338_v33 = vmax.f32 %v4727_v54, %v7322_v24  ;;  %3400 = vst [vmem:[%s8341_s4 + $0x148] sm:$0xff] %v3336_v16  ;;  %v3491_v59 = vadd.f32 %v7486_v18, %v6989_v50  ;;  %v4196_v39 = vmul.f32 -1.442695, %v3487_v11 }
 0x3a0   :  { %v4731_v0 = vpop.eup %4730  ;;  %4750 = vrcp.f32 %v3158_v14  ;;  %v3339_v34 = vmax.f32 %v4729_v12, %v7322_v24  ;;  %3401 = vst [vmem:[%s8341_s4 + $0x150] sm:$0xff] %v3337_v19  ;;  %v3492_v57 = vadd.f32 %v7495_v58, %v6989_v50  ;;  %v4197_v53 = vmul.f32 -1.442695, %v3488_v46 }
 0x3a1   :  { %v4733_v29 = vpop.eup %4732  ;;  %4752 = vrcp.f32 %v3159_v10  ;;  %v3340_v25 = vmax.f32 %v4731_v0, %v7322_v24  ;;  %3402 = vst [vmem:[%s8341_s4 + $0x158] sm:$0xff] %v3338_v33  ;;  %v3493_v18 = vadd.f32 %v7504_v15, %v6989_v50  ;;  %v4198_v49 = vmul.f32 -1.442695, %v3489_v26 }
 0x3a2   :  { %v4735_v41 = vpop.eup %4734  ;;  %4754 = vrcp.f32 %v3160_v9  ;;  %v3341_v20 = vmax.f32 %v4733_v29, %v7322_v24  ;;  %3403 = vst [vmem:[%s8341_s4 + $0x160] sm:$0xff] %v3339_v34  ;;  %v3494_v58 = vadd.f32 %v7513_v40, %v6989_v50  ;;  %v4199_v10 = vmul.f32 -1.442695, %v3490_v22 }
 0x3a3   :  { %v4737_v13 = vpop.eup %4736  ;;  %4756 = vrcp.f32 %v3161_v21  ;;  %v3342_v62 = vmax.f32 %v4735_v41, %v7322_v24  ;;  %3404 = vst [vmem:[%s8341_s4 + $0x168] sm:$0xff] %v3340_v25  ;;  %v3495_v15 = vadd.f32 %v7522_v4, %v6989_v50  ;;  %v4200_v54 = vmul.f32 -1.442695, %v3491_v59 }
 0x3a4   :  { %v4739_v28 = vpop.eup %4738  ;;  %4758 = vrcp.f32 %v3162_v17  ;;  %v3343_v42 = vmax.f32 %v4737_v13, %v7322_v24  ;;  %3405 = vst [vmem:[%s8341_s4 + $0x170] sm:$0xff] %v3341_v20  ;;  %v3496_v40 = vadd.f32 %v7531_v31, %v6989_v50  ;;  %v4201_v6 = vmul.f32 -1.442695, %v3492_v57 }
 0x3a5   :  { %v4741_v52 = vpop.eup %4740  ;;  %4760 = vrcp.f32 %v3163_v48  ;;  %v3344_v51 = vmax.f32 %v4739_v28, %v7322_v24  ;;  %3406 = vst [vmem:[%s8341_s4 + $0x178] sm:$0xff] %v3342_v62  ;;  %v3497_v4 = vadd.f32 %v7540_v44, %v6989_v50  ;;  %v4202_v33 = vmul.f32 -1.442695, %v3493_v18 }
 0x3a6   :  { %v4743_v61 = vpop.eup %4742  ;;  %4762 = vrcp.f32 %v3164_v43  ;;  %v3345_v55 = vmax.f32 %v4741_v52, %v7322_v24  ;;  %3407 = vst [vmem:[%s8341_s4 + $0x180] sm:$0xff] %v3343_v42  ;;  %v3498_v31 = vadd.f32 %v7549_v7, %v6989_v50  ;;  %v4203_v17 = vmul.f32 -1.442695, %v3494_v58 }
 0x3a7   :  { %v4745_v8 = vpop.eup %4744  ;;  %4764 = vrcp.f32 %v3165_v37  ;;  %v3346_v14 = vmax.f32 %v4743_v61, %v7322_v24  ;;  %3408 = vst [vmem:[%s8341_s4 + $0x188] sm:$0xff] %v3344_v51  ;;  %v3499_v44 = vadd.f32 %v7558_v5, %v6989_v50  ;;  %v4204_v29 = vmul.f32 -1.442695, %v3495_v15 }
 0x3a8   :  { %v4747_v2 = vpop.eup %4746  ;;  %4766 = vrcp.f32 %v3166_v47  ;;  %v3347_v60 = vmax.f32 %v4745_v8, %v7322_v24  ;;  %3409 = vst [vmem:[%s8341_s4 + $0x190] sm:$0xff] %v3345_v55  ;;  %v3500_v7 = vadd.f32 %v7567_v63, %v6989_v50  ;;  %v4205_v11 = vmul.f32 -1.442695, %v3496_v40 }
 0x3a9   :  { %v4749_v16 = vpop.eup %4748  ;;  %v3348_v3 = vmax.f32 %v4747_v2, %v7322_v24  ;;  %3410 = vst [vmem:[%s8341_s4 + $0x198] sm:$0xff] %v3346_v14  ;;  %4768 = vpow2.f32 %v4196_v39  ;;  %v3501_v5 = vadd.f32 %v7576_v35, %v6989_v50  ;;  %v4206_v20 = vmul.f32 -1.442695, %v3497_v4  ;;  %v8652_v2 = vld [vmem:[#allocation55_spill] sm:$0xff] }
 0x3aa   :  { %v4751_v9 = vpop.eup %4750  ;;  %v3349_v19 = vmax.f32 %v4749_v16, %v7322_v24  ;;  %3411 = vst [vmem:[%s8341_s4 + $0x1a0] sm:$0xff] %v3347_v60  ;;  %4770 = vpow2.f32 %v4197_v53  ;;  %v3502_v63 = vadd.f32 %v7585_v1, %v6989_v50  ;;  %v4207_v37 = vmul.f32 -1.442695, %v3498_v31  ;;  %v8653_v16 = vld [vmem:[#allocation61_spill] sm:$0xff]  ;;  %v8656_v31 = vld [vmem:[#allocation66_spill] sm:$0xff] }
 0x3ab   :  { %v4753_v12 = vpop.eup %4752  ;;  %v3350_v21 = vmax.f32 %v4751_v9, %v7322_v24  ;;  %3412 = vst [vmem:[%s8341_s4 + $0x1a8] sm:$0xff] %v3348_v3  ;;  %4772 = vpow2.f32 %v4198_v49  ;;  %v3503_v35 = vadd.f32 %v7594_v23, %v6989_v50  ;;  %v4208_v28 = vmul.f32 -1.442695, %v3499_v44  ;;  %v8654_v9 = vld [vmem:[#allocation60_spill] sm:$0xff] }
 0x3ac   :  { %v4755_v56 = vpop.eup %4754  ;;  %v3351_v0 = vmax.f32 %v4753_v12, %v7322_v24  ;;  %3413 = vst [vmem:[%s8341_s4 + $0x1b0] sm:$0xff] %v3349_v19  ;;  %4774 = vpow2.f32 %v4199_v10  ;;  %v3504_v1 = vadd.f32 %v7603_v32, %v6989_v50  ;;  %v4209_v22 = vmul.f32 -1.442695, %v3500_v7  ;;  %v8650_v32 = vld [vmem:[#allocation48_spill] sm:$0xff] }
 0x3ad   :  { %v4757_v34 = vpop.eup %4756  ;;  %v3352_v38 = vmax.f32 %v4755_v56, %v7322_v24  ;;  %3414 = vst [vmem:[%s8341_s4 + $0x1b8] sm:$0xff] %v3350_v21  ;;  %4776 = vpow2.f32 %v4200_v54  ;;  %v3505_v23 = vadd.f32 %v7612_v45, %v6989_v50  ;;  %v4210_v59 = vmul.f32 -1.442695, %v3501_v5  ;;  %v8651_v45 = vld [vmem:[#allocation54_spill] sm:$0xff]  ;;  %v8655_v21 = vld [vmem:[#allocation65_spill] sm:$0xff] }
 0x3ae   :  { %v4759_v48 = vpop.eup %4758  ;;  %v3353_v25 = vmax.f32 %v4757_v34, %v7322_v24  ;;  %3415 = vst [vmem:[%s8341_s4 + $0x1c0] sm:$0xff] %v3351_v0  ;;  %4778 = vpow2.f32 %v4201_v6  ;;  %v3444_v61 = vmul.f32 %v6987_v30, %v8650_v32  ;;  %v3506_v55 = vadd.f32 %v7621_v27, %v6989_v50 }
 0x3af   :  { %v4761_v41 = vpop.eup %4760  ;;  %v3354_v43 = vmax.f32 %v4759_v48, %v7322_v24  ;;  %3416 = vst [vmem:[%s8341_s4 + $0x1c8] sm:$0xff] %v3352_v38  ;;  %4780 = vpow2.f32 %v4202_v33  ;;  %v4211_v57 = vmul.f32 -1.442695, %v3502_v63  ;;  %v3445_v8 = vmul.f32 %v6987_v30, %v8651_v45 }
 0x3b0   :  { %v4763_v46 = vpop.eup %4762  ;;  %v3355_v13 = vmax.f32 %v4761_v41, %v7322_v24  ;;  %3417 = vst [vmem:[%s8341_s4 + $0x1d0] sm:$0xff] %v3353_v25  ;;  %4782 = vpow2.f32 %v4203_v17  ;;  %v3507_v14 = vadd.f32 %v7630_v36, %v6989_v50  ;;  %v4212_v18 = vmul.f32 -1.442695, %v3503_v35  ;;  %v8658_v41 = vld [vmem:[#allocation73_spill] sm:$0xff]  ;;  %v8660_v35 = vld [vmem:[#allocation75_spill] sm:$0xff] }
 0x3b1   :  { %v4765_v62 = vpop.eup %4764  ;;  %v3356_v26 = vmax.f32 %v4763_v46, %v7322_v24  ;;  %3418 = vst [vmem:[%s8341_s4 + $0x1d8] sm:$0xff] %v3354_v43  ;;  %4784 = vpow2.f32 %v4204_v29  ;;  %v3446_v27 = vmul.f32 %v6987_v30, %v8652_v2  ;;  %v3508_v60 = vadd.f32 %v3444_v61, %v6989_v50  ;;  %v8657_v29 = vld [vmem:[#allocation72_spill] sm:$0xff]  ;;  %v8662_v61 = vld [vmem:[#allocation70_spill] sm:$0xff] }
 0x3b2   :  { %v4767_v47 = vpop.eup %4766  ;;  %v3357_v42 = vmax.f32 %v4765_v62, %v7322_v24  ;;  %3419 = vst [vmem:[%s8341_s4 + $0x1e0] sm:$0xff] %v3355_v13  ;;  %4786 = vpow2.f32 %v4205_v11  ;;  %v4213_v58 = vmul.f32 -1.442695, %v3504_v1  ;;  %v3447_v3 = vmul.f32 %v6987_v30, %v8653_v16  ;;  %v8659_v13 = vld [vmem:[#allocation74_spill] sm:$0xff] }
 0x3b3   :  { %v7744_v52 = vpop.eup %4768  ;;  %v3358_v51 = vmax.f32 %v4767_v47, %v7322_v24  ;;  %3420 = vst [vmem:[%s8341_s4 + $0x1e8] sm:$0xff] %v3356_v26  ;;  %4788 = vpow2.f32 %v4206_v20  ;;  %v3509_v15 = vadd.f32 %v3445_v8, %v6989_v50  ;;  %v4214_v36 = vmul.f32 -1.442695, %v3505_v23 }
 0x3b4   :  { %v7752_v39 = vpop.eup %4770  ;;  %3421 = vst [vmem:[%s8341_s4 + $0x1f0] sm:$0xff] %v3357_v42  ;;  %4790 = vpow2.f32 %v4207_v37  ;;  %v3448_v19 = vmul.f32 %v6987_v30, %v8654_v9  ;;  %v3510_v40 = vadd.f32 %v3446_v27, %v6989_v50  ;;  %v4215_v6 = vmul.f32 -1.442695, %v3506_v55  ;;  %v8665_v9 = vld [vmem:[#allocation78_spill] sm:$0xff] }
 0x3b5   :  { %v7761_v53 = vpop.eup %4772  ;;  %3422 = vst [vmem:[%s8341_s4 + $0x1f8] sm:$0xff] %v3358_v51  ;;  %4792 = vpow2.f32 %v4208_v28  ;;  %v3449_v4 = vmul.f32 %v6987_v30, %v8655_v21  ;;  %v3511_v33 = vadd.f32 %v3447_v3, %v6989_v50  ;;  %v4216_v56 = vmul.f32 -1.442695, %v3507_v14  ;;  %v8663_v14 = vld [vmem:[#allocation77_spill] sm:$0xff] }
 0x3b6   :  { %v7770_v49 = vpop.eup %4774  ;;  %4794 = vpow2.f32 %v4209_v22  ;;  %v3450_v17 = vmul.f32 %v6987_v30, %v8656_v31  ;;  %v3512_v34 = vadd.f32 %v3448_v19, %v6989_v50  ;;  %v4217_v38 = vmul.f32 -1.442695, %v3508_v60  ;;  %v8661_v22 = vld [vmem:[#allocation71_spill] sm:$0xff] }
 0x3b7   :  { %v7775_v10 = vpop.eup %4776  ;;  %4796 = vpow2.f32 %v4210_v59  ;;  %v3451_v48 = vmul.f32 %v6987_v30, %v8657_v29  ;;  %v3513_v25 = vadd.f32 %v3449_v4, %v6989_v50  ;;  %v4218_v7 = vmul.f32 -1.442695, %v3509_v15  ;;  %v8666_v4 = vld [vmem:[#allocation79_spill] sm:$0xff] }
 0x3b8   :  { %v7780_v54 = vpop.eup %4778  ;;  %4798 = vpow2.f32 %v4211_v57  ;;  %v3452_v43 = vmul.f32 %v6987_v30, %v8658_v41  ;;  %v3514_v5 = vadd.f32 %v3450_v17, %v6989_v50  ;;  %v4219_v20 = vmul.f32 -1.442695, %v3510_v40 }
 0x3b9   :  { %v7785_v12 = vpop.eup %4780  ;;  %4800 = vpow2.f32 %v4212_v18  ;;  %v3453_v63 = vmul.f32 %v6987_v30, %v8659_v13  ;;  %v3515_v37 = vadd.f32 %v3451_v48, %v6989_v50  ;;  %v4220_v62 = vmul.f32 -1.442695, %v3511_v33  ;;  %v8669_v13 = vld [vmem:[#allocation44_spill] sm:$0xff] }
 0x3ba   :  { %v7790_v0 = vpop.eup %4782  ;;  %4802 = vpow2.f32 %v4213_v58  ;;  %v3454_v28 = vmul.f32 %v6987_v30, %v8660_v35  ;;  %v3516_v47 = vadd.f32 %v3452_v43, %v6989_v50  ;;  %v4221_v42 = vmul.f32 -1.442695, %v3512_v34  ;;  %v8664_v58 = vld [vmem:[#allocation76_spill] sm:$0xff]  ;;  %v8667_v34 = vld [vmem:[#allocation81_spill] sm:$0xff] }
 0x3bb   :  { %v7795_v44 = vpop.eup %4784  ;;  %4804 = vpow2.f32 %v4214_v36  ;;  %v3455_v51 = vmul.f32 %v6987_v30, %v8661_v22  ;;  %v3517_v23 = vadd.f32 %v3453_v63, %v6989_v50  ;;  %v4222_v59 = vmul.f32 -1.442695, %v3513_v25 }
 0x3bc   :  { %v7800_v11 = vpop.eup %4786  ;;  %4806 = vpow2.f32 %v4215_v6  ;;  %v3456_v55 = vmul.f32 %v6987_v30, %v8662_v61  ;;  %v3518_v57 = vadd.f32 %v3454_v28, %v6989_v50  ;;  %v4223_v45 = vmul.f32 -1.442695, %v3514_v5  ;;  %v8670_v28 = vld [vmem:[#allocation45_spill] sm:$0xff] }
 0x3bd   :  { %v7805_v46 = vpop.eup %4788  ;;  %4808 = vpow2.f32 %v4216_v56  ;;  %v3457_v18 = vmul.f32 %v6987_v30, %v8663_v14  ;;  %v3519_v2 = vadd.f32 %v3455_v51, %v6989_v50  ;;  %v4224_v27 = vmul.f32 -1.442695, %v3515_v37 }
 0x3be   :  { %v7810_v26 = vpop.eup %4790  ;;  %4810 = vpow2.f32 %v4217_v38  ;;  %v3458_v16 = vmul.f32 %v6987_v30, %v8664_v58  ;;  %v3520_v3 = vadd.f32 %v3456_v55, %v6989_v50  ;;  %v4225_v15 = vmul.f32 -1.442695, %v3516_v47  ;;  %v8673_v58 = vld [vmem:[#allocation62_spill] sm:$0xff] }
 0x3bf   :  { %v7815_v1 = vpop.eup %4792  ;;  %4812 = vpow2.f32 %v4218_v7  ;;  %v3459_v19 = vmul.f32 %v6987_v30, %v8665_v9  ;;  %v3521_v40 = vadd.f32 %v3457_v18, %v6989_v50  ;;  %v4226_v6 = vmul.f32 -1.442695, %v3517_v23  ;;  %v8668_v7 = vld [vmem:[#allocation80_spill] sm:$0xff]  ;;  %v8671_v23 = vld [vmem:[#allocation51_spill] sm:$0xff] }
 0x3c0   :  { %v7820_v32 = vpop.eup %4794  ;;  %4814 = vpow2.f32 %v4219_v20  ;;  %v3460_v33 = vmul.f32 %v6987_v30, %v8666_v4  ;;  %v3522_v56 = vadd.f32 %v3458_v16, %v6989_v50  ;;  %v4227_v31 = vmul.f32 -1.442695, %v3518_v57 }
 0x3c1   :  { %v7825_v8 = vpop.eup %4796  ;;  %4816 = vpow2.f32 %v4220_v62  ;;  %v3461_v38 = vmul.f32 %v6987_v30, %v8667_v34  ;;  %v3523_v29 = vadd.f32 %v3459_v19, %v6989_v50  ;;  %v4228_v48 = vmul.f32 -1.442695, %v3519_v2  ;;  %v8674_v19 = vld [vmem:[#allocation82_spill] sm:$0xff] }
 0x3c2   :  { %v7830_v60 = vpop.eup %4798  ;;  %4818 = vpow2.f32 %v4221_v42  ;;  %v3462_v41 = vmul.f32 %v6987_v30, %v8668_v7  ;;  %v3524_v43 = vadd.f32 %v3460_v33, %v6989_v50  ;;  %v4229_v5 = vmul.f32 -1.442695, %v3520_v3 }
 0x3c3   :  { %v7835_v36 = vpop.eup %4800  ;;  %4820 = vpow2.f32 %v4222_v59  ;;  %v3463_v63 = vmul.f32 %v6987_v30, %v8669_v13  ;;  %v3525_v37 = vadd.f32 %v3461_v38, %v6989_v50  ;;  %v4230_v62 = vmul.f32 -1.442695, %v3521_v40  ;;  %v8677_v13 = vld [vmem:[#allocation67_spill] sm:$0xff] }
 0x3c4   :  { %v7840_v21 = vpop.eup %4802  ;;  %4822 = vpow2.f32 %v4223_v45  ;;  %v3464_v47 = vmul.f32 %v6987_v30, %v8670_v28  ;;  %v3526_v42 = vadd.f32 %v3462_v41, %v6989_v50  ;;  %v4231_v22 = vmul.f32 -1.442695, %v3522_v56  ;;  %v8672_v45 = vld [vmem:[#allocation50_spill] sm:$0xff]  ;;  %v8675_v56 = vld [vmem:[#allocation63_spill] sm:$0xff] }
 0x3c5   :  { %v7845_v17 = vpop.eup %4804  ;;  %4824 = vpow2.f32 %v4224_v27  ;;  %v3465_v59 = vmul.f32 %v6987_v30, %v8671_v23  ;;  %v3527_v61 = vadd.f32 %v3463_v63, %v6989_v50  ;;  %v4232_v55 = vmul.f32 -1.442695, %v3523_v29 }
 0x3c6   :  { %v7850_v25 = vpop.eup %4806  ;;  %4826 = vpow2.f32 %v4225_v15  ;;  %v3466_v14 = vmul.f32 %v6987_v30, %v8672_v45  ;;  %v3528_v18 = vadd.f32 %v3464_v47, %v6989_v50  ;;  %v4233_v2 = vmul.f32 -1.442695, %v3524_v43  ;;  %v8678_v47 = vld [vmem:[#allocation68_spill] sm:$0xff] }
 0x3c7   :  { %v7855_v20 = vpop.eup %4808  ;;  %4828 = vpow2.f32 %v4226_v6  ;;  %v3467_v16 = vmul.f32 %v6987_v30, %v8673_v58  ;;  %v3529_v3 = vadd.f32 %v3465_v59, %v6989_v50  ;;  %v4234_v15 = vmul.f32 -1.442695, %v3525_v37 }
 0x3c8   :  { %v7860_v35 = vpop.eup %4810  ;;  %4830 = vpow2.f32 %v4227_v31  ;;  %v3468_v40 = vmul.f32 %v6987_v30, %v8674_v19  ;;  %v3530_v6 = vadd.f32 %v3466_v14, %v6989_v50  ;;  %v4235_v4 = vmul.f32 -1.442695, %v3526_v42  ;;  %v8681_v19 = vld [vmem:[#allocation89_spill] sm:$0xff] }
 0x3c9   :  { %v7865_v51 = vpop.eup %4812  ;;  %4832 = vpow2.f32 %v4228_v48  ;;  %v3469_v31 = vmul.f32 %v6987_v30, %v8675_v56  ;;  %v3531_v34 = vadd.f32 %v3467_v16, %v6989_v50  ;;  %v4236_v38 = vmul.f32 -1.442695, %v3527_v61  ;;  %v8676_v48 = vld [vmem:[#allocation85_spill] sm:$0xff]  ;;  %v8679_v61 = vld [vmem:[#allocation88_spill] sm:$0xff] }
 0x3ca   :  { %v7870_v57 = vpop.eup %4814  ;;  %4834 = vpow2.f32 %v4229_v5  ;;  %v3470_v7 = vmul.f32 %v6987_v30, %v8676_v48  ;;  %v3532_v41 = vadd.f32 %v3468_v40, %v6989_v50  ;;  %v4237_v43 = vmul.f32 -1.442695, %v3528_v18 }
 0x3cb   :  { %v7875_v27 = vpop.eup %4816  ;;  %4836 = vpow2.f32 %v4230_v62  ;;  %v3471_v63 = vmul.f32 %v6987_v30, %v8677_v13  ;;  %v3533_v37 = vadd.f32 %v3469_v31, %v6989_v50  ;;  %v4238_v62 = vmul.f32 -1.442695, %v3529_v3  ;;  %v8682_v31 = vld [vmem:[#allocation90_spill] sm:$0xff] }
 0x3cc   :  { %v7880_v9 = vpop.eup %4818  ;;  %4838 = vpow2.f32 %v4231_v22  ;;  %v3472_v42 = vmul.f32 %v6987_v30, %v8678_v47  ;;  %v3534_v22 = vadd.f32 %v3470_v7, %v6989_v50  ;;  %v4239_v23 = vmul.f32 -1.442695, %v3530_v6 }
 0x3cd   :  { %v7885_v33 = vpop.eup %4820  ;;  %4840 = vpow2.f32 %v4232_v55  ;;  %v3473_v55 = vmul.f32 %v6987_v30, %v8679_v61  ;;  %v3535_v45 = vadd.f32 %v3471_v63, %v6989_v50  ;;  %v4240_v14 = vmul.f32 -1.442695, %v3531_v34 }
 0x3ce   :  { %v7890_v29 = vpop.eup %4822  ;;  %4842 = vpow2.f32 %v4233_v2  ;;  %v8680_v2 = vld [vmem:[#allocation87_spill] sm:$0xff]  ;;  %v3536_v16 = vadd.f32 %v3472_v42, %v6989_v50  ;;  %v4241_v3 = vmul.f32 -1.442695, %v3532_v41  ;;  %v3475_v40 = vmul.f32 %v6987_v30, %v8681_v19  ;;  %v8683_v41 = vld [vmem:[#allocation94_spill] sm:$0xff] }
 0x3cf   :  { %v7895_v5 = vpop.eup %4824  ;;  %4844 = vpow2.f32 %v4234_v15  ;;  %v3474_v58 = vmul.f32 %v6987_v30, %v8680_v2  ;;  %v3537_v6 = vadd.f32 %v3473_v55, %v6989_v50  ;;  %v3476_v34 = vmul.f32 %v6987_v30, %v8682_v31 }
 0x3d0   :  { %v7900_v28 = vpop.eup %4826  ;;  %4846 = vpow2.f32 %v4235_v4  ;;  %v4242_v4 = vmul.f32 -1.442695, %v3533_v37  ;;  %v4243_v48 = vmul.f32 -1.442695, %v3534_v22  ;;  %v3539_v13 = vadd.f32 %v3475_v40, %v6989_v50  ;;  %v8684_v37 = vld [vmem:[#allocation93_spill] sm:$0xff]  ;;  %v8685_v22 = vld [vmem:[#allocation96_spill] sm:$0xff] }
 0x3d1   :  { %v7905_v59 = vpop.eup %4828  ;;  %4848 = vpow2.f32 %v4236_v38  ;;  %v3538_v38 = vadd.f32 %v3474_v58, %v6989_v50  ;;  %v4244_v63 = vmul.f32 -1.442695, %v3535_v45  ;;  %v3478_v47 = vmul.f32 %v6987_v30, %v8684_v37  ;;  %v8686_v45 = vld [vmem:[#allocation97_spill] sm:$0xff] }
 0x3d2   :  { %v7910_v18 = vpop.eup %4830  ;;  %4850 = vpow2.f32 %v4237_v43  ;;  %v3477_v43 = vmul.f32 %v6987_v30, %v8683_v41  ;;  %v3540_v42 = vadd.f32 %v3476_v34, %v6989_v50  ;;  %v4245_v61 = vmul.f32 -1.442695, %v3536_v16  ;;  %v8687_v16 = vld [vmem:[#allocation99_spill] sm:$0xff] }
 0x3d3   :  { %v7915_v15 = vpop.eup %4832  ;;  %4852 = vpow2.f32 %v4238_v62  ;;  %v3479_v55 = vmul.f32 %v6987_v30, %v8685_v22  ;;  %v4246_v58 = vmul.f32 -1.442695, %v3537_v6  ;;  %v3480_v19 = vmul.f32 %v6987_v30, %v8686_v45  ;;  %v8689_v6 = vld [vmem:[#allocation98_spill] sm:$0xff] }
 0x3d4   :  { %v7920_v56 = vpop.eup %4834  ;;  %4854 = vpow2.f32 %v4239_v23  ;;  %v3541_v2 = vadd.f32 %v3477_v43, %v6989_v50  ;;  %v3542_v40 = vadd.f32 %v3478_v47, %v6989_v50  ;;  %v4247_v31 = vmul.f32 -1.442695, %v3538_v38  ;;  %v8691_v38 = vld [vmem:[#allocation100_spill] sm:$0xff] }
 0x3d5   :  { %v7925_v7 = vpop.eup %4836  ;;  %4856 = vpow2.f32 %v4240_v14  ;;  %v3481_v34 = vmul.f32 %v6987_v30, %v8687_v16  ;;  %v3543_v41 = vadd.f32 %v3479_v55, %v6989_v50  ;;  %v4248_v43 = vmul.f32 -1.442695, %v3539_v13  ;;  %v8693_v13 = vld [vmem:[#allocation102_spill] sm:$0xff] }
 0x3d6   :  { %v7930_v62 = vpop.eup %4838  ;;  %4858 = vpow2.f32 %v4241_v3  ;;  %v3482_v37 = vmul.f32 %v6987_v30, %v8689_v6  ;;  %v3544_v22 = vadd.f32 %v3480_v19, %v6989_v50  ;;  %v4249_v47 = vmul.f32 -1.442695, %v3540_v42  ;;  %v8695_v42 = vld [vmem:[#allocation101_spill] sm:$0xff] }
 0x3d7   :  { %v7935_v23 = vpop.eup %4840  ;;  %4860 = vpow2.f32 %v4242_v4  ;;  %v3483_v45 = vmul.f32 %v6987_v30, %v8691_v38  ;;  %v3545_v16 = vadd.f32 %v3481_v34, %v6989_v50  ;;  %v4250_v55 = vmul.f32 -1.442695, %v3541_v2  ;;  %v8696_v2 = vld [vmem:[#allocation103_spill] sm:$0xff] }
 0x3d8   :  { %v7940_v14 = vpop.eup %4842  ;;  %4862 = vpow2.f32 %v4243_v48  ;;  %v3546_v6 = vadd.f32 %v3482_v37, %v6989_v50  ;;  %v4251_v19 = vmul.f32 -1.442695, %v3542_v40  ;;  %v4252_v34 = vmul.f32 -1.442695, %v3543_v41 }
 0x3d9   :  { %v7945_v3 = vpop.eup %4844  ;;  %4864 = vpow2.f32 %v4244_v63  ;;  %v3547_v38 = vadd.f32 %v3483_v45, %v6989_v50  ;;  %v4253_v37 = vmul.f32 -1.442695, %v3544_v22 }
 0x3da   :  { %v7950_v4 = vpop.eup %4846  ;;  %4866 = vpow2.f32 %v4245_v61  ;;  %v4255_v41 = vmul.f32 -1.442695, %v3546_v6  ;;  %v3744_v6 = vadd.f32 1.0, %v7752_v39 }
 0x3db   :  { %8688 = vst [vmem:[#allocation9_spill] sm:$0xff] %v7950_v4  ;;  %v7955_v48 = vpop.eup %4848  ;;  %4868 = vpow2.f32 %v4246_v58  ;;  %v3484_v4 = vmul.f32 %v6987_v30, %v8693_v13 }
 0x3dc   :  { %8690 = vst [vmem:[#allocation13_spill] sm:$0xff] %v7955_v48  ;;  %v7960_v63 = vpop.eup %4850  ;;  %4870 = vpow2.f32 %v4247_v31  ;;  %v3485_v48 = vmul.f32 %v6987_v30, %v8695_v42 }
 0x3dd   :  { %8692 = vst [vmem:[#allocation14_spill] sm:$0xff] %v7960_v63  ;;  %v7965_v61 = vpop.eup %4852  ;;  %4872 = vpow2.f32 %v4248_v43  ;;  %v3486_v63 = vmul.f32 %v6987_v30, %v8696_v2  ;;  %v3548_v13 = vadd.f32 %v3484_v4, %v6989_v50  ;;  %v4256_v30 = vmul.f32 -1.442695, %v3547_v38 }
 0x3de   :  { %8694 = vst [vmem:[#allocation16_spill] sm:$0xff] %v7965_v61  ;;  %v7970_v58 = vpop.eup %4854  ;;  %4874 = vpow2.f32 %v4249_v47  ;;  %v3549_v40 = vadd.f32 %v3485_v48, %v6989_v50  ;;  %v4254_v61 = vmul.f32 -1.442695, %v3545_v16 }
 0x3df   :  { %v7975_v31 = vpop.eup %4856  ;;  %4876 = vpow2.f32 %v4250_v55  ;;  %v3550_v43 = vadd.f32 %v3486_v63, %v6989_v50  ;;  %v4257_v4 = vmul.f32 -1.442695, %v3548_v13  ;;  %v3743_v50 = vadd.f32 1.0, %v7744_v52 }
 0x3e0   :  { %v7978_v42 = vpop.eup %4858  ;;  %4878 = vpow2.f32 %v4251_v19  ;;  %v4258_v47 = vmul.f32 -1.442695, %v3549_v40  ;;  %v3748_v40 = vadd.f32 1.0, %v7780_v54  ;;  %v3752_v54 = vadd.f32 1.0, %v7800_v11 }
 0x3e1   :  { %v7981_v45 = vpop.eup %4860  ;;  %4880 = vpow2.f32 %v4252_v34  ;;  %v4259_v16 = vmul.f32 -1.442695, %v3550_v43  ;;  %v3746_v34 = vadd.f32 1.0, %v7770_v49  ;;  %v3749_v43 = vadd.f32 1.0, %v7785_v12 }
 0x3e2   :  { %v7983_v2 = vpop.eup %4862  ;;  %4882 = vpow2.f32 %v4253_v37  ;;  %v3747_v37 = vadd.f32 1.0, %v7775_v10  ;;  %v3751_v10 = vadd.f32 1.0, %v7795_v44  ;;  %v3753_v12 = vadd.f32 1.0, %v7805_v46 }
 0x3e3   :  { %v7985_v22 = vpop.eup %4864  ;;  %4884 = vpow2.f32 %v4254_v61  ;;  %v3745_v61 = vadd.f32 1.0, %v7761_v53  ;;  %v3755_v44 = vadd.f32 1.0, %v7815_v1  ;;  %v3756_v11 = vadd.f32 1.0, %v7820_v32 }
 0x3e4   :  { %v7987_v48 = vpop.eup %4866  ;;  %4886 = vpow2.f32 %v4255_v41  ;;  %v3750_v41 = vadd.f32 1.0, %v7790_v0  ;;  %v3754_v0 = vadd.f32 1.0, %v7810_v26  ;;  %v3760_v32 = vadd.f32 1.0, %v7840_v21 }
 0x3e5   :  { %v7989_v55 = vpop.eup %4868  ;;  %4888 = vpow2.f32 %v4256_v30  ;;  %v3762_v21 = vadd.f32 1.0, %v7850_v25  ;;  %v3764_v25 = vadd.f32 1.0, %v7860_v35  ;;  %v3766_v35 = vadd.f32 1.0, %v7870_v57 }
 0x3e6   :  { %v7992_v63 = vpop.eup %4870  ;;  %4890 = vpow2.f32 %v4257_v4  ;;  %v3768_v57 = vadd.f32 1.0, %v7880_v9  ;;  %v3770_v9 = vadd.f32 1.0, %v7890_v29  ;;  %v3772_v29 = vadd.f32 1.0, %v7900_v28 }
 0x3e7   :  { %v7995_v19 = vpop.eup %4872  ;;  %4892 = vpow2.f32 %v4258_v47  ;;  %v3774_v28 = vadd.f32 1.0, %v7910_v18  ;;  %v3776_v18 = vadd.f32 1.0, %v7920_v56  ;;  %v3778_v56 = vadd.f32 1.0, %v7930_v62 }
 0x3e8   :  { %v7998_v38 = vpop.eup %4874  ;;  %4894 = vpow2.f32 %v4259_v16  ;;  %v3780_v62 = vadd.f32 1.0, %v7940_v14 }
 0x3e9   :  { %v8001_v13 = vpop.eup %4876  ;;  %4896 = vrcp.f32 %v3743_v50 }
 0x3ea   :  { %v8004_v52 = vpop.eup %4878  ;;  %4898 = vrcp.f32 %v3744_v6 }
 0x3eb   :  { %v8007_v39 = vpop.eup %4880  ;;  %4900 = vrcp.f32 %v3745_v61  ;;  %v3757_v61 = vadd.f32 1.0, %v7825_v8 }
 0x3ec   :  { %v8010_v53 = vpop.eup %4882  ;;  %4902 = vrcp.f32 %v3746_v34  ;;  %v3758_v34 = vadd.f32 1.0, %v7830_v60  ;;  %v3761_v60 = vadd.f32 1.0, %v7845_v17  ;;  %v3763_v17 = vadd.f32 1.0, %v7855_v20 }
 0x3ed   :  { %v8013_v49 = vpop.eup %4884  ;;  %4904 = vrcp.f32 %v3747_v37  ;;  %v3765_v20 = vadd.f32 1.0, %v7865_v51  ;;  %v3767_v51 = vadd.f32 1.0, %v7875_v27  ;;  %v3769_v27 = vadd.f32 1.0, %v7885_v33 }
 0x3ee   :  { %v8016_v30 = vpop.eup %4886  ;;  %4906 = vrcp.f32 %v3748_v40  ;;  %v3759_v40 = vadd.f32 1.0, %v7835_v36  ;;  %v3771_v33 = vadd.f32 1.0, %v7895_v5  ;;  %v3773_v5 = vadd.f32 1.0, %v7905_v59 }
 0x3ef   :  { %v8019_v4 = vpop.eup %4888  ;;  %4908 = vrcp.f32 %v3749_v43  ;;  %v3775_v59 = vadd.f32 1.0, %v7915_v15  ;;  %v3777_v15 = vadd.f32 1.0, %v7925_v7  ;;  %v3779_v7 = vadd.f32 1.0, %v7935_v23 }
 0x3f0   :  { %v8022_v47 = vpop.eup %4890  ;;  %4910 = vrcp.f32 %v3750_v41  ;;  %v3781_v23 = vadd.f32 1.0, %v7945_v3 }
 0x3f1   :  { %v8025_v16 = vpop.eup %4892  ;;  %4912 = vrcp.f32 %v3751_v10 }
 0x3f2   :  { %v8028_v50 = vpop.eup %4894  ;;  %4914 = vrcp.f32 %v3752_v54 }
 0x3f3   :  { %v4897_v6 = vpop.eup %4896  ;;  %4916 = vrcp.f32 %v3753_v12 }
 0x3f4   :  { %v4899_v46 = vpop.eup %4898  ;;  %4918 = vrcp.f32 %v3754_v0  ;;  %v3935_v26 = vmax.f32 %v4897_v6, %v7322_v24 }
 0x3f5   :  { %v4901_v37 = vpop.eup %4900  ;;  %4920 = vrcp.f32 %v3755_v44  ;;  %v3936_v1 = vmax.f32 %v4899_v46, %v7322_v24 }
 0x3f6   :  { %v4903_v43 = vpop.eup %4902  ;;  %4922 = vrcp.f32 %v3756_v11  ;;  %v3937_v41 = vmax.f32 %v4901_v37, %v7322_v24  ;;  %4260 = vst [vmem:[%s8341_s4 + $0x200] sm:$0xff] %v3935_v26 }
 0x3f7   :  { %v4905_v8 = vpop.eup %4904  ;;  %4924 = vrcp.f32 %v3757_v61  ;;  %v3938_v10 = vmax.f32 %v4903_v43, %v7322_v24  ;;  %4261 = vst [vmem:[%s8341_s4 + $0x208] sm:$0xff] %v3936_v1 }
 0x3f8   :  { %v4907_v36 = vpop.eup %4906  ;;  %4926 = vrcp.f32 %v3758_v34  ;;  %v3939_v54 = vmax.f32 %v4905_v8, %v7322_v24  ;;  %4262 = vst [vmem:[%s8341_s4 + $0x210] sm:$0xff] %v3937_v41 }
 0x3f9   :  { %v4909_v12 = vpop.eup %4908  ;;  %4928 = vrcp.f32 %v3759_v40  ;;  %v3940_v0 = vmax.f32 %v4907_v36, %v7322_v24  ;;  %4263 = vst [vmem:[%s8341_s4 + $0x218] sm:$0xff] %v3938_v10 }
 0x3fa   :  { %v4911_v44 = vpop.eup %4910  ;;  %4930 = vrcp.f32 %v3760_v32  ;;  %v3941_v11 = vmax.f32 %v4909_v12, %v7322_v24  ;;  %4264 = vst [vmem:[%s8341_s4 + $0x220] sm:$0xff] %v3939_v54 }
 0x3fb   :  { %v4913_v6 = vpop.eup %4912  ;;  %4932 = vrcp.f32 %v3761_v60  ;;  %v3942_v61 = vmax.f32 %v4911_v44, %v7322_v24  ;;  %4265 = vst [vmem:[%s8341_s4 + $0x228] sm:$0xff] %v3940_v0 }
 0x3fc   :  { %v4915_v46 = vpop.eup %4914  ;;  %4934 = vrcp.f32 %v3762_v21  ;;  %v3943_v34 = vmax.f32 %v4913_v6, %v7322_v24  ;;  %4266 = vst [vmem:[%s8341_s4 + $0x230] sm:$0xff] %v3941_v11 }
 0x3fd   :  { %v4917_v26 = vpop.eup %4916  ;;  %4936 = vrcp.f32 %v3763_v17  ;;  %v3944_v37 = vmax.f32 %v4915_v46, %v7322_v24  ;;  %4267 = vst [vmem:[%s8341_s4 + $0x238] sm:$0xff] %v3942_v61 }
 0x3fe   :  { %v4919_v40 = vpop.eup %4918  ;;  %4938 = vrcp.f32 %v3764_v25  ;;  %v3945_v1 = vmax.f32 %v4917_v26, %v7322_v24  ;;  %4268 = vst [vmem:[%s8341_s4 + $0x240] sm:$0xff] %v3943_v34 }
 0x3ff   :  { %v4921_v43 = vpop.eup %4920  ;;  %4940 = vrcp.f32 %v3765_v20  ;;  %v3946_v32 = vmax.f32 %v4919_v40, %v7322_v24  ;;  %4269 = vst [vmem:[%s8341_s4 + $0x248] sm:$0xff] %v3944_v37 }
 0x400   :  { %v4923_v41 = vpop.eup %4922  ;;  %4942 = vrcp.f32 %v3766_v35  ;;  %v3947_v8 = vmax.f32 %v4921_v43, %v7322_v24  ;;  %4270 = vst [vmem:[%s8341_s4 + $0x250] sm:$0xff] %v3945_v1  ;;  %v8697_v43 = vld [vmem:[#allocation9_spill] sm:$0xff] }
 0x401   :  { %v4925_v60 = vpop.eup %4924  ;;  %4944 = vrcp.f32 %v3767_v51  ;;  %v3948_v10 = vmax.f32 %v4923_v41, %v7322_v24  ;;  %4271 = vst [vmem:[%s8341_s4 + $0x258] sm:$0xff] %v3946_v32  ;;  %v3782_v14 = vadd.f32 1.0, %v8697_v43  ;;  %v8698_v41 = vld [vmem:[#allocation13_spill] sm:$0xff] }
 0x402   :  { %v4927_v36 = vpop.eup %4926  ;;  %4946 = vrcp.f32 %v3768_v57  ;;  %v3949_v21 = vmax.f32 %v4925_v60, %v7322_v24  ;;  %4272 = vst [vmem:[%s8341_s4 + $0x260] sm:$0xff] %v3947_v8  ;;  %v3783_v3 = vadd.f32 1.0, %v8698_v41  ;;  %v8699_v60 = vld [vmem:[#allocation14_spill] sm:$0xff] }
 0x403   :  { %v4929_v54 = vpop.eup %4928  ;;  %4948 = vrcp.f32 %v3769_v27  ;;  %v3950_v12 = vmax.f32 %v4927_v36, %v7322_v24  ;;  %4273 = vst [vmem:[%s8341_s4 + $0x268] sm:$0xff] %v3948_v10 }
 0x404   :  { %v4931_v17 = vpop.eup %4930  ;;  %4950 = vrcp.f32 %v3770_v9  ;;  %v3951_v0 = vmax.f32 %v4929_v54, %v7322_v24  ;;  %4274 = vst [vmem:[%s8341_s4 + $0x270] sm:$0xff] %v3949_v21 }
 0x405   :  { %v4933_v44 = vpop.eup %4932  ;;  %4952 = vrcp.f32 %v3771_v33  ;;  %v3952_v25 = vmax.f32 %v4931_v17, %v7322_v24  ;;  %4275 = vst [vmem:[%s8341_s4 + $0x278] sm:$0xff] %v3950_v12  ;;  %v3784_v33 = vadd.f32 1.0, %v8699_v60  ;;  %v3786_v12 = vadd.f32 1.0, %v7970_v58 }
 0x406   :  { %v4935_v11 = vpop.eup %4934  ;;  %4954 = vrcp.f32 %v3772_v29  ;;  %v3953_v6 = vmax.f32 %v4933_v44, %v7322_v24  ;;  %4276 = vst [vmem:[%s8341_s4 + $0x280] sm:$0xff] %v3951_v0  ;;  %v8700_v29 = vld [vmem:[#allocation16_spill] sm:$0xff]  ;;  %v3787_v0 = vadd.f32 1.0, %v7975_v31  ;;  %v3788_v58 = vadd.f32 1.0, %v7978_v42 }
 0x407   :  { %v4937_v20 = vpop.eup %4936  ;;  %4956 = vrcp.f32 %v3773_v5  ;;  %v3954_v61 = vmax.f32 %v4935_v11, %v7322_v24  ;;  %4277 = vst [vmem:[%s8341_s4 + $0x288] sm:$0xff] %v3952_v25  ;;  %v3785_v21 = vadd.f32 1.0, %v8700_v29  ;;  %v3789_v31 = vadd.f32 1.0, %v7981_v45 }
 0x408   :  { %v4939_v46 = vpop.eup %4938  ;;  %4958 = vrcp.f32 %v3774_v28  ;;  %v3955_v35 = vmax.f32 %v4937_v20, %v7322_v24  ;;  %4278 = vst [vmem:[%s8341_s4 + $0x290] sm:$0xff] %v3953_v6  ;;  %v3790_v42 = vadd.f32 1.0, %v7983_v2  ;;  %v3791_v45 = vadd.f32 1.0, %v7985_v22 }
 0x409   :  { %v4941_v34 = vpop.eup %4940  ;;  %4960 = vrcp.f32 %v3775_v59  ;;  %v3956_v26 = vmax.f32 %v4939_v46, %v7322_v24  ;;  %4279 = vst [vmem:[%s8341_s4 + $0x298] sm:$0xff] %v3954_v61  ;;  %v3792_v2 = vadd.f32 1.0, %v7987_v48  ;;  %v3793_v22 = vadd.f32 1.0, %v7989_v55 }
 0x40a   :  { %v4943_v51 = vpop.eup %4942  ;;  %4962 = vrcp.f32 %v3776_v18  ;;  %v3957_v37 = vmax.f32 %v4941_v34, %v7322_v24  ;;  %4280 = vst [vmem:[%s8341_s4 + $0x2a0] sm:$0xff] %v3955_v35  ;;  %v3794_v48 = vadd.f32 1.0, %v7992_v63  ;;  %v3795_v55 = vadd.f32 1.0, %v7995_v19 }
 0x40b   :  { %v4945_v40 = vpop.eup %4944  ;;  %4964 = vrcp.f32 %v3777_v15  ;;  %v3958_v57 = vmax.f32 %v4943_v51, %v7322_v24  ;;  %4281 = vst [vmem:[%s8341_s4 + $0x2a8] sm:$0xff] %v3956_v26  ;;  %v3796_v63 = vadd.f32 1.0, %v7998_v38  ;;  %v3797_v19 = vadd.f32 1.0, %v8001_v13 }
 0x40c   :  { %v4947_v1 = vpop.eup %4946  ;;  %4966 = vrcp.f32 %v3778_v56  ;;  %v3959_v27 = vmax.f32 %v4945_v40, %v7322_v24  ;;  %4282 = vst [vmem:[%s8341_s4 + $0x2b0] sm:$0xff] %v3957_v37  ;;  %v3798_v38 = vadd.f32 1.0, %v8004_v52  ;;  %v3799_v13 = vadd.f32 1.0, %v8007_v39 }
 0x40d   :  { %v4949_v32 = vpop.eup %4948  ;;  %4968 = vrcp.f32 %v3779_v7  ;;  %v3960_v9 = vmax.f32 %v4947_v1, %v7322_v24  ;;  %4283 = vst [vmem:[%s8341_s4 + $0x2b8] sm:$0xff] %v3958_v57  ;;  %v3800_v52 = vadd.f32 1.0, %v8010_v53  ;;  %v3801_v39 = vadd.f32 1.0, %v8013_v49 }
 0x40e   :  { %v4951_v8 = vpop.eup %4950  ;;  %4970 = vrcp.f32 %v3780_v62  ;;  %v3961_v10 = vmax.f32 %v4949_v32, %v7322_v24  ;;  %4284 = vst [vmem:[%s8341_s4 + $0x2c0] sm:$0xff] %v3959_v27  ;;  %v3802_v53 = vadd.f32 1.0, %v8016_v30  ;;  %v3803_v49 = vadd.f32 1.0, %v8019_v4 }
 0x40f   :  { %v4953_v36 = vpop.eup %4952  ;;  %4972 = vrcp.f32 %v3781_v23  ;;  %v3962_v54 = vmax.f32 %v4951_v8, %v7322_v24  ;;  %4285 = vst [vmem:[%s8341_s4 + $0x2c8] sm:$0xff] %v3960_v9  ;;  %v3804_v30 = vadd.f32 1.0, %v8022_v47  ;;  %v3805_v4 = vadd.f32 1.0, %v8025_v16 }
 0x410   :  { %v4955_v5 = vpop.eup %4954  ;;  %4974 = vrcp.f32 %v3782_v14  ;;  %v3963_v17 = vmax.f32 %v4953_v36, %v7322_v24  ;;  %4286 = vst [vmem:[%s8341_s4 + $0x2d0] sm:$0xff] %v3961_v10  ;;  %v3806_v47 = vadd.f32 1.0, %v8028_v50 }
 0x411   :  { %v4957_v28 = vpop.eup %4956  ;;  %4976 = vrcp.f32 %v3783_v3  ;;  %v3964_v44 = vmax.f32 %v4955_v5, %v7322_v24  ;;  %4287 = vst [vmem:[%s8341_s4 + $0x2d8] sm:$0xff] %v3962_v54 }
 0x412   :  { %v4959_v59 = vpop.eup %4958  ;;  %4978 = vrcp.f32 %v3784_v33  ;;  %v3965_v25 = vmax.f32 %v4957_v28, %v7322_v24  ;;  %4288 = vst [vmem:[%s8341_s4 + $0x2e0] sm:$0xff] %v3963_v17 }
 0x413   :  { %v4961_v11 = vpop.eup %4960  ;;  %4980 = vrcp.f32 %v3785_v21  ;;  %v3966_v18 = vmax.f32 %v4959_v59, %v7322_v24  ;;  %4289 = vst [vmem:[%s8341_s4 + $0x2e8] sm:$0xff] %v3964_v44 }
 0x414   :  { %v4963_v6 = vpop.eup %4962  ;;  %4982 = vrcp.f32 %v3786_v12  ;;  %v3967_v20 = vmax.f32 %v4961_v11, %v7322_v24  ;;  %4290 = vst [vmem:[%s8341_s4 + $0x2f0] sm:$0xff] %v3965_v25 }
 0x415   :  { %v4965_v15 = vpop.eup %4964  ;;  %4984 = vrcp.f32 %v3787_v0  ;;  %v3968_v61 = vmax.f32 %v4963_v6, %v7322_v24  ;;  %4291 = vst [vmem:[%s8341_s4 + $0x2f8] sm:$0xff] %v3966_v18 }
 0x416   :  { %v4967_v46 = vpop.eup %4966  ;;  %4986 = vrcp.f32 %v3788_v58  ;;  %v3969_v56 = vmax.f32 %v4965_v15, %v7322_v24  ;;  %4292 = vst [vmem:[%s8341_s4 + $0x300] sm:$0xff] %v3967_v20 }
 0x417   :  { %v4969_v35 = vpop.eup %4968  ;;  %4988 = vrcp.f32 %v3789_v31  ;;  %v3970_v34 = vmax.f32 %v4967_v46, %v7322_v24  ;;  %4293 = vst [vmem:[%s8341_s4 + $0x308] sm:$0xff] %v3968_v61 }
 0x418   :  { %v4971_v7 = vpop.eup %4970  ;;  %4990 = vrcp.f32 %v3790_v42  ;;  %v3971_v26 = vmax.f32 %v4969_v35, %v7322_v24  ;;  %4294 = vst [vmem:[%s8341_s4 + $0x310] sm:$0xff] %v3969_v56 }
 0x419   :  { %v4973_v51 = vpop.eup %4972  ;;  %4992 = vrcp.f32 %v3791_v45  ;;  %v3972_v62 = vmax.f32 %v4971_v7, %v7322_v24  ;;  %4295 = vst [vmem:[%s8341_s4 + $0x318] sm:$0xff] %v3970_v34 }
 0x41a   :  { %v4975_v37 = vpop.eup %4974  ;;  %4994 = vrcp.f32 %v3792_v2  ;;  %v3973_v40 = vmax.f32 %v4973_v51, %v7322_v24  ;;  %4296 = vst [vmem:[%s8341_s4 + $0x320] sm:$0xff] %v3971_v26 }
 0x41b   :  { %v4977_v23 = vpop.eup %4976  ;;  %4996 = vrcp.f32 %v3793_v22  ;;  %v3974_v57 = vmax.f32 %v4975_v37, %v7322_v24  ;;  %4297 = vst [vmem:[%s8341_s4 + $0x328] sm:$0xff] %v3972_v62 }
 0x41c   :  { %v4979_v1 = vpop.eup %4978  ;;  %4998 = vrcp.f32 %v3794_v48  ;;  %v3975_v43 = vmax.f32 %v4977_v23, %v7322_v24  ;;  %4298 = vst [vmem:[%s8341_s4 + $0x330] sm:$0xff] %v3973_v40 }
 0x41d   :  { %v4981_v14 = vpop.eup %4980  ;;  %5000 = vrcp.f32 %v3795_v55  ;;  %v3976_v27 = vmax.f32 %v4979_v1, %v7322_v24  ;;  %4299 = vst [vmem:[%s8341_s4 + $0x338] sm:$0xff] %v3974_v57 }
 0x41e   :  { %v4983_v32 = vpop.eup %4982  ;;  %5002 = vrcp.f32 %v3796_v63  ;;  %v3977_v41 = vmax.f32 %v4981_v14, %v7322_v24  ;;  %4300 = vst [vmem:[%s8341_s4 + $0x340] sm:$0xff] %v3975_v43 }
 0x41f   :  { %v4985_v3 = vpop.eup %4984  ;;  %5004 = vrcp.f32 %v3797_v19  ;;  %v3978_v9 = vmax.f32 %v4983_v32, %v7322_v24  ;;  %4301 = vst [vmem:[%s8341_s4 + $0x348] sm:$0xff] %v3976_v27 }
 0x420   :  { %v4987_v8 = vpop.eup %4986  ;;  %5006 = vrcp.f32 %v3798_v38  ;;  %v3979_v60 = vmax.f32 %v4985_v3, %v7322_v24  ;;  %4302 = vst [vmem:[%s8341_s4 + $0x350] sm:$0xff] %v3977_v41 }
 0x421   :  { %v4989_v33 = vpop.eup %4988  ;;  %5008 = vrcp.f32 %v3799_v13  ;;  %v3980_v10 = vmax.f32 %v4987_v8, %v7322_v24  ;;  %4303 = vst [vmem:[%s8341_s4 + $0x358] sm:$0xff] %v3978_v9 }
 0x422   :  { %v4991_v36 = vpop.eup %4990  ;;  %5010 = vrcp.f32 %v3800_v52  ;;  %v3981_v29 = vmax.f32 %v4989_v33, %v7322_v24  ;;  %4304 = vst [vmem:[%s8341_s4 + $0x360] sm:$0xff] %v3979_v60 }
 0x423   :  { %v4993_v21 = vpop.eup %4992  ;;  %5012 = vrcp.f32 %v3801_v39  ;;  %v3982_v54 = vmax.f32 %v4991_v36, %v7322_v24  ;;  %4305 = vst [vmem:[%s8341_s4 + $0x368] sm:$0xff] %v3980_v10 }
 0x424   :  { %v4995_v5 = vpop.eup %4994  ;;  %5014 = vrcp.f32 %v3802_v53  ;;  %v3983_v12 = vmax.f32 %v4993_v21, %v7322_v24  ;;  %4306 = vst [vmem:[%s8341_s4 + $0x370] sm:$0xff] %v3981_v29 }
 0x425   :  { %v4997_v17 = vpop.eup %4996  ;;  %5016 = vrcp.f32 %v3803_v49  ;;  %v3984_v16 = vmax.f32 %v4995_v5, %v7322_v24  ;;  %4307 = vst [vmem:[%s8341_s4 + $0x378] sm:$0xff] %v3982_v54 }
 0x426   :  { %v4999_v28 = vpop.eup %4998  ;;  %5018 = vrcp.f32 %v3804_v30  ;;  %v3985_v0 = vmax.f32 %v4997_v17, %v7322_v24  ;;  %4308 = vst [vmem:[%s8341_s4 + $0x380] sm:$0xff] %v3983_v12 }
 0x427   :  { %v5001_v50 = vpop.eup %5000  ;;  %5020 = vrcp.f32 %v3805_v4  ;;  %v3986_v44 = vmax.f32 %v4999_v28, %v7322_v24  ;;  %4309 = vst [vmem:[%s8341_s4 + $0x388] sm:$0xff] %v3984_v16 }
 0x428   :  { %v5003_v59 = vpop.eup %5002  ;;  %5022 = vrcp.f32 %v3806_v47  ;;  %v3987_v58 = vmax.f32 %v5001_v50, %v7322_v24  ;;  %4310 = vst [vmem:[%s8341_s4 + $0x390] sm:$0xff] %v3985_v0 }
 0x429   :  { %v5005_v25 = vpop.eup %5004  ;;  %v3988_v11 = vmax.f32 %v5003_v59, %v7322_v24  ;;  %4311 = vst [vmem:[%s8341_s4 + $0x398] sm:$0xff] %v3986_v44 }
 0x42a   :  { %v5007_v31 = vpop.eup %5006  ;;  %v3989_v18 = vmax.f32 %v5005_v25, %v7322_v24  ;;  %4312 = vst [vmem:[%s8341_s4 + $0x3a0] sm:$0xff] %v3987_v58 }
 0x42b   :  { %v5009_v6 = vpop.eup %5008  ;;  %v3990_v42 = vmax.f32 %v5007_v31, %v7322_v24  ;;  %4313 = vst [vmem:[%s8341_s4 + $0x3a8] sm:$0xff] %v3988_v11 }
 0x42c   :  { %v5011_v20 = vpop.eup %5010  ;;  %v3991_v15 = vmax.f32 %v5009_v6, %v7322_v24  ;;  %4314 = vst [vmem:[%s8341_s4 + $0x3b0] sm:$0xff] %v3989_v18 }
 0x42d   :  { %v5013_v45 = vpop.eup %5012  ;;  %v3992_v61 = vmax.f32 %v5011_v20, %v7322_v24  ;;  %4315 = vst [vmem:[%s8341_s4 + $0x3b8] sm:$0xff] %v3990_v42 }
 0x42e   :  { %v5015_v46 = vpop.eup %5014  ;;  %v3993_v2 = vmax.f32 %v5013_v45, %v7322_v24  ;;  %4316 = vst [vmem:[%s8341_s4 + $0x3c0] sm:$0xff] %v3991_v15 }
 0x42f   :  { %v5017_v56 = vpop.eup %5016  ;;  %v3994_v35 = vmax.f32 %v5015_v46, %v7322_v24  ;;  %4317 = vst [vmem:[%s8341_s4 + $0x3c8] sm:$0xff] %v3992_v61 }
 0x430   :  { %v5019_v22 = vpop.eup %5018  ;;  %v3995_v34 = vmax.f32 %v5017_v56, %v7322_v24  ;;  %4318 = vst [vmem:[%s8341_s4 + $0x3d0] sm:$0xff] %v3993_v2 }
 0x431   :  { %v5021_v7 = vpop.eup %5020  ;;  %v3996_v48 = vmax.f32 %v5019_v22, %v7322_v24  ;;  %4319 = vst [vmem:[%s8341_s4 + $0x3d8] sm:$0xff] %v3994_v35 }
 0x432   :  { %v5023_v26 = vpop.eup %5022  ;;  %v3997_v51 = vmax.f32 %v5021_v7, %v7322_v24  ;;  %4320 = vst [vmem:[%s8341_s4 + $0x3e0] sm:$0xff] %v3995_v34 }
 0x433   :  { %v3998_v55 = vmax.f32 %v5023_v26, %v7322_v24  ;;  %4321 = vst [vmem:[%s8341_s4 + $0x3e8] sm:$0xff] %v3996_v48 }
 0x434   :  { %4322 = vst [vmem:[%s8341_s4 + $0x3f0] sm:$0xff] %v3997_v51 }
 0x435   :  { %4323 = vst [vmem:[%s8341_s4 + $0x3f8] sm:$0xff] %v3998_v55 }

</bundles_post_ra>
